<compile_context>
chip_gen: v5e
topology: v5e:2x2
jax: 0.10.0
libtpu: 0.0.40
codegen_flags: <defaults>
</compile_context>

<pallas_src>
import jax
import jax.numpy as jnp
from jax.experimental import pallas as pl
from jax.experimental.pallas import tpu as pltpu


def _round_up(v, m):
    return (v + m - 1) // m * m


def _cdiv(a, b):
    return (a + b - 1) // b


def _make_kernel(BB, C_pad, TN, H, F_pad, n_true, pt_total, pt_per_split,
                 n_splits, need_mask, compute_dtype):
    n_total_tiles = n_splits * pt_per_split

    def kernel(x_ref, w1t_ref, b1_ref, w2t_ref, b2_ref, o_ref):
        s = pl.program_id(0)
        ni = pl.program_id(2)

        # Output block is resident across the innermost ("arbitrary") point-tile axis.
        # Init to 0: every activation is post-ReLU, hence >= 0.
        @pl.when(ni == 0)
        def _init():
            o_ref[...] = jnp.zeros_like(o_ref)

        w1t = w1t_ref[...]                                  # (H, C_pad)   compute_dtype
        w2t = w2t_ref[...]                                  # (F_pad, H)   compute_dtype
        # Hoisted bias broadcasts (JAX does not CSE broadcast_in_dim inside the
        # statically unrolled batch loop).
        b1b = jnp.broadcast_to(b1_ref[...], (H, TN))        # f32
        b2b = jnp.broadcast_to(b2_ref[...], (F_pad, TN))    # f32

        gt = s * pt_per_split + ni                          # global point-tile index

        def tile_max(apply_mask):
            if apply_mask:
                col = jax.lax.broadcasted_iota(jnp.int32, (1, TN), 1)
                valid = (gt * TN + col) < n_true            # (1, TN)
            rows = []
            for b in range(BB):                             # static unroll, BB is small
                xb = x_ref[b]                               # (C_pad, TN), points on lanes
                # Layer 1 (1x1 conv) on the MXU: (H, C_pad) @ (C_pad, TN).
                h1 = jnp.dot(w1t, xb, preferred_element_type=jnp.float32)
                h1 = jnp.maximum(h1 + b1b, 0.0).astype(compute_dtype)
                # Layer 2 on the MXU: (F_pad, H) @ (H, TN), f32 accumulation.
                h2 = jnp.dot(w2t, h1, preferred_element_type=jnp.float32)
                h2 = jnp.maximum(h2 + b2b, 0.0)             # >= 0
                if apply_mask:
                    # Zero padded points; safe because real activations are >= 0.
                    h2 = jnp.where(valid, h2, 0.0)
                rows.append(jnp.max(h2, axis=1))            # (F_pad,)
            return jnp.stack(rows, axis=0)                  # (BB, F_pad)

        def update(apply_mask):
            o_ref[0] = jnp.maximum(o_ref[0], tile_max(apply_mask))

        if not need_mask:
            update(False)
        elif n_total_tiles == 1:
            update(True)
        else:
            # Only tiles at/after the ragged point boundary contain padded points;
            # gate the mask there so earlier tiles skip the compare+select entirely.
            ragged = gt >= (pt_total - 1)

            @pl.when(ragged)
            def _masked():
                update(True)

            @pl.when(jnp.logical_not(ragged))
            def _unmasked():
                update(False)

    return kernel


def meta_template_forward(x, w1, b1, w2, b2, *, block_b=8, block_n=1024,
                          compute_dtype=jnp.bfloat16):
    """MetaTemplate.forward: x (B, N, C_in) -> features (B, F).

    Equivalent to x.permute(0, 2, 1) followed by the PointNet-style backbone:
    max_over_points( relu( relu(x @ w1 + b1) @ w2 + b2 ) ).
    """
    B, N, C_in = x.shape
    H = w1.shape[1]
    F = w2.shape[1]

    # ---- Tiling -------------------------------------------------------------------
    C_pad = _round_up(C_in, 8)                  # layer-1 contraction dim (sublanes)
    F_pad = _round_up(F, 128)                   # lane-dense output features

    BB = max(8, _round_up(block_b, 8))
    # Keep >= 2 batch tiles where possible so v7x's two TensorCores both get work.
    while BB > 8 and _cdiv(_round_up(B, 8), BB) < 2:
        BB -= 8
    B_pad = _round_up(B, BB)
    batch_tiles = B_pad // BB

    # Point tile: lane dimension, multiple of 128, up to the full (padded) point count.
    # (Cap BB*TN ~ 8K rows per step; raise block_n for very large clouds if MXU-bound.)
    TN = min(_round_up(max(block_n, 128), 128), _round_up(N, 128))
    pt_total = _cdiv(N, TN)

    # If the batch axis has only one tile, split the point range into a leading size-2
    # "parallel" grid axis so a v7x megacore can shard the work across both cores.
    n_splits = 1
    if batch_tiles == 1:
        if pt_total >= 2:
            n_splits = 2
        elif TN >= 256:
            TN //= 2                             # still a multiple of 128
            pt_total = _cdiv(N, TN)
            n_splits = 2 if pt_total >= 2 else 1
    pt_per_split = _cdiv(pt_total, n_splits)
    n_total_tiles = n_splits * pt_per_split
    N_pad = n_total_tiles * TN
    need_mask = (N_pad != N)

    # ---- Operand prep (the transpose below IS the module's own x.permute(0, 2, 1)) ----
    x_t = jnp.transpose(x, (0, 2, 1)).astype(compute_dtype)                   # (B, C, N)
    x_t = jnp.pad(x_t, ((0, B_pad - B), (0, C_pad - C_in), (0, N_pad - N)))
    w1t = jnp.pad(w1.T.astype(compute_dtype), ((0, 0), (0, C_pad - C_in)))    # (H, C_pad)
    b1c = b1.astype(jnp.float32).reshape(H, 1)
    w2t = jnp.pad(w2.T.astype(compute_dtype), ((0, F_pad - F), (0, 0)))       # (F_pad, H)
    b2c = jnp.pad(b2.astype(jnp.float32), (0, F_pad - F)).reshape(F_pad, 1)

    kernel = _make_kernel(BB, C_pad, TN, H, F_pad, N, pt_total, pt_per_split,
                          n_splits, need_mask, compute_dtype)

    # ---- Explicit VMEM budget (v5e default scoped VMEM is 16 MiB; v7x physical 64) ----
    bpe = jnp.dtype(compute_dtype).itemsize
    x_tile_bytes = BB * max(C_pad, 16) * TN * bpe            # sublane-padded x tile
    interm_bytes = 3 * (H + F_pad) * TN * 4                  # h1/h2 temps + bias bcasts
    resident = (H * 128 + F_pad * max(H, 128)) * bpe + (H + F_pad) * 128 * 4
    vmem_est = 2 * x_tile_bytes + interm_bytes + 2 * resident + 2 * BB * F_pad * 4
    vmem_limit = int(max(32 << 20, min(2 * vmem_est, 56 << 20)))

    grid = (n_splits, batch_tiles, pt_per_split)
    out = pl.pallas_call(
        kernel,
        out_shape=jax.ShapeDtypeStruct((n_splits, B_pad, F_pad), jnp.float32),
        grid_spec=pltpu.PrefetchScalarGridSpec(
            num_scalar_prefetch=0,
            grid=grid,
            in_specs=[
                pl.BlockSpec((BB, C_pad, TN),
                             lambda s, bi, ni: (bi, 0, s * pt_per_split + ni)),  # x tile
                pl.BlockSpec((H, C_pad), lambda s, bi, ni: (0, 0)),     # W1^T (resident)
                pl.BlockSpec((H, 1), lambda s, bi, ni: (0, 0)),         # b1
                pl.BlockSpec((F_pad, H), lambda s, bi, ni: (0, 0)),     # W2^T (resident)
                pl.BlockSpec((F_pad, 1), lambda s, bi, ni: (0, 0)),     # b2
            ],
            out_specs=pl.BlockSpec((1, BB, F_pad), lambda s, bi, ni: (s, bi, 0)),
        ),
        compiler_params=pltpu.CompilerParams(
            dimension_semantics=("parallel", "parallel", "arbitrary"),
            vmem_limit_bytes=vmem_limit),
    )(x_t, w1t, b1c, w2t, b2c)

    res = out[0] if n_splits == 1 else jnp.max(out, axis=0)
    return res[:B, :F]


def _reference(x, w1, b1, w2, b2, compute_dtype):
    # Mirrors the kernel's numerics: operands rounded to compute_dtype, f32 accumulation.
    xf = x.astype(compute_dtype).astype(jnp.float32)
    w1f = w1.astype(compute_dtype).astype(jnp.float32)
    w2f = w2.astype(compute_dtype).astype(jnp.float32)
    h1 = jnp.maximum(jnp.einsum("bnc,ch->bnh", xf, w1f) + b1, 0.0)
    h1 = h1.astype(compute_dtype).astype(jnp.float32)
    h2 = jnp.maximum(jnp.einsum("bnh,hf->bnf", h1, w2f) + b2, 0.0)
    return jnp.max(h2, axis=1)


if __name__ == "__main__":
    key = jax.random.PRNGKey(0)

    def run_case(B, N, C_in, H, F, case_key, **kw):
        ks = jax.random.split(case_key, 5)
        x = jax.random.normal(ks[0], (B, N, C_in), dtype=jnp.float32)
        w1 = jax.random.normal(ks[1], (C_in, H), dtype=jnp.float32) * 0.1
        b1 = jax.random.normal(ks[2], (H,), dtype=jnp.float32) * 0.01
        w2 = jax.random.normal(ks[3], (H, F), dtype=jnp.float32) * 0.1
        b2 = jax.random.normal(ks[4], (F,), dtype=jnp.float32) * 0.01

        out = jax.block_until_ready(meta_template_forward(x, w1, b1, w2, b2, **kw))
        ref = _reference(x, w1, b1, w2, b2, jnp.bfloat16)
        assert out.shape == (B, F), out.shape
        assert jnp.allclose(out, ref, atol=2e-3, rtol=2e-3), "mismatch vs reference"

    k1, k2, k3 = jax.random.split(key, 3)
    # Aligned case: 2 batch tiles, single point tile, no masking.
    run_case(B=16, N=256, C_in=3, H=128, F=128, case_key=k1)
    # Unaligned case: batch/point/feature padding, single batch tile -> 2-way point split.
    run_case(B=5, N=200, C_in=3, H=64, F=96, case_key=k2)
    # Multi point-tile case: exercises running max across point tiles + gated pad mask.
    run_case(B=8, N=384, C_in=3, H=64, F=128, case_key=k3, block_n=128)

    print("KERNEL_OK")
</pallas_src>

<mosaic_0001>
module attributes {stable_mosaic.version = 11 : i64} {
  func.func @kernel(%arg0: i32, %arg1: i32, %arg2: i32, %arg3: memref<8x8x256xbf16, #tpu.memory_space<vmem>>, %arg4: memref<128x8xbf16, #tpu.memory_space<vmem>>, %arg5: memref<128x1xf32, #tpu.memory_space<vmem>>, %arg6: memref<128x128xbf16, #tpu.memory_space<vmem>>, %arg7: memref<128x1xf32, #tpu.memory_space<vmem>>, %arg8: memref<1x8x128xf32, #tpu.memory_space<vmem>>) attributes {dimension_semantics = [#tpu.dimension_semantics<parallel>, #tpu.dimension_semantics<parallel>, #tpu.dimension_semantics<arbitrary>], iteration_bounds = array<i64: 1, 2, 1>, scalar_prefetch = 0 : i64, scratch_operands = 0 : i64, tpu.core_type = #tpu.core_type<tc>, window_params = [{transform_indices = @transform_0, window_bounds = array<i64: 8, 8, 256>}, {pipeline_mode = #tpu.pipeline_mode<synchronous>, transform_indices = @transform_1, window_bounds = array<i64: 128, 8>}, {pipeline_mode = #tpu.pipeline_mode<synchronous>, transform_indices = @transform_2, window_bounds = array<i64: 128, 1>}, {pipeline_mode = #tpu.pipeline_mode<synchronous>, transform_indices = @transform_3, window_bounds = array<i64: 128, 128>}, {pipeline_mode = #tpu.pipeline_mode<synchronous>, transform_indices = @transform_4, window_bounds = array<i64: 128, 1>}, {transform_indices = @transform_5, window_bounds = array<i64: 1, 8, 128>}]} {
    %c0_i32 = arith.constant 0 : i32
    %0 = arith.cmpi eq, %arg2, %c0_i32 : i32
    %1 = arith.extui %0 : i1 to i32
    %c0_i32_0 = arith.constant 0 : i32
    %2 = arith.cmpi ne, %1, %c0_i32_0 : i32
    scf.if %2 {
      %cst_70 = arith.constant 0.000000e+00 : f32
      %122 = vector.broadcast %cst_70 : f32 to vector<1x8x128xf32>
      %c0_71 = arith.constant 0 : index
      %c0_72 = arith.constant 0 : index
      %c0_73 = arith.constant 0 : index
      %123 = vector.load %arg8[%c0_71, %c0_72, %c0_73] : memref<1x8x128xf32, #tpu.memory_space<vmem>>, vector<1x8x128xf32>
      tpu.vector_store %arg8[%c0_71, %c0_72, %c0_73], %122 {strides = array<i32>} : memref<1x8x128xf32, #tpu.memory_space<vmem>>, vector<1x8x128xf32>,
    } else {
    }
    %c0 = arith.constant 0 : index
    %c0_1 = arith.constant 0 : index
    %3 = vector.load %arg4[%c0, %c0_1] : memref<128x8xbf16, #tpu.memory_space<vmem>>, vector<128x8xbf16>
    %c0_2 = arith.constant 0 : index
    %c0_3 = arith.constant 0 : index
    %4 = vector.load %arg6[%c0_2, %c0_3] : memref<128x128xbf16, #tpu.memory_space<vmem>>, vector<128x128xbf16>
    %c0_4 = arith.constant 0 : index
    %c0_5 = arith.constant 0 : index
    %5 = vector.load %arg5[%c0_4, %c0_5] : memref<128x1xf32, #tpu.memory_space<vmem>>, vector<128x1xf32>
    %6 = vector.shape_cast %5 : vector<128x1xf32> to vector<128x1xf32>
    %7 = vector.broadcast %6 : vector<128x1xf32> to vector<128x256xf32>
    %c0_6 = arith.constant 0 : index
    %c0_7 = arith.constant 0 : index
    %8 = vector.load %arg7[%c0_6, %c0_7] : memref<128x1xf32, #tpu.memory_space<vmem>>, vector<128x1xf32>
    %9 = vector.shape_cast %8 : vector<128x1xf32> to vector<128x1xf32>
    %10 = vector.broadcast %9 : vector<128x1xf32> to vector<128x256xf32>
    %c0_8 = arith.constant 0 : index
    %c0_9 = arith.constant 0 : index
    %c0_10 = arith.constant 0 : index
    %11 = vector.load %arg8[%c0_8, %c0_9, %c0_10] : memref<1x8x128xf32, #tpu.memory_space<vmem>>, vector<1x8x128xf32>
    %12 = vector.shape_cast %11 : vector<1x8x128xf32> to vector<8x128xf32>
    %c0_11 = arith.constant 0 : index
    %c0_12 = arith.constant 0 : index
    %c0_13 = arith.constant 0 : index
    %13 = vector.load %arg3[%c0_11, %c0_12, %c0_13] : memref<8x8x256xbf16, #tpu.memory_space<vmem>>, vector<1x8x256xbf16>
    %14 = vector.shape_cast %13 : vector<1x8x256xbf16> to vector<8x256xbf16>
    %cst = arith.constant dense<0.000000e+00> : vector<128x256xf32>
    %15 = tpu.matmul %3, %14, %cst {dimension_numbers = #tpu.dot_dimension_numbers<[1], [0], [0], [1], [0, 0, 1, 1], [], []>} : vector<128x8xbf16>, vector<8x256xbf16>, vector<128x256xf32> -> vector<128x256xf32>
    %16 = arith.addf %15, %7 : vector<128x256xf32>
    %cst_14 = arith.constant 0.000000e+00 : f32
    %17 = vector.broadcast %cst_14 : f32 to vector<128x256xf32>
    %18 = arith.maximumf %16, %17 : vector<128x256xf32>
    %19 = arith.truncf %18 : vector<128x256xf32> to vector<128x256xbf16>
    %cst_15 = arith.constant dense<0.000000e+00> : vector<128x256xf32>
    %20 = tpu.matmul %4, %19, %cst_15 {dimension_numbers = #tpu.dot_dimension_numbers<[1], [0], [0], [1], [0, 0, 1, 1], [], []>} : vector<128x128xbf16>, vector<128x256xbf16>, vector<128x256xf32> -> vector<128x256xf32>
    %21 = arith.addf %20, %10 : vector<128x256xf32>
    %cst_16 = arith.constant 0.000000e+00 : f32
    %22 = vector.broadcast %cst_16 : f32 to vector<128x256xf32>
    %23 = arith.maximumf %21, %22 : vector<128x256xf32>
    %cst_17 = arith.constant dense<0xFF800000> : vector<128xf32>
    %24 = vector.multi_reduction <maximumf>, %23, %cst_17 [1] : vector<128x256xf32> to vector<128xf32>
    %c1 = arith.constant 1 : index
    %c0_18 = arith.constant 0 : index
    %c0_19 = arith.constant 0 : index
    %25 = vector.load %arg3[%c1, %c0_18, %c0_19] : memref<8x8x256xbf16, #tpu.memory_space<vmem>>, vector<1x8x256xbf16>
    %26 = vector.shape_cast %25 : vector<1x8x256xbf16> to vector<8x256xbf16>
    %cst_20 = arith.constant dense<0.000000e+00> : vector<128x256xf32>
    %27 = tpu.matmul %3, %26, %cst_20 {dimension_numbers = #tpu.dot_dimension_numbers<[1], [0], [0], [1], [0, 0, 1, 1], [], []>} : vector<128x8xbf16>, vector<8x256xbf16>, vector<128x256xf32> -> vector<128x256xf32>
    %28 = arith.addf %27, %7 : vector<128x256xf32>
    %cst_21 = arith.constant 0.000000e+00 : f32
    %29 = vector.broadcast %cst_21 : f32 to vector<128x256xf32>
    %30 = arith.maximumf %28, %29 : vector<128x256xf32>
    %31 = arith.truncf %30 : vector<128x256xf32> to vector<128x256xbf16>
    %cst_22 = arith.constant dense<0.000000e+00> : vector<128x256xf32>
    %32 = tpu.matmul %4, %31, %cst_22 {dimension_numbers = #tpu.dot_dimension_numbers<[1], [0], [0], [1], [0, 0, 1, 1], [], []>} : vector<128x128xbf16>, vector<128x256xbf16>, vector<128x256xf32> -> vector<128x256xf32>
    %33 = arith.addf %32, %10 : vector<128x256xf32>
    %cst_23 = arith.constant 0.000000e+00 : f32
    %34 = vector.broadcast %cst_23 : f32 to vector<128x256xf32>
    %35 = arith.maximumf %33, %34 : vector<128x256xf32>
    %cst_24 = arith.constant dense<0xFF800000> : vector<128xf32>
    %36 = vector.multi_reduction <maximumf>, %35, %cst_24 [1] : vector<128x256xf32> to vector<128xf32>
    %c2 = arith.constant 2 : index
    %c0_25 = arith.constant 0 : index
    %c0_26 = arith.constant 0 : index
    %37 = vector.load %arg3[%c2, %c0_25, %c0_26] : memref<8x8x256xbf16, #tpu.memory_space<vmem>>, vector<1x8x256xbf16>
    %38 = vector.shape_cast %37 : vector<1x8x256xbf16> to vector<8x256xbf16>
    %cst_27 = arith.constant dense<0.000000e+00> : vector<128x256xf32>
    %39 = tpu.matmul %3, %38, %cst_27 {dimension_numbers = #tpu.dot_dimension_numbers<[1], [0], [0], [1], [0, 0, 1, 1], [], []>} : vector<128x8xbf16>, vector<8x256xbf16>, vector<128x256xf32> -> vector<128x256xf32>
    %40 = arith.addf %39, %7 : vector<128x256xf32>
    %cst_28 = arith.constant 0.000000e+00 : f32
    %41 = vector.broadcast %cst_28 : f32 to vector<128x256xf32>
    %42 = arith.maximumf %40, %41 : vector<128x256xf32>
    %43 = arith.truncf %42 : vector<128x256xf32> to vector<128x256xbf16>
    %cst_29 = arith.constant dense<0.000000e+00> : vector<128x256xf32>
    %44 = tpu.matmul %4, %43, %cst_29 {dimension_numbers = #tpu.dot_dimension_numbers<[1], [0], [0], [1], [0, 0, 1, 1], [], []>} : vector<128x128xbf16>, vector<128x256xbf16>, vector<128x256xf32> -> vector<128x256xf32>
    %45 = arith.addf %44, %10 : vector<128x256xf32>
    %cst_30 = arith.constant 0.000000e+00 : f32
    %46 = vector.broadcast %cst_30 : f32 to vector<128x256xf32>
    %47 = arith.maximumf %45, %46 : vector<128x256xf32>
    %cst_31 = arith.constant dense<0xFF800000> : vector<128xf32>
    %48 = vector.multi_reduction <maximumf>, %47, %cst_31 [1] : vector<128x256xf32> to vector<128xf32>
    %c3 = arith.constant 3 : index
    %c0_32 = arith.constant 0 : index
    %c0_33 = arith.constant 0 : index
    %49 = vector.load %arg3[%c3, %c0_32, %c0_33] : memref<8x8x256xbf16, #tpu.memory_space<vmem>>, vector<1x8x256xbf16>
    %50 = vector.shape_cast %49 : vector<1x8x256xbf16> to vector<8x256xbf16>
    %cst_34 = arith.constant dense<0.000000e+00> : vector<128x256xf32>
    %51 = tpu.matmul %3, %50, %cst_34 {dimension_numbers = #tpu.dot_dimension_numbers<[1], [0], [0], [1], [0, 0, 1, 1], [], []>} : vector<128x8xbf16>, vector<8x256xbf16>, vector<128x256xf32> -> vector<128x256xf32>
    %52 = arith.addf %51, %7 : vector<128x256xf32>
    %cst_35 = arith.constant 0.000000e+00 : f32
    %53 = vector.broadcast %cst_35 : f32 to vector<128x256xf32>
    %54 = arith.maximumf %52, %53 : vector<128x256xf32>
    %55 = arith.truncf %54 : vector<128x256xf32> to vector<128x256xbf16>
    %cst_36 = arith.constant dense<0.000000e+00> : vector<128x256xf32>
    %56 = tpu.matmul %4, %55, %cst_36 {dimension_numbers = #tpu.dot_dimension_numbers<[1], [0], [0], [1], [0, 0, 1, 1], [], []>} : vector<128x128xbf16>, vector<128x256xbf16>, vector<128x256xf32> -> vector<128x256xf32>
    %57 = arith.addf %56, %10 : vector<128x256xf32>
    %cst_37 = arith.constant 0.000000e+00 : f32
    %58 = vector.broadcast %cst_37 : f32 to vector<128x256xf32>
    %59 = arith.maximumf %57, %58 : vector<128x256xf32>
    %cst_38 = arith.constant dense<0xFF800000> : vector<128xf32>
    %60 = vector.multi_reduction <maximumf>, %59, %cst_38 [1] : vector<128x256xf32> to vector<128xf32>
    %c4 = arith.constant 4 : index
    %c0_39 = arith.constant 0 : index
    %c0_40 = arith.constant 0 : index
    %61 = vector.load %arg3[%c4, %c0_39, %c0_40] : memref<8x8x256xbf16, #tpu.memory_space<vmem>>, vector<1x8x256xbf16>
    %62 = vector.shape_cast %61 : vector<1x8x256xbf16> to vector<8x256xbf16>
    %cst_41 = arith.constant dense<0.000000e+00> : vector<128x256xf32>
    %63 = tpu.matmul %3, %62, %cst_41 {dimension_numbers = #tpu.dot_dimension_numbers<[1], [0], [0], [1], [0, 0, 1, 1], [], []>} : vector<128x8xbf16>, vector<8x256xbf16>, vector<128x256xf32> -> vector<128x256xf32>
    %64 = arith.addf %63, %7 : vector<128x256xf32>
    %cst_42 = arith.constant 0.000000e+00 : f32
    %65 = vector.broadcast %cst_42 : f32 to vector<128x256xf32>
    %66 = arith.maximumf %64, %65 : vector<128x256xf32>
    %67 = arith.truncf %66 : vector<128x256xf32> to vector<128x256xbf16>
    %cst_43 = arith.constant dense<0.000000e+00> : vector<128x256xf32>
    %68 = tpu.matmul %4, %67, %cst_43 {dimension_numbers = #tpu.dot_dimension_numbers<[1], [0], [0], [1], [0, 0, 1, 1], [], []>} : vector<128x128xbf16>, vector<128x256xbf16>, vector<128x256xf32> -> vector<128x256xf32>
    %69 = arith.addf %68, %10 : vector<128x256xf32>
    %cst_44 = arith.constant 0.000000e+00 : f32
    %70 = vector.broadcast %cst_44 : f32 to vector<128x256xf32>
    %71 = arith.maximumf %69, %70 : vector<128x256xf32>
    %cst_45 = arith.constant dense<0xFF800000> : vector<128xf32>
    %72 = vector.multi_reduction <maximumf>, %71, %cst_45 [1] : vector<128x256xf32> to vector<128xf32>
    %c5 = arith.constant 5 : index
    %c0_46 = arith.constant 0 : index
    %c0_47 = arith.constant 0 : index
    %73 = vector.load %arg3[%c5, %c0_46, %c0_47] : memref<8x8x256xbf16, #tpu.memory_space<vmem>>, vector<1x8x256xbf16>
    %74 = vector.shape_cast %73 : vector<1x8x256xbf16> to vector<8x256xbf16>
    %cst_48 = arith.constant dense<0.000000e+00> : vector<128x256xf32>
    %75 = tpu.matmul %3, %74, %cst_48 {dimension_numbers = #tpu.dot_dimension_numbers<[1], [0], [0], [1], [0, 0, 1, 1], [], []>} : vector<128x8xbf16>, vector<8x256xbf16>, vector<128x256xf32> -> vector<128x256xf32>
    %76 = arith.addf %75, %7 : vector<128x256xf32>
    %cst_49 = arith.constant 0.000000e+00 : f32
    %77 = vector.broadcast %cst_49 : f32 to vector<128x256xf32>
    %78 = arith.maximumf %76, %77 : vector<128x256xf32>
    %79 = arith.truncf %78 : vector<128x256xf32> to vector<128x256xbf16>
    %cst_50 = arith.constant dense<0.000000e+00> : vector<128x256xf32>
    %80 = tpu.matmul %4, %79, %cst_50 {dimension_numbers = #tpu.dot_dimension_numbers<[1], [0], [0], [1], [0, 0, 1, 1], [], []>} : vector<128x128xbf16>, vector<128x256xbf16>, vector<128x256xf32> -> vector<128x256xf32>
    %81 = arith.addf %80, %10 : vector<128x256xf32>
    %cst_51 = arith.constant 0.000000e+00 : f32
    %82 = vector.broadcast %cst_51 : f32 to vector<128x256xf32>
    %83 = arith.maximumf %81, %82 : vector<128x256xf32>
    %cst_52 = arith.constant dense<0xFF800000> : vector<128xf32>
    %84 = vector.multi_reduction <maximumf>, %83, %cst_52 [1] : vector<128x256xf32> to vector<128xf32>
    %c6 = arith.constant 6 : index
    %c0_53 = arith.constant 0 : index
    %c0_54 = arith.constant 0 : index
    %85 = vector.load %arg3[%c6, %c0_53, %c0_54] : memref<8x8x256xbf16, #tpu.memory_space<vmem>>, vector<1x8x256xbf16>
    %86 = vector.shape_cast %85 : vector<1x8x256xbf16> to vector<8x256xbf16>
    %cst_55 = arith.constant dense<0.000000e+00> : vector<128x256xf32>
    %87 = tpu.matmul %3, %86, %cst_55 {dimension_numbers = #tpu.dot_dimension_numbers<[1], [0], [0], [1], [0, 0, 1, 1], [], []>} : vector<128x8xbf16>, vector<8x256xbf16>, vector<128x256xf32> -> vector<128x256xf32>
    %88 = arith.addf %87, %7 : vector<128x256xf32>
    %cst_56 = arith.constant 0.000000e+00 : f32
    %89 = vector.broadcast %cst_56 : f32 to vector<128x256xf32>
    %90 = arith.maximumf %88, %89 : vector<128x256xf32>
    %91 = arith.truncf %90 : vector<128x256xf32> to vector<128x256xbf16>
    %cst_57 = arith.constant dense<0.000000e+00> : vector<128x256xf32>
    %92 = tpu.matmul %4, %91, %cst_57 {dimension_numbers = #tpu.dot_dimension_numbers<[1], [0], [0], [1], [0, 0, 1, 1], [], []>} : vector<128x128xbf16>, vector<128x256xbf16>, vector<128x256xf32> -> vector<128x256xf32>
    %93 = arith.addf %92, %10 : vector<128x256xf32>
    %cst_58 = arith.constant 0.000000e+00 : f32
    %94 = vector.broadcast %cst_58 : f32 to vector<128x256xf32>
    %95 = arith.maximumf %93, %94 : vector<128x256xf32>
    %cst_59 = arith.constant dense<0xFF800000> : vector<128xf32>
    %96 = vector.multi_reduction <maximumf>, %95, %cst_59 [1] : vector<128x256xf32> to vector<128xf32>
    %c7 = arith.constant 7 : index
    %c0_60 = arith.constant 0 : index
    %c0_61 = arith.constant 0 : index
    %97 = vector.load %arg3[%c7, %c0_60, %c0_61] : memref<8x8x256xbf16, #tpu.memory_space<vmem>>, vector<1x8x256xbf16>
    %98 = vector.shape_cast %97 : vector<1x8x256xbf16> to vector<8x256xbf16>
    %cst_62 = arith.constant dense<0.000000e+00> : vector<128x256xf32>
    %99 = tpu.matmul %3, %98, %cst_62 {dimension_numbers = #tpu.dot_dimension_numbers<[1], [0], [0], [1], [0, 0, 1, 1], [], []>} : vector<128x8xbf16>, vector<8x256xbf16>, vector<128x256xf32> -> vector<128x256xf32>
    %100 = arith.addf %99, %7 : vector<128x256xf32>
    %cst_63 = arith.constant 0.000000e+00 : f32
    %101 = vector.broadcast %cst_63 : f32 to vector<128x256xf32>
    %102 = arith.maximumf %100, %101 : vector<128x256xf32>
    %103 = arith.truncf %102 : vector<128x256xf32> to vector<128x256xbf16>
    %cst_64 = arith.constant dense<0.000000e+00> : vector<128x256xf32>
    %104 = tpu.matmul %4, %103, %cst_64 {dimension_numbers = #tpu.dot_dimension_numbers<[1], [0], [0], [1], [0, 0, 1, 1], [], []>} : vector<128x128xbf16>, vector<128x256xbf16>, vector<128x256xf32> -> vector<128x256xf32>
    %105 = arith.addf %104, %10 : vector<128x256xf32>
    %cst_65 = arith.constant 0.000000e+00 : f32
    %106 = vector.broadcast %cst_65 : f32 to vector<128x256xf32>
    %107 = arith.maximumf %105, %106 : vector<128x256xf32>
    %cst_66 = arith.constant dense<0xFF800000> : vector<128xf32>
    %108 = vector.multi_reduction <maximumf>, %107, %cst_66 [1] : vector<128x256xf32> to vector<128xf32>
    %109 = vector.shape_cast %24 : vector<128xf32> to vector<1x128xf32>
    %110 = vector.shape_cast %36 : vector<128xf32> to vector<1x128xf32>
    %111 = vector.shape_cast %48 : vector<128xf32> to vector<1x128xf32>
    %112 = vector.shape_cast %60 : vector<128xf32> to vector<1x128xf32>
    %113 = vector.shape_cast %72 : vector<128xf32> to vector<1x128xf32>
    %114 = vector.shape_cast %84 : vector<128xf32> to vector<1x128xf32>
    %115 = vector.shape_cast %96 : vector<128xf32> to vector<1x128xf32>
    %116 = vector.shape_cast %108 : vector<128xf32> to vector<1x128xf32>
    %117 = tpu.concatenate %109, %110, %111, %112, %113, %114, %115, %116 in 0 : vector<1x128xf32>, vector<1x128xf32>, vector<1x128xf32>, vector<1x128xf32>, vector<1x128xf32>, vector<1x128xf32>, vector<1x128xf32>, vector<1x128xf32> -> vector<8x128xf32>
    %118 = arith.maximumf %12, %117 : vector<8x128xf32>
    %c0_67 = arith.constant 0 : index
    %c0_68 = arith.constant 0 : index
    %c0_69 = arith.constant 0 : index
    %119 = vector.load %arg8[%c0_67, %c0_68, %c0_69] : memref<1x8x128xf32, #tpu.memory_space<vmem>>, vector<1x8x128xf32>
    %120 = vector.shape_cast %119 : vector<1x8x128xf32> to vector<8x128xf32>
    %121 = vector.shape_cast %118 : vector<8x128xf32> to vector<1x8x128xf32>
    tpu.vector_store %arg8[%c0_67, %c0_68, %c0_69], %121 {strides = array<i32>} : memref<1x8x128xf32, #tpu.memory_space<vmem>>, vector<1x8x128xf32>,
    return
  }
  func.func @transform_0(%arg0: i32, %arg1: i32, %arg2: i32) -> (i32, i32, i32) {
    %c1_i32 = arith.constant 1 : i32
    %0 = arith.muli %arg0, %c1_i32 : i32
    %1 = arith.addi %0, %arg2 : i32
    %c0_i32 = arith.constant 0 : i32
    %c0_i32_0 = arith.constant 0 : i32
    return %arg1, %c0_i32, %1 : i32, i32, i32
  }
  func.func @transform_1(%arg0: i32, %arg1: i32, %arg2: i32) -> (i32, i32) {
    %c0_i32 = arith.constant 0 : i32
    %c0_i32_0 = arith.constant 0 : i32
    %c0_i32_1 = arith.constant 0 : i32
    return %c0_i32, %c0_i32_0 : i32, i32
  }
  func.func @transform_2(%arg0: i32, %arg1: i32, %arg2: i32) -> (i32, i32) {
    %c0_i32 = arith.constant 0 : i32
    %c0_i32_0 = arith.constant 0 : i32
    %c0_i32_1 = arith.constant 0 : i32
    return %c0_i32, %c0_i32_0 : i32, i32
  }
  func.func @transform_3(%arg0: i32, %arg1: i32, %arg2: i32) -> (i32, i32) {
    %c0_i32 = arith.constant 0 : i32
    %c0_i32_0 = arith.constant 0 : i32
    %c0_i32_1 = arith.constant 0 : i32
    return %c0_i32, %c0_i32_0 : i32, i32
  }
  func.func @transform_4(%arg0: i32, %arg1: i32, %arg2: i32) -> (i32, i32) {
    %c0_i32 = arith.constant 0 : i32
    %c0_i32_0 = arith.constant 0 : i32
    %c0_i32_1 = arith.constant 0 : i32
    return %c0_i32, %c0_i32_0 : i32, i32
  }
  func.func @transform_5(%arg0: i32, %arg1: i32, %arg2: i32) -> (i32, i32, i32) {
    %c0_i32 = arith.constant 0 : i32
    %c0_i32_0 = arith.constant 0 : i32
    return %arg0, %arg1, %c0_i32 : i32, i32, i32
  }
}

</mosaic_0001>

<bundles_post_ra>
// kernel: tpu_custom_call.1
= control target key start
LH: loop header
LB: loop body
LE: loop exit
PB: predicated region body
PF: predicated region fallthrough
CT: control target
= control target key end

     0   :  { %10 = vsyncpa [#allocation3], 0  ;;  %s6427_s0 = inlined_call_operand.vmem [shape: bf16[16,8,256], index: 0, kind: input, shape index: {}]   ;;  %s6428_s1 = inlined_call_operand.vmem [shape: bf16[128,8], index: 1, kind: input, shape index: {}]   ;;  %s6429_s2 = inlined_call_operand.vmem [shape: f32[128,1], index: 2, kind: input, shape index: {}]   ;;  %s6430_s3 = inlined_call_operand.vmem [shape: bf16[128,128], index: 3, kind: input, shape index: {}]   ;;  %s6431_s4 = inlined_call_operand.vmem [shape: f32[128,1], index: 4, kind: input, shape index: {}]   ;;  %s6432_s5 = inlined_call_operand.hbm [shape: f32[1,16,128], index: 5, kind: output, shape index: {}]  }
   0x1   :  { %12 = vsyncpa [#allocation3 + $0x1], 0  ;;  %s4282_s18 = smov 0   ;;  %s4284_s19 = smov 0  }
   0x2   :  { %s4286_s20 = smov 0   ;;  %s4288_s21 = smov 0  }
   0x3   :  { %s4290_s22 = smov 0   ;;  %s4292_s23 = smov 0  }
   0x4 LB: > { %s3839_s24 = sadd.s32 4294967295, %s4249_s23   ;;  %s3840_s25 = sadd.s32 4294967294, %s4249_s23   ;;  %s4249_s23 = sphi %s4292_s23, %s18_s23   ;;  %s4245_s22 = sphi %s4290_s22, %s6848_s22   ;;  %s4241_s21 = sphi %s4288_s21, %s6847_s21   ;;  %s4237_s20 = sphi %s4286_s20, %s6846_s20   ;;  %s4233_s19 = sphi %s4284_s19, %s6845_s19   ;;  %s4229_s18 = sphi %s4282_s18, %s6844_s18  }
   0x5   : > { %s33_s26 = sadd.s32 1, %s4245_s22  ;;  %s160_s27 = sadd.s32 1, %s4237_s20 }
   0x6   : > { %p35_p0 = scmp.ge.s32.totalorder %s33_s26, 2  ;;  %p170_p1 = scmp.ne.s32.totalorder %s4237_s20, %s4233_s19 }
   0x7   : > { %p171_p2 = scmp.eq.s32.totalorder %s3839_s24, 1  ;;  %p176_p3 = scmp.ne.s32.totalorder %s4233_s19, %s4229_s18 }
   0x8   : > { %s6850_s26 = smov (%p35_p0, %s33_s26), 0  ;;  %p177_p5 = scmp.eq.s32.totalorder %s3840_s25, 1 }
   0x9   : > { %p4320_p4 = por %p171_p2, %p170_p1  ;;  %s156_s29 = ssub.s32 %s4245_s22, %s6850_s26 }
   0xa   : > { %p3843_p6 = scmp.ge.s32.totalorder %s4249_s23, 1  ;;  %p158_p7 = scmp.eq.s32.totalorder %s156_s29, 0 }
   0xb   : > { %p4327_p8 = por %p177_p5, %p176_p3  ;;  %p224_p9 = scmp.lt.s32.totalorder %s4249_s23, 3 }
   0xc   : > { %s4333_s6 = scalar_select %p158_p7, %s4237_s20, %s160_s27  }
   0xd   : > { %p225_p10 = pnand %p3843_p6, %p224_p9 }
   0xf   : > { %228 = sbr.rel (%p225_p10) target bundleno = 1601 (0x641), region = 40 }
  0x14   : > { %v324_v0 = vld [vmem:[%s6429_s2 + $0x70] sm:$0xff]  ;;  %s4338_s9 = sshll.u32 %s4241_s21, 3  ;;  %v4251_v1 = vmov 0   ;;  %v322_v2 = vld [vmem:[%s6429_s2 + $0x60] sm:$0xff]  ;;  %v325_v4 = vld [vmem:[%s6429_s2 + $0x78] sm:$0xff]  ;;  %vm574_vm0 = vcmask 1043456  }
  0x15   : > { %4125 = vset.pattern.permute.xlu0 %v4251_v1  ;;  %p261_p11 = scmp.lt.s32.totalorder %s4338_s9, 15  ;;  %4127 = vset.pattern.permute.xlu2 %v4251_v1  ;;  %v320_v3 = vld [vmem:[%s6429_s2 + $0x50] sm:$0xff]  ;;  %v323_v8 = vld [vmem:[%s6429_s2 + $0x68] sm:$0xff]  ;;  %v321_v9 = vld [vmem:[%s6429_s2 + $0x58] sm:$0xff]  ;;  %vm549_vm1 = vcmask 64512   ;;  %vm3333_vm2 = vcmask 130112   ;;  %s3756_s13 = scalar_lea.hbm %s6432_s5, %s4338_s9 }
  0x16   : > { %398 = vperm.xlu0 %4125, %v324_v0   ;;  %4126 = vset.pattern.permute.xlu1 %v4251_v1  ;;  %v4368_v14 = vld [vmem:[%s6428_s1] sm:$0xff]  ;;  %v319_v16 = vld [vmem:[%s6429_s2 + $0x48] sm:$0xff]  ;;  %v316_v17 = vld [vmem:[%s6429_s2 + $0x30] sm:$0xff]  ;;  %vm3337_vm3 = vcmask 195712   ;;  %vm3341_vm4 = vcmask 261312   ;;  %vm3345_vm5 = vcmask 326912  }
  0x17   : > { %s262_s14 = scalar_select %p261_p11, %s4338_s9, 15  ;;  %388 = vperm.xlu1 %4126, %v322_v2   ;;  %378 = vperm.xlu2 %4127, %v320_v3   ;;  %v318_v15 = vld [vmem:[%s6429_s2 + $0x40] sm:$0xff]  ;;  %v317_v18 = vld [vmem:[%s6429_s2 + $0x38] sm:$0xff]  ;;  %v315_v19 = vld [vmem:[%s6429_s2 + $0x28] sm:$0xff]  ;;  %vm3349_vm6 = vcmask 392512   ;;  %vm3353_vm7 = vcmask 458112  }
  0x18   : > { %v314_v20 = vld [vmem:[%s6429_s2 + $0x20] sm:$0xff]  ;;  %v4395_v21 = vld [vmem:[%s6428_s1 + $0x8] sm:$0xff]  ;;  %v312_v22 = vld [vmem:[%s6429_s2 + $0x10] sm:$0xff]  ;;  %vm3357_vm8 = vcmask 523712   ;;  %vm3361_vm9 = vcmask 589312   ;;  %vm3365_vm10 = vcmask 654912  }
  0x19   : > { %s4051_s15 = sshll.u32 %s262_s14, 3  ;;  %v313_v23 = vld [vmem:[%s6429_s2 + $0x18] sm:$0xff]  ;;  %v310_v24 = vld [vmem:[%s6429_s2] sm:$0xff]  ;;  %v311_v25 = vld [vmem:[%s6429_s2 + $0x8] sm:$0xff]  ;;  %vm3369_vm11 = vcmask 720512   ;;  %vm3373_vm12 = vcmask 786112  }
  0x1a   : > { %s4351_s21 = scalar_lea.vmem %s6427_s0, %s4051_s15  ;;  %v4416_v26 = vld [vmem:[%s6428_s1 + $0x10] sm:$0xff]  ;;  %v4425_v27 = vld [vmem:[%s6428_s1 + $0x18] sm:$0xff]  ;;  %v406_v28 = vld [vmem:[%s6431_s4] sm:$0xff]  ;;  %vm3377_vm13 = vcmask 851712   ;;  %vm6543_vm14 = vcmask 917312   ;;  %vm6512_vm15 = vcmask 982912  }
  0x1b   : > { %v503_v5 = vld [vmem:[%s4351_s21] sm:$0xff]  ;;  %v408_v29 = vld [vmem:[%s6431_s4 + $0x10] sm:$0xff]  ;;  %v409_v30 = vld [vmem:[%s6431_s4 + $0x18] sm:$0xff]  ;;  %s255_s8 = sand.u32 1, %s4233_s19   ;;  %s3760_s16 = sshll.u32 %s3756_s13, 4  ;;  %s3761_s16 = int_to_ptr.hbm [resolvable:$true] %s3760_s16 }
  0x1c   : > { %v545_v6 = vunpack.c.l.b16 %v503_v5  ;;  %v546_v7 = vunpack.c.h.b16 %v503_v5  ;;  %v4443_v31 = vld [vmem:[%s6428_s1 + $0x20] sm:$0xff]  ;;  %v411_v32 = vld [vmem:[%s6431_s4 + $0x28] sm:$0xff]  ;;  %v412_v36 = vld [vmem:[%s6431_s4 + $0x30] sm:$0xff]  ;;  %s3844_s10 = sshll.u32 %s255_s8, 3  ;;  %s3744_s9 = scalar_lea.sflag [#allocation3], %s255_s8 }
  0x1d   : > { %v3928_v33 = vld [vmem:[%s4351_s21 + $0x8] sm:$0xff]  ;;  %v414_v41 = vld [vmem:[%s6431_s4 + $0x40] sm:$0xff]  ;;  %v417_v44 = vld [vmem:[%s6431_s4 + $0x58] sm:$0xff]  ;;  %s257_s14 = scalar_lea.vmem [#allocation2], %s3844_s10  ;;  %s4185_s17 = sshra.s32 %s3761_s16, 4  ;;  %s4186_s17 = int_to_ptr.hbm [resolvable:$true] %s4185_s17 }
  0x1e   : > { %403 = vperm.xlu0 %4125, %v325_v4   ;;  %v547_v10 = vpack.c.b16 %v545_v6, %v545_v6  ;;  %v548_v11 = vpack.c.b16 %v546_v7, %v546_v7  ;;  %v956_v34 = vunpack.c.l.b16 %v3928_v33  ;;  %v957_v35 = vunpack.c.h.b16 %v3928_v33  ;;  %v415_v42 = vld [vmem:[%s6431_s4 + $0x48] sm:$0xff]  ;;  %v418_v45 = vld [vmem:[%s6431_s4 + $0x60] sm:$0xff]  ;;  %v420_v46 = vld [vmem:[%s6431_s4 + $0x70] sm:$0xff]  ;;  %s3758_s15 = sshll.u32 %s257_s14, 4  ;;  %s4187_s24 = scalar_lea.hbm %s4186_s17, 8  ;;  %s3759_s15 = int_to_ptr.vmem [resolvable:$true] %s3758_s15 }
  0x1f   : > { %393 = vperm.xlu1 %4126, %v323_v8   ;;  %383 = vperm.xlu2 %4127, %v321_v9   ;;  %v4467_v43 = vld [vmem:[%s6428_s1 + $0x28] sm:$0xff]  ;;  %v421_v48 = vld [vmem:[%s6431_s4 + $0x78] sm:$0xff]  ;;  %v4491_v49 = vld [vmem:[%s6428_s1 + $0x30] sm:$0xff]  ;;  %p4188_p12 = scmp.ne.s32.totalorder %s4186_s17, %s4187_s24  ;;  %s4191_s27 = scalar_lea.hbm %s6432_s5, 16 }
  0x20   : > { %v576_v12 = vsel %vm574_vm0, %v547_v10, 0  ;;  %v579_v13 = vsel %vm574_vm0, %v548_v11, 0  ;;  %v958_v37 = vpack.c.b16 %v956_v34, %v956_v34  ;;  %v959_v38 = vpack.c.b16 %v957_v35, %v957_v35  ;;  %v407_v47 = vld [vmem:[%s6431_s4 + $0x8] sm:$0xff]  ;;  %v410_v50 = vld [vmem:[%s6431_s4 + $0x20] sm:$0xff]  ;;  %v413_v53 = vld [vmem:[%s6431_s4 + $0x38] sm:$0xff]  ;;  %p4192_p1 = scmp.lt.s32.totalorder %s4186_s17, %s6432_s5  ;;  %p4193_p2 = scmp.lt.s32.totalorder %s4191_s27, %s4187_s24 }
  0x21   : > { %588 = vmatpush.bf16.msra.mxu0 %v576_v12  ;;  %637 = vmatpush.bf16.msra.mxu1 %v579_v13  ;;  %v4516_v57 = vld [vmem:[%s6428_s1 + $0x38] sm:$0xff]  ;;  %v416_v58 = vld [vmem:[%s6431_s4 + $0x50] sm:$0xff]  ;;  %v419_v62 = vld [vmem:[%s6431_s4 + $0x68] sm:$0xff]  ;;  %p4189_p13 = pnand %p4188_p12, %p4320_p4 }
  0x22   : > { %v961_v39 = vsel %vm574_vm0, %v958_v37, 0  ;;  %v964_v40 = vsel %vm574_vm0, %v959_v38, 0  ;;  %p4194_p3 = por %p4193_p2, %p4192_p1 }
  0x23   : > { %p4190_p0 = pneg %p4189_p13 }
  0x24   : > { %3880 = vmatmul.msk.bf16.vlgmr.msra.gmra.mxu0 %vm549_vm1, %v4368_v14  ;;  %3888 = vmatmul.msk.bf16.vlgmr.msra.gmra.mxu1 %vm549_vm1, %v4368_v14 }
  0x25   : > { %973 = vmatpush.bf16.msrb.mxu0 %v961_v39  ;;  %1022 = vmatpush.bf16.msrb.mxu1 %v964_v40  ;;  %p4195_p5 = pnand %p4194_p3, %p4190_p0 }
  0x26   : > { %368 = vperm.xlu0 %4125, %v318_v15  }
  0x27   : > { %373 = vperm.xlu1 %4126, %v319_v16   ;;  %358 = vperm.xlu2 %4127, %v316_v17  }
  0x2e   : > { %363 = vperm.xlu0 %4125, %v317_v18  }
  0x2f   : > { %353 = vperm.xlu2 %4127, %v315_v19   ;;  %348 = vperm.xlu1 %4126, %v314_v20  }
  0x34   : > { %3881 = vmatmul.msk.bf16.gmra.mxu0 %vm549_vm1, %v4395_v21  ;;  %3889 = vmatmul.msk.bf16.gmra.mxu1 %vm549_vm1, %v4395_v21 }
  0x36   : > { %338 = vperm.xlu0 %4125, %v312_v22  }
  0x37   : > { %343 = vperm.xlu1 %4126, %v313_v23   ;;  %328 = vperm.xlu2 %4127, %v310_v24  }
  0x3e   : > { %333 = vperm.xlu0 %4125, %v311_v25  }
  0x3f   : > { %424 = vperm.xlu1 %4126, %v406_v28   ;;  %429 = vperm.xlu2 %4127, %v407_v47  }
  0x44   : > { %3882 = vmatmul.msk.bf16.gmra.mxu0 %vm549_vm1, %v4416_v26  ;;  %3890 = vmatmul.msk.bf16.gmra.mxu1 %vm549_vm1, %v4416_v26 }
  0x46   : > { %434 = vperm.xlu0 %4125, %v408_v29  }
  0x47   : > { %439 = vperm.xlu1 %4126, %v409_v30   ;;  %444 = vperm.xlu2 %4127, %v410_v50  }
  0x4e   : > { %449 = vperm.xlu0 %4125, %v411_v32  }
  0x4f   : > { %454 = vperm.xlu1 %4126, %v412_v36   ;;  %459 = vperm.xlu2 %4127, %v413_v53  }
  0x54   : > { %3883 = vmatmul.msk.bf16.gmra.mxu0 %vm549_vm1, %v4425_v27  ;;  %3891 = vmatmul.msk.bf16.gmra.mxu1 %vm549_vm1, %v4425_v27 }
  0x56   : > { %464 = vperm.xlu0 %4125, %v414_v41  }
  0x57   : > { %469 = vperm.xlu1 %4126, %v415_v42   ;;  %474 = vperm.xlu2 %4127, %v416_v58  }
  0x5e   : > { %479 = vperm.xlu0 %4125, %v417_v44  }
  0x5f   : > { %484 = vperm.xlu1 %4126, %v418_v45   ;;  %489 = vperm.xlu2 %4127, %v419_v62  }
  0x64   : > { %3884 = vmatmul.msk.bf16.gmra.mxu0 %vm549_vm1, %v4443_v31  ;;  %3892 = vmatmul.msk.bf16.gmra.mxu1 %vm549_vm1, %v4443_v31 }
  0x66   : > { %494 = vperm.xlu0 %4125, %v420_v46  }
  0x67   : > { %499 = vperm.xlu1 %4126, %v421_v48  }
  0x71   : > { %v4496_v51 = vpop.permute.xlu2 %378 }
  0x74   : > { %3885 = vmatmul.msk.bf16.gmra.mxu0 %vm549_vm1, %v4467_v43  ;;  %3893 = vmatmul.msk.bf16.gmra.mxu1 %vm549_vm1, %v4467_v43 }
  0x79   : > { %v4507_v54 = vpop.permute.xlu2 %383 }
  0x81   : > { %v4525_v59 = vpop.permute.xlu2 %358 }
  0x82   : > { %6615 = vst [vmem:[#allocation7_spill] sm:$0xff] %v4525_v59 }
  0x84   : > { %3886 = vmatmul.msk.bf16.gmra.mxu0 %vm549_vm1, %v4491_v49  ;;  %3894 = vmatmul.msk.bf16.gmra.mxu1 %vm549_vm1, %v4491_v49 }
  0x88   : > { %v4502_v52 = vpop.permute.xlu0 %398 }
  0x89   : > { %6613 = vst [vmem:[#allocation5_spill] sm:$0xff] %v4502_v52  ;;  %v4509_v55 = vpop.permute.xlu1 %388  ;;  %v4536_v2 = vpop.permute.xlu2 %353 }
  0x8a   : > { %6618 = vst [vmem:[#allocation10_spill] sm:$0xff] %v4536_v2 }
  0x90   : > { %v4511_v56 = vpop.permute.xlu0 %403 }
  0x91   : > { %6614 = vst [vmem:[#allocation6_spill] sm:$0xff] %v4511_v56  ;;  %v4529_v61 = vpop.permute.xlu1 %393  ;;  %v4546_v7 = vpop.permute.xlu2 %328 }
  0x92   : > { %6616 = vst [vmem:[#allocation8_spill] sm:$0xff] %v4529_v61 }
  0x94   : > { %3887 = vmatmul.msk.bf16.gmra.mxu0 %vm549_vm1, %v4516_v57  ;;  %3895 = vmatmul.msk.bf16.gmra.mxu1 %vm549_vm1, %v4516_v57 }
  0x98   : > { %v4527_v60 = vpop.permute.xlu0 %368 }
  0x99   : > { %v4538_v3 = vpop.permute.xlu1 %373 }
  0xa0   : > { %v4534_v63 = vpop.permute.xlu0 %363 }
  0xa1   : > { %6617 = vst [vmem:[#allocation9_spill] sm:$0xff] %v4534_v63  ;;  %v590_v0 = vpop.f32.mrf.mxu0  ;;  %v639_v1 = vpop.f32.mrf.mxu1 }
  0xa2   : > { %v4548_v8 = vpop.permute.xlu1 %348  ;;  %v591_v9 = vadd.f32 %v590_v0, %v4546_v7  ;;  %v640_v10 = vadd.f32 %v639_v1, %v4546_v7 }
  0xa3   : > { %6619 = vst [vmem:[#allocation11_spill] sm:$0xff] %v4548_v8 }
  0xa4   : > { %3929 = vmatmul.msk.bf16.vlgmr.msrb.gmra.mxu0 %vm549_vm1, %v4368_v14  ;;  %3937 = vmatmul.msk.bf16.vlgmr.msrb.gmra.mxu1 %vm549_vm1, %v4368_v14  ;;  %v679_v17 = vmax.f32 %v591_v9, 0.0  ;;  %v680_v18 = vmax.f32 %v640_v10, 0.0 }
  0xa8   : > { %v4544_v4 = vpop.permute.xlu0 %338 }
  0xa9   : > { %v592_v5 = vpop.f32.mrf.mxu0  ;;  %v641_v6 = vpop.f32.mrf.mxu1 }
  0xaa   : > { %v4564_v24 = vpop.permute.xlu1 %343 }
  0xb0   : > { %v4552_v11 = vpop.permute.xlu0 %333 }
  0xb1   : > { %v595_v12 = vpop.f32.mrf.mxu0  ;;  %v644_v13 = vpop.f32.mrf.mxu1  ;;  %v593_v15 = vadd.f32 %v592_v5, %v4552_v11  ;;  %v642_v16 = vadd.f32 %v641_v6, %v4552_v11 }
  0xb2   : > { %v596_v25 = vadd.f32 %v595_v12, %v4544_v4  ;;  %v645_v28 = vadd.f32 %v644_v13, %v4544_v4 }
  0xb3   : > { %v681_v19 = vmax.f32 %v593_v15, 0.0  ;;  %v682_v20 = vmax.f32 %v642_v16, 0.0 }
  0xb4   : > { %3930 = vmatmul.msk.bf16.gmra.mxu0 %vm549_vm1, %v4395_v21  ;;  %3938 = vmatmul.msk.bf16.gmra.mxu1 %vm549_vm1, %v4395_v21  ;;  %v683_v34 = vmax.f32 %v596_v25, 0.0  ;;  %v684_v35 = vmax.f32 %v645_v28, 0.0 }
  0xb5   : > { %v4560_v22 = vpack.c.bf16 %v681_v19, %v679_v17  ;;  %v4562_v23 = vpack.c.bf16 %v682_v20, %v680_v18 }
  0xb9   : > { %v597_v29 = vpop.f32.mrf.mxu0  ;;  %v646_v30 = vpop.f32.mrf.mxu1 }
  0xba   : > { %v598_v32 = vadd.f32 %v597_v29, %v4564_v24  ;;  %v647_v33 = vadd.f32 %v646_v30, %v4564_v24 }
  0xbc   : > { %v685_v36 = vmax.f32 %v598_v32, 0.0  ;;  %v686_v37 = vmax.f32 %v647_v33, 0.0  ;;  %v3945_v32 = vld [vmem:[%s4351_s21 + $0x10] sm:$0xff] }
  0xbd   : > { %v1293_v33 = vunpack.c.l.b16 %v3945_v32 }
  0xbe   : > { %v4570_v38 = vpack.c.bf16 %v685_v36, %v683_v34  ;;  %v4572_v39 = vpack.c.bf16 %v686_v37, %v684_v35  ;;  %v1294_v34 = vunpack.c.h.b16 %v3945_v32 }
  0xbf   : > { %v1295_v35 = vpack.c.b16 %v1293_v33, %v1293_v33 }
  0xc0   : > { %v1296_v36 = vpack.c.b16 %v1294_v34, %v1294_v34 }
  0xc1   : > { %v600_v40 = vpop.f32.mrf.mxu0  ;;  %v649_v41 = vpop.f32.mrf.mxu1 }
  0xc2   : > { %v601_v42 = vadd.f32 %v600_v40, %v4548_v8  ;;  %v650_v44 = vadd.f32 %v649_v41, %v4548_v8  ;;  %v1298_v41 = vsel %vm574_vm0, %v1295_v35, 0 }
  0xc3   : > { %1310 = vmatpush.bf16.msra.mxu0 %v1298_v41 }
  0xc4   : > { %3931 = vmatmul.msk.bf16.gmra.mxu0 %vm549_vm1, %v4416_v26  ;;  %3939 = vmatmul.msk.bf16.gmra.mxu1 %vm549_vm1, %v4416_v26  ;;  %v687_v50 = vmax.f32 %v601_v42, 0.0  ;;  %v688_v53 = vmax.f32 %v650_v44, 0.0  ;;  %v1301_v42 = vsel %vm574_vm0, %v1296_v36, 0 }
  0xc5   : > { %1359 = vmatpush.bf16.msra.mxu1 %v1301_v42 }
  0xc9   : > { %v602_v45 = vpop.f32.mrf.mxu0  ;;  %v651_v46 = vpop.f32.mrf.mxu1 }
  0xca   : > { %v603_v47 = vadd.f32 %v602_v45, %v4536_v2  ;;  %v652_v48 = vadd.f32 %v651_v46, %v4536_v2 }
  0xcc   : > { %v689_v58 = vmax.f32 %v603_v47, 0.0  ;;  %v690_v62 = vmax.f32 %v652_v48, 0.0 }
  0xce   : > { %v4582_v0 = vpack.c.bf16 %v689_v58, %v687_v50  ;;  %v4584_v1 = vpack.c.bf16 %v690_v62, %v688_v53 }
  0xd1   : > { %v605_v5 = vpop.f32.mrf.mxu0  ;;  %v654_v6 = vpop.f32.mrf.mxu1 }
  0xd2   : > { %v606_v9 = vadd.f32 %v605_v5, %v4525_v59  ;;  %v655_v10 = vadd.f32 %v654_v6, %v4525_v59 }
  0xd4   : > { %3932 = vmatmul.msk.bf16.gmra.mxu0 %vm549_vm1, %v4425_v27  ;;  %3940 = vmatmul.msk.bf16.gmra.mxu1 %vm549_vm1, %v4425_v27  ;;  %v691_v17 = vmax.f32 %v606_v9, 0.0  ;;  %v692_v18 = vmax.f32 %v655_v10, 0.0 }
  0xd9   : > { %v607_v12 = vpop.f32.mrf.mxu0  ;;  %v656_v13 = vpop.f32.mrf.mxu1 }
  0xda   : > { %v608_v15 = vadd.f32 %v607_v12, %v4534_v63  ;;  %v657_v16 = vadd.f32 %v656_v13, %v4534_v63 }
  0xdc   : > { %v693_v19 = vmax.f32 %v608_v15, 0.0  ;;  %v694_v20 = vmax.f32 %v657_v16, 0.0 }
  0xde   : > { %v4594_v25 = vpack.c.bf16 %v693_v19, %v691_v17  ;;  %v4596_v28 = vpack.c.bf16 %v694_v20, %v692_v18 }
  0xe1   : > { %v4598_v29 = vpop.f32.mrf.mxu0  ;;  %v4600_v30 = vpop.f32.mrf.mxu1 }
  0xe4   : > { %3933 = vmatmul.msk.bf16.gmra.mxu0 %vm549_vm1, %v4443_v31  ;;  %3941 = vmatmul.msk.bf16.gmra.mxu1 %vm549_vm1, %v4443_v31 }
  0xe9   : > { %v612_v37 = vpop.f32.mrf.mxu0  ;;  %v661_v40 = vpop.f32.mrf.mxu1 }
  0xf1   : > { %v615_v44 = vpop.f32.mrf.mxu0  ;;  %v664_v45 = vpop.f32.mrf.mxu1 }
  0xf4   : > { %3934 = vmatmul.msk.bf16.gmra.mxu0 %vm549_vm1, %v4467_v43  ;;  %3942 = vmatmul.msk.bf16.gmra.mxu1 %vm549_vm1, %v4467_v43 }
  0xf9   : > { %v617_v46 = vpop.f32.mrf.mxu0  ;;  %v666_v47 = vpop.f32.mrf.mxu1 }
  0xfa   : > { %v618_v35 = vadd.f32 %v617_v46, %v4507_v54  ;;  %v667_v36 = vadd.f32 %v666_v47, %v4507_v54 }
  0xfc   : > { %v702_v47 = vmax.f32 %v667_v36, 0.0 }
 0x101   : > { %v620_v48 = vpop.f32.mrf.mxu0  ;;  %v669_v50 = vpop.f32.mrf.mxu1 }
 0x102   : > { %v621_v18 = vadd.f32 %v620_v48, %v4509_v55  ;;  %v670_v19 = vadd.f32 %v669_v50, %v4509_v55  ;;  %v613_v50 = vadd.f32 %v612_v37, %v4538_v3 }
 0x104   : > { %3935 = vmatmul.msk.bf16.gmra.mxu0 %vm549_vm1, %v4491_v49  ;;  %3943 = vmatmul.msk.bf16.gmra.mxu1 %vm549_vm1, %v4491_v49  ;;  %v704_v48 = vmax.f32 %v670_v19, 0.0  ;;  %v697_v37 = vmax.f32 %v613_v50, 0.0 }
 0x109   : > { %v622_v53 = vpop.f32.mrf.mxu0  ;;  %v671_v58 = vpop.f32.mrf.mxu1 }
 0x10a   : > { %v623_v13 = vadd.f32 %v622_v53, %v4529_v61  ;;  %v672_v15 = vadd.f32 %v671_v58, %v4529_v61 }
 0x10c   : > { %v705_v41 = vmax.f32 %v623_v13, 0.0  ;;  %v706_v42 = vmax.f32 %v672_v15, 0.0 }
 0x10e   : > { %v724_v15 = vpack.c.bf16 %v706_v42, %v704_v48 }
 0x111   : > { %v625_v62 = vpop.f32.mrf.mxu0  ;;  %v674_v5 = vpop.f32.mrf.mxu1 }
 0x112   : > { %v626_v6 = vadd.f32 %v625_v62, %v4502_v52  ;;  %v675_v9 = vadd.f32 %v674_v5, %v4502_v52  ;;  %v616_v62 = vadd.f32 %v615_v44, %v4496_v51  ;;  %v665_v5 = vadd.f32 %v664_v45, %v4496_v51 }
 0x113   : > { %v660_v44 = vadd.f32 %v4600_v30, %v4527_v60 }
 0x114   : > { %3936 = vmatmul.msk.bf16.gmra.mxu0 %vm549_vm1, %v4516_v57  ;;  %3944 = vmatmul.msk.bf16.gmra.mxu1 %vm549_vm1, %v4516_v57  ;;  %v707_v20 = vmax.f32 %v626_v6, 0.0  ;;  %v708_v32 = vmax.f32 %v675_v9, 0.0  ;;  %v662_v6 = vadd.f32 %v661_v40, %v4538_v3  ;;  %v699_v45 = vmax.f32 %v616_v62, 0.0 }
 0x116   : > { %v698_v40 = vmax.f32 %v662_v6, 0.0 }
 0x119   : > { %v627_v10 = vpop.f32.mrf.mxu0  ;;  %v676_v12 = vpop.f32.mrf.mxu1 }
 0x11a   : > { %v628_v16 = vadd.f32 %v627_v10, %v4511_v56  ;;  %v677_v17 = vadd.f32 %v676_v12, %v4511_v56  ;;  %v703_v10 = vmax.f32 %v621_v18, 0.0  ;;  %v701_v12 = vmax.f32 %v618_v35, 0.0 }
 0x11c   : > { %v709_v33 = vmax.f32 %v628_v16, 0.0  ;;  %v710_v34 = vmax.f32 %v677_v17, 0.0  ;;  %v723_v13 = vpack.c.bf16 %v705_v41, %v703_v10  ;;  %v611_v16 = vadd.f32 %v4598_v29, %v4527_v60 }
 0x11d   : > { %v700_v17 = vmax.f32 %v665_v5, 0.0  ;;  %v721_v18 = vpack.c.bf16 %v701_v12, %v699_v45  ;;  %v4668_v12 = vld [vmem:[%s6430_s3] sm:$0xff] }
 0x11e   : > { %v725_v53 = vpack.c.bf16 %v709_v33, %v707_v20  ;;  %v726_v58 = vpack.c.bf16 %v710_v34, %v708_v32  ;;  %v695_v20 = vmax.f32 %v611_v16, 0.0  ;;  %v696_v32 = vmax.f32 %v660_v44, 0.0 }
 0x11f   : > { %v722_v19 = vpack.c.bf16 %v702_v47, %v700_v17 }
 0x120   : > { %775 = vmatpush.bf16.msra.mxu2 %v725_v53  ;;  %824 = vmatpush.bf16.msra.mxu3 %v726_v58  ;;  %v719_v41 = vpack.c.bf16 %v697_v37, %v695_v20  ;;  %v720_v42 = vpack.c.bf16 %v698_v40, %v696_v32 }
 0x121   : > { %v975_v9 = vpop.f32.mrf.mxu0  ;;  %v1024_v46 = vpop.f32.mrf.mxu1 }
 0x122   : > { %v976_v29 = vadd.f32 %v975_v9, %v4546_v7  ;;  %v1025_v30 = vadd.f32 %v1024_v46, %v4546_v7 }
 0x124   : > { %776 = vmatpush.bf16.msra.mxu2 %v723_v13  ;;  %825 = vmatpush.bf16.msra.mxu3 %v724_v15  ;;  %v1064_v53 = vmax.f32 %v976_v29, 0.0  ;;  %v1065_v58 = vmax.f32 %v1025_v30, 0.0 }
 0x125   : > { %3946 = vmatmul.msk.bf16.vlgmr.msra.gmra.mxu0 %vm549_vm1, %v4368_v14  ;;  %3954 = vmatmul.msk.bf16.vlgmr.msra.gmra.mxu1 %vm549_vm1, %v4368_v14 }
 0x128   : > { %777 = vmatpush.bf16.msra.mxu2 %v721_v18  ;;  %826 = vmatpush.bf16.msra.mxu3 %v722_v19  ;;  %v4689_v19 = vld [vmem:[%s6430_s3 + $0x8] sm:$0xff] }
 0x129   : > { %v977_v33 = vpop.f32.mrf.mxu0  ;;  %v1026_v34 = vpop.f32.mrf.mxu1 }
 0x12a   : > { %v978_v35 = vadd.f32 %v977_v33, %v4552_v11  ;;  %v1027_v36 = vadd.f32 %v1026_v34, %v4552_v11 }
 0x12c   : > { %v1066_v62 = vmax.f32 %v978_v35, 0.0  ;;  %v1067_v5 = vmax.f32 %v1027_v36, 0.0  ;;  %778 = vmatpush.bf16.msra.mxu2 %v719_v41  ;;  %827 = vmatpush.bf16.msra.mxu3 %v720_v42 }
 0x12e   : > { %v4647_v10 = vpack.c.bf16 %v1066_v62, %v1064_v53  ;;  %v4649_v48 = vpack.c.bf16 %v1067_v5, %v1065_v58 }
 0x130   : > { %779 = vmatpush.bf16.msra.mxu2 %v4594_v25  ;;  %828 = vmatpush.bf16.msra.mxu3 %v4596_v28 }
 0x131   : > { %v980_v50 = vpop.f32.mrf.mxu0  ;;  %v1029_v6 = vpop.f32.mrf.mxu1 }
 0x132   : > { %v981_v9 = vadd.f32 %v980_v50, %v4544_v4  ;;  %v1030_v46 = vadd.f32 %v1029_v6, %v4544_v4  ;;  %v4708_v50 = vld [vmem:[%s6430_s3 + $0x10] sm:$0xff] }
 0x134   : > { %780 = vmatpush.bf16.msra.mxu2 %v4582_v0  ;;  %829 = vmatpush.bf16.msra.mxu3 %v4584_v1  ;;  %v1068_v47 = vmax.f32 %v981_v9, 0.0  ;;  %v1069_v13 = vmax.f32 %v1030_v46, 0.0 }
 0x135   : > { %3947 = vmatmul.msk.bf16.gmra.mxu0 %vm549_vm1, %v4395_v21  ;;  %3955 = vmatmul.msk.bf16.gmra.mxu1 %vm549_vm1, %v4395_v21 }
 0x138   : > { %781 = vmatpush.bf16.msra.mxu2 %v4570_v38  ;;  %830 = vmatpush.bf16.msra.mxu3 %v4572_v39 }
 0x139   : > { %v982_v25 = vpop.f32.mrf.mxu0  ;;  %v1031_v28 = vpop.f32.mrf.mxu1 }
 0x13a   : > { %v983_v0 = vadd.f32 %v982_v25, %v4564_v24  ;;  %v1032_v1 = vadd.f32 %v1031_v28, %v4564_v24 }
 0x13c   : > { %v1070_v15 = vmax.f32 %v983_v0, 0.0  ;;  %v1071_v16 = vmax.f32 %v1032_v1, 0.0  ;;  %782 = vmatpush.bf16.msra.mxu2 %v4560_v22  ;;  %831 = vmatpush.bf16.msra.mxu3 %v4562_v23 }
 0x13e   : > { %v4672_v38 = vpack.c.bf16 %v1070_v15, %v1068_v47  ;;  %v4674_v39 = vpack.c.bf16 %v1071_v16, %v1069_v13  ;;  %v3962_v13 = vld [vmem:[%s4351_s21 + $0x18] sm:$0xff] }
 0x13f   : > { %783 = vmatmul.bf16.vlgmr.msra.gmra.mxu2 %v4668_v12  ;;  %832 = vmatmul.bf16.vlgmr.msra.gmra.mxu3 %v4668_v12  ;;  %v1630_v15 = vunpack.c.l.b16 %v3962_v13  ;;  %v1631_v16 = vunpack.c.h.b16 %v3962_v13 }
 0x141   : > { %v985_v44 = vpop.f32.mrf.mxu0  ;;  %v1034_v45 = vpop.f32.mrf.mxu1 }
 0x142   : > { %v986_v22 = vadd.f32 %v985_v44, %v4548_v8  ;;  %v1035_v23 = vadd.f32 %v1034_v45, %v4548_v8  ;;  %v1632_v44 = vpack.c.b16 %v1630_v15, %v1630_v15  ;;  %v1633_v45 = vpack.c.b16 %v1631_v16, %v1631_v16 }
 0x144   : > { %v1072_v20 = vmax.f32 %v986_v22, 0.0  ;;  %v1073_v32 = vmax.f32 %v1035_v23, 0.0 }
 0x145   : > { %3948 = vmatmul.msk.bf16.gmra.mxu0 %vm549_vm1, %v4416_v26  ;;  %3956 = vmatmul.msk.bf16.gmra.mxu1 %vm549_vm1, %v4416_v26 }
 0x149   : > { %v987_v17 = vpop.f32.mrf.mxu0  ;;  %v1036_v37 = vpop.f32.mrf.mxu1 }
 0x14a   : > { %v988_v40 = vadd.f32 %v987_v17, %v4536_v2  ;;  %v1037_v18 = vadd.f32 %v1036_v37, %v4536_v2  ;;  %v1635_v17 = vsel %vm574_vm0, %v1632_v44, 0  ;;  %v1638_v37 = vsel %vm574_vm0, %v1633_v45, 0 }
 0x14b   : > { %1647 = vmatpush.bf16.msrb.mxu0 %v1635_v17  ;;  %1696 = vmatpush.bf16.msrb.mxu1 %v1638_v37 }
 0x14c   : > { %v1074_v29 = vmax.f32 %v988_v40, 0.0  ;;  %v1075_v30 = vmax.f32 %v1037_v18, 0.0  ;;  %v4730_v40 = vld [vmem:[%s6430_s3 + $0x18] sm:$0xff] }
 0x14e   : > { %v4691_v33 = vpack.c.bf16 %v1074_v29, %v1072_v20  ;;  %v4693_v34 = vpack.c.bf16 %v1075_v30, %v1073_v32  ;;  %v4741_v30 = vld [vmem:[%s6430_s3 + $0x20] sm:$0xff] }
 0x14f   : > { %788 = vmatmul.bf16.gmra.mxu2 %v4689_v19  ;;  %837 = vmatmul.bf16.gmra.mxu3 %v4689_v19 }
 0x151   : > { %v990_v35 = vpop.f32.mrf.mxu0  ;;  %v1039_v36 = vpop.f32.mrf.mxu1 }
 0x152   : > { %v991_v41 = vadd.f32 %v990_v35, %v4525_v59  ;;  %v1040_v42 = vadd.f32 %v1039_v36, %v4525_v59 }
 0x154   : > { %v1076_v6 = vmax.f32 %v991_v41, 0.0  ;;  %v1077_v9 = vmax.f32 %v1040_v42, 0.0  ;;  %v4752_v42 = vld [vmem:[%s6430_s3 + $0x28] sm:$0xff] }
 0x155   : > { %3949 = vmatmul.msk.bf16.gmra.mxu0 %vm549_vm1, %v4425_v27  ;;  %3957 = vmatmul.msk.bf16.gmra.mxu1 %vm549_vm1, %v4425_v27 }
 0x159   : > { %v992_v53 = vpop.f32.mrf.mxu0  ;;  %v1041_v58 = vpop.f32.mrf.mxu1 }
 0x15a   : > { %v993_v62 = vadd.f32 %v992_v53, %v4534_v63  ;;  %v1042_v5 = vadd.f32 %v1041_v58, %v4534_v63 }
 0x15c   : > { %v1078_v46 = vmax.f32 %v993_v62, 0.0  ;;  %v1079_v25 = vmax.f32 %v1042_v5, 0.0 }
 0x15e   : > { %v4710_v28 = vpack.c.bf16 %v1078_v46, %v1076_v6  ;;  %v4712_v0 = vpack.c.bf16 %v1079_v25, %v1077_v9 }
 0x15f   : > { %793 = vmatmul.bf16.gmra.mxu2 %v4708_v50  ;;  %842 = vmatmul.bf16.gmra.mxu3 %v4708_v50 }
 0x161   : > { %v4716_v1 = vpop.f32.mrf.mxu0  ;;  %v4718_v47 = vpop.f32.mrf.mxu1 }
 0x165   : > { %3950 = vmatmul.msk.bf16.gmra.mxu0 %vm549_vm1, %v4443_v31  ;;  %3958 = vmatmul.msk.bf16.gmra.mxu1 %vm549_vm1, %v4443_v31 }
 0x169   : > { %v997_v22 = vpop.f32.mrf.mxu0  ;;  %v1046_v23 = vpop.f32.mrf.mxu1 }
 0x16f   : > { %798 = vmatmul.bf16.gmra.mxu2 %v4730_v40  ;;  %847 = vmatmul.bf16.gmra.mxu3 %v4730_v40 }
 0x171   : > { %v1000_v18 = vpop.f32.mrf.mxu0  ;;  %v1049_v20 = vpop.f32.mrf.mxu1 }
 0x175   : > { %3951 = vmatmul.msk.bf16.gmra.mxu0 %vm549_vm1, %v4467_v43  ;;  %3959 = vmatmul.msk.bf16.gmra.mxu1 %vm549_vm1, %v4467_v43 }
 0x179   : > { %v1002_v32 = vpop.f32.mrf.mxu0  ;;  %v1051_v29 = vpop.f32.mrf.mxu1 }
 0x17f   : > { %803 = vmatmul.bf16.gmra.mxu2 %v4741_v30  ;;  %852 = vmatmul.bf16.gmra.mxu3 %v4741_v30 }
 0x181   : > { %v1005_v35 = vpop.f32.mrf.mxu0  ;;  %v1054_v36 = vpop.f32.mrf.mxu1 }
 0x182   : > { %v1006_v15 = vadd.f32 %v1005_v35, %v4509_v55  ;;  %v1055_v16 = vadd.f32 %v1054_v36, %v4509_v55  ;;  %v1001_v35 = vadd.f32 %v1000_v18, %v4496_v51  ;;  %v1050_v36 = vadd.f32 %v1049_v20, %v4496_v51 }
 0x183   : > { %v1045_v18 = vadd.f32 %v4718_v47, %v4527_v60 }
 0x184   : > { %v1084_v20 = vmax.f32 %v1001_v35, 0.0 }
 0x185   : > { %3952 = vmatmul.msk.bf16.gmra.mxu0 %vm549_vm1, %v4491_v49  ;;  %3960 = vmatmul.msk.bf16.gmra.mxu1 %vm549_vm1, %v4491_v49 }
 0x189   : > { %v1007_v43 = vpop.f32.mrf.mxu0  ;;  %v1056_v41 = vpop.f32.mrf.mxu1 }
 0x18a   : > { %v1008_v9 = vadd.f32 %v1007_v43, %v4529_v61  ;;  %v1057_v46 = vadd.f32 %v1056_v41, %v4529_v61  ;;  %v1003_v43 = vadd.f32 %v1002_v32, %v4507_v54  ;;  %v1052_v41 = vadd.f32 %v1051_v29, %v4507_v54 }
 0x18b   : > { %v998_v32 = vadd.f32 %v997_v22, %v4538_v3  ;;  %v1047_v29 = vadd.f32 %v1046_v23, %v4538_v3 }
 0x18d   : > { %v1082_v22 = vmax.f32 %v998_v32, 0.0  ;;  %v1083_v23 = vmax.f32 %v1047_v29, 0.0 }
 0x18f   : > { %808 = vmatmul.bf16.gmra.mxu2 %v4752_v42  ;;  %857 = vmatmul.bf16.gmra.mxu3 %v4752_v42 }
 0x191   : > { %v1010_v53 = vpop.f32.mrf.mxu0  ;;  %v1059_v58 = vpop.f32.mrf.mxu1 }
 0x192   : > { %v1011_v49 = vadd.f32 %v1010_v53, %v4502_v52  ;;  %v1060_v62 = vadd.f32 %v1059_v58, %v4502_v52  ;;  %v1090_v53 = vmax.f32 %v1008_v9, 0.0  ;;  %v1091_v58 = vmax.f32 %v1057_v46, 0.0 }
 0x193   : > { %v1086_v9 = vmax.f32 %v1003_v43, 0.0  ;;  %v1087_v46 = vmax.f32 %v1052_v41, 0.0  ;;  %v1081_v41 = vmax.f32 %v1045_v18, 0.0 }
 0x194   : > { %v1092_v44 = vmax.f32 %v1011_v49, 0.0  ;;  %v1093_v45 = vmax.f32 %v1060_v62, 0.0  ;;  %v1088_v49 = vmax.f32 %v1006_v15, 0.0  ;;  %v1089_v62 = vmax.f32 %v1055_v16, 0.0 }
 0x195   : > { %3953 = vmatmul.msk.bf16.gmra.mxu0 %vm549_vm1, %v4516_v57  ;;  %3961 = vmatmul.msk.bf16.gmra.mxu1 %vm549_vm1, %v4516_v57  ;;  %v4771_v57 = vld [vmem:[%s6430_s3 + $0x30] sm:$0xff]  ;;  %v1085_v15 = vmax.f32 %v1050_v36, 0.0  ;;  %v1106_v16 = vpack.c.bf16 %v1086_v9, %v1084_v20  ;;  %v4796_v36 = vld [vmem:[%s6430_s3 + $0x38] sm:$0xff] }
 0x199   : > { %v1012_v5 = vpop.f32.mrf.mxu0  ;;  %v1061_v6 = vpop.f32.mrf.mxu1 }
 0x19a   : > { %v1013_v25 = vadd.f32 %v1012_v5, %v4511_v56  ;;  %v1062_v13 = vadd.f32 %v1061_v6, %v4511_v56 }
 0x19c   : > { %v1094_v17 = vmax.f32 %v1013_v25, 0.0  ;;  %v1095_v37 = vmax.f32 %v1062_v13, 0.0 }
 0x19e   : > { %v1110_v5 = vpack.c.bf16 %v1094_v17, %v1092_v44  ;;  %v1111_v6 = vpack.c.bf16 %v1095_v37, %v1093_v45  ;;  %v1108_v44 = vpack.c.bf16 %v1090_v53, %v1088_v49  ;;  %v1109_v45 = vpack.c.bf16 %v1091_v58, %v1089_v62 }
 0x19f   : > { %813 = vmatmul.bf16.gmra.mxu2 %v4771_v57  ;;  %862 = vmatmul.bf16.gmra.mxu3 %v4771_v57  ;;  %v996_v17 = vadd.f32 %v4716_v1, %v4527_v60  ;;  %v1107_v37 = vpack.c.bf16 %v1087_v46, %v1085_v15  ;;  %v4826_v15 = vpop.permute.xlu1 %424 }
 0x1a0   : > { %1112 = vmatpush.bf16.msrb.mxu2 %v1110_v5  ;;  %1161 = vmatpush.bf16.msrb.mxu3 %v1111_v6  ;;  %v1105_v6 = vpack.c.bf16 %v1083_v23, %v1081_v41  ;;  %6620 = vst [vmem:[#allocation12_spill] sm:$0xff] %v4826_v15 }
 0x1a1   : > { %v1080_v43 = vmax.f32 %v996_v17, 0.0 }
 0x1a2   : > { %v1312_v25 = vpop.f32.mrf.mxu0  ;;  %v1361_v13 = vpop.f32.mrf.mxu1 }
 0x1a3   : > { %v1313_v1 = vadd.f32 %v1312_v25, %v4546_v7  ;;  %v1362_v47 = vadd.f32 %v1361_v13, %v4546_v7  ;;  %v1104_v5 = vpack.c.bf16 %v1082_v22, %v1080_v43 }
 0x1a4   : > { %1113 = vmatpush.bf16.msrb.mxu2 %v1108_v44  ;;  %1162 = vmatpush.bf16.msrb.mxu3 %v1109_v45 }
 0x1a5   : > { %3963 = vmatmul.msk.bf16.vlgmr.msrb.gmra.mxu0 %vm549_vm1, %v4368_v14  ;;  %3971 = vmatmul.msk.bf16.vlgmr.msrb.gmra.mxu1 %vm549_vm1, %v4368_v14  ;;  %v1401_v49 = vmax.f32 %v1313_v1, 0.0  ;;  %v1402_v62 = vmax.f32 %v1362_v47, 0.0  ;;  %v4834_v47 = vpop.permute.xlu2 %429 }
 0x1a6   : > { %6621 = vst [vmem:[#allocation13_spill] sm:$0xff] %v4834_v47 }
 0x1a8   : > { %1114 = vmatpush.bf16.msrb.mxu2 %v1106_v16  ;;  %1163 = vmatpush.bf16.msrb.mxu3 %v1107_v37 }
 0x1aa   : > { %v1314_v53 = vpop.f32.mrf.mxu0  ;;  %v1363_v58 = vpop.f32.mrf.mxu1 }
 0x1ab   : > { %v1315_v35 = vadd.f32 %v1314_v53, %v4552_v11  ;;  %v1364_v14 = vadd.f32 %v1363_v58, %v4552_v11 }
 0x1ac   : > { %1115 = vmatpush.bf16.msrb.mxu2 %v1104_v5  ;;  %1164 = vmatpush.bf16.msrb.mxu3 %v1105_v6 }
 0x1ad   : > { %v1403_v32 = vmax.f32 %v1315_v35, 0.0  ;;  %v1404_v29 = vmax.f32 %v1364_v14, 0.0 }
 0x1af   : > { %818 = vmatmul.bf16.gmra.mxu2 %v4796_v36  ;;  %867 = vmatmul.bf16.gmra.mxu3 %v4796_v36  ;;  %v4800_v9 = vpack.c.bf16 %v1403_v32, %v1401_v49  ;;  %v4802_v46 = vpack.c.bf16 %v1404_v29, %v1402_v62 }
 0x1b0   : > { %1116 = vmatpush.bf16.msrb.mxu2 %v4710_v28  ;;  %1165 = vmatpush.bf16.msrb.mxu3 %v4712_v0 }
 0x1b2   : > { %v1317_v25 = vpop.f32.mrf.mxu0  ;;  %v1366_v13 = vpop.f32.mrf.mxu1 }
 0x1b3   : > { %v1318_v28 = vadd.f32 %v1317_v25, %v4544_v4  ;;  %v1367_v0 = vadd.f32 %v1366_v13, %v4544_v4 }
 0x1b4   : > { %1117 = vmatpush.bf16.msrb.mxu2 %v4691_v33  ;;  %1166 = vmatpush.bf16.msrb.mxu3 %v4693_v34 }
 0x1b5   : > { %3964 = vmatmul.msk.bf16.gmra.mxu0 %vm549_vm1, %v4395_v21  ;;  %3972 = vmatmul.msk.bf16.gmra.mxu1 %vm549_vm1, %v4395_v21  ;;  %v1405_v17 = vmax.f32 %v1318_v28, 0.0  ;;  %v1406_v21 = vmax.f32 %v1367_v0, 0.0 }
 0x1b8   : > { %1118 = vmatpush.bf16.msrb.mxu2 %v4672_v38  ;;  %1167 = vmatpush.bf16.msrb.mxu3 %v4674_v39 }
 0x1ba   : > { %v1319_v44 = vpop.f32.mrf.mxu0  ;;  %v1368_v45 = vpop.f32.mrf.mxu1 }
 0x1bb   : > { %v1320_v33 = vadd.f32 %v1319_v44, %v4564_v24  ;;  %v1369_v34 = vadd.f32 %v1368_v45, %v4564_v24 }
 0x1bc   : > { %1119 = vmatpush.bf16.msrb.mxu2 %v4647_v10  ;;  %1168 = vmatpush.bf16.msrb.mxu3 %v4649_v48 }
 0x1bd   : > { %v1407_v18 = vmax.f32 %v1320_v33, 0.0  ;;  %v1408_v38 = vmax.f32 %v1369_v34, 0.0 }
 0x1bf   : > { %1120 = vmatmul.bf16.vlgmr.msrb.gmra.mxu2 %v4668_v12  ;;  %1169 = vmatmul.bf16.vlgmr.msrb.gmra.mxu3 %v4668_v12  ;;  %v4822_v39 = vpack.c.bf16 %v1407_v18, %v1405_v17  ;;  %v4824_v20 = vpack.c.bf16 %v1408_v38, %v1406_v21  ;;  %v4848_v17 = vpop.permute.xlu0 %434 }
 0x1c0   : > { %6622 = vst [vmem:[#allocation14_spill] sm:$0xff] %v4848_v17 }
 0x1c2   : > { %v1322_v22 = vpop.f32.mrf.mxu0  ;;  %v1371_v23 = vpop.f32.mrf.mxu1 }
 0x1c3   : > { %v784_v16 = vpop.f32.mrf.mxu2  ;;  %v833_v10 = vpop.f32.mrf.mxu3  ;;  %v1323_v53 = vadd.f32 %v1322_v22, %v4548_v8  ;;  %v1372_v58 = vadd.f32 %v1371_v23, %v4548_v8 }
 0x1c4   : > { %v785_v48 = vadd.f32 %v784_v16, %v4826_v15  ;;  %v834_v37 = vadd.f32 %v833_v10, %v4826_v15 }
 0x1c5   : > { %3965 = vmatmul.msk.bf16.gmra.mxu0 %vm549_vm1, %v4416_v26  ;;  %3973 = vmatmul.msk.bf16.gmra.mxu1 %vm549_vm1, %v4416_v26  ;;  %v1409_v29 = vmax.f32 %v1323_v53, 0.0  ;;  %v1410_v25 = vmax.f32 %v1372_v58, 0.0 }
 0x1c6   : > { %v873_v43 = vmax.f32 %v785_v48, 0.0  ;;  %v874_v41 = vmax.f32 %v834_v37, 0.0  ;;  %v4856_v37 = vpop.permute.xlu1 %439 }
 0x1c7   : > { %6623 = vst [vmem:[#allocation15_spill] sm:$0xff] %v4856_v37 }
 0x1c8   : > { %v905_v1 = vmax.f32 %v873_v43, %v874_v41 }
 0x1ca   : > { %v1324_v5 = vpop.f32.mrf.mxu0  ;;  %v1373_v6 = vpop.f32.mrf.mxu1  ;;  %906 = vmax.xlane.f32.xlu2 %v905_v1 }
 0x1cb   : > { %v1325_v35 = vadd.f32 %v1324_v5, %v4536_v2  ;;  %v1374_v14 = vadd.f32 %v1373_v6, %v4536_v2  ;;  %v786_v49 = vpop.f32.mrf.mxu2  ;;  %v835_v62 = vpop.f32.mrf.mxu3 }
 0x1cc   : > { %v787_v26 = vadd.f32 %v786_v49, %v4834_v47  ;;  %v836_v32 = vadd.f32 %v835_v62, %v4834_v47 }
 0x1cd   : > { %v1411_v13 = vmax.f32 %v1325_v35, 0.0  ;;  %v1412_v28 = vmax.f32 %v1374_v14, 0.0 }
 0x1ce   : > { %v875_v0 = vmax.f32 %v787_v26, 0.0  ;;  %v876_v44 = vmax.f32 %v836_v32, 0.0 }
 0x1cf   : > { %1125 = vmatmul.bf16.gmra.mxu2 %v4689_v19  ;;  %1174 = vmatmul.bf16.gmra.mxu3 %v4689_v19  ;;  %v4844_v45 = vpack.c.bf16 %v1411_v13, %v1409_v29  ;;  %v4846_v33 = vpack.c.bf16 %v1412_v28, %v1410_v25 }
 0x1d0   : > { %v908_v34 = vmax.f32 %v875_v0, %v876_v44  ;;  %v4870_v44 = vpop.permute.xlu2 %444 }
 0x1d1   : > { %6624 = vst [vmem:[#allocation16_spill] sm:$0xff] %v4870_v44 }
 0x1d2   : > { %v1327_v21 = vpop.f32.mrf.mxu0  ;;  %v1376_v18 = vpop.f32.mrf.mxu1  ;;  %909 = vmax.xlane.f32.xlu0 %v908_v34 }
 0x1d3   : > { %v789_v38 = vpop.f32.mrf.mxu2  ;;  %v838_v22 = vpop.f32.mrf.mxu3  ;;  %v1328_v43 = vadd.f32 %v1327_v21, %v4525_v59  ;;  %v1377_v41 = vadd.f32 %v1376_v18, %v4525_v59 }
 0x1d4   : > { %v790_v23 = vadd.f32 %v789_v38, %v4848_v17  ;;  %v839_v16 = vadd.f32 %v838_v22, %v4848_v17 }
 0x1d5   : > { %3966 = vmatmul.msk.bf16.gmra.mxu0 %vm549_vm1, %v4425_v27  ;;  %3974 = vmatmul.msk.bf16.gmra.mxu1 %vm549_vm1, %v4425_v27  ;;  %v1413_v49 = vmax.f32 %v1328_v43, 0.0  ;;  %v1414_v62 = vmax.f32 %v1377_v41, 0.0  ;;  %v4883_v41 = vpop.permute.xlu0 %449 }
 0x1d6   : > { %v877_v19 = vmax.f32 %v790_v23, 0.0  ;;  %v878_v10 = vmax.f32 %v839_v16, 0.0  ;;  %6625 = vst [vmem:[#allocation17_spill] sm:$0xff] %v4883_v41 }
 0x1d8   : > { %v911_v48 = vmax.f32 %v877_v19, %v878_v10  ;;  %v3979_v19 = vld [vmem:[%s4351_s21 + $0x20] sm:$0xff] }
 0x1d9   : > { %v1967_v10 = vunpack.c.l.b16 %v3979_v19 }
 0x1da   : > { %v1329_v1 = vpop.f32.mrf.mxu0  ;;  %v1378_v53 = vpop.f32.mrf.mxu1  ;;  %912 = vmax.xlane.f32.xlu1 %v911_v48  ;;  %v1968_v48 = vunpack.c.h.b16 %v3979_v19 }
 0x1db   : > { %v1330_v58 = vadd.f32 %v1329_v1, %v4534_v63  ;;  %v1379_v5 = vadd.f32 %v1378_v53, %v4534_v63  ;;  %v791_v6 = vpop.f32.mrf.mxu2  ;;  %v840_v35 = vpop.f32.mrf.mxu3  ;;  %v1969_v1 = vpack.c.b16 %v1967_v10, %v1967_v10 }
 0x1dc   : > { %v792_v27 = vadd.f32 %v791_v6, %v4856_v37  ;;  %v841_v14 = vadd.f32 %v840_v35, %v4856_v37  ;;  %v1970_v53 = vpack.c.b16 %v1968_v48, %v1968_v48  ;;  %v4912_v10 = vpop.permute.xlu2 %459 }
 0x1dd   : > { %v1415_v26 = vmax.f32 %v1330_v58, 0.0  ;;  %v1416_v32 = vmax.f32 %v1379_v5, 0.0  ;;  %6628 = vst [vmem:[#allocation20_spill] sm:$0xff] %v4912_v10 }
 0x1de   : > { %v879_v29 = vmax.f32 %v792_v27, 0.0  ;;  %v880_v25 = vmax.f32 %v841_v14, 0.0  ;;  %v1972_v27 = vsel %vm574_vm0, %v1969_v1, 0 }
 0x1df   : > { %1130 = vmatmul.bf16.gmra.mxu2 %v4708_v50  ;;  %1179 = vmatmul.bf16.gmra.mxu3 %v4708_v50  ;;  %v4866_v13 = vpack.c.bf16 %v1415_v26, %v1413_v49  ;;  %v4868_v28 = vpack.c.bf16 %v1416_v32, %v1414_v62 }
 0x1e0   : > { %v914_v0 = vmax.f32 %v879_v29, %v880_v25  ;;  %1984 = vmatpush.bf16.msra.mxu0 %v1972_v27  ;;  %v4895_v29 = vpop.permute.xlu1 %454 }
 0x1e1   : > { %6626 = vst [vmem:[#allocation18_spill] sm:$0xff] %v4895_v29 }
 0x1e2   : > { %v4872_v34 = vpop.f32.mrf.mxu0  ;;  %v4874_v21 = vpop.f32.mrf.mxu1  ;;  %915 = vmax.xlane.f32.xlu2 %v914_v0 }
 0x1e3   : > { %v794_v18 = vpop.f32.mrf.mxu2  ;;  %v843_v38 = vpop.f32.mrf.mxu3 }
 0x1e4   : > { %v795_v22 = vadd.f32 %v794_v18, %v4870_v44  ;;  %v844_v23 = vadd.f32 %v843_v38, %v4870_v44 }
 0x1e5   : > { %3967 = vmatmul.msk.bf16.gmra.mxu0 %vm549_vm1, %v4443_v31  ;;  %3975 = vmatmul.msk.bf16.gmra.mxu1 %vm549_vm1, %v4443_v31  ;;  %v1975_v31 = vsel %vm574_vm0, %v1970_v53, 0 }
 0x1e6   : > { %v881_v50 = vmax.f32 %v795_v22, 0.0  ;;  %v882_v16 = vmax.f32 %v844_v23, 0.0  ;;  %2033 = vmatpush.bf16.msra.mxu1 %v1975_v31 }
 0x1e8   : > { %v917_v43 = vmax.f32 %v881_v50, %v882_v16  ;;  %v4906_v50 = vld [vmem:[%s6428_s1 + $0x28] sm:$0xff] }
 0x1e9   : > { %6627 = vst [vmem:[#allocation19_spill] sm:$0xff] %v4906_v50 }
 0x1ea   : > { %v4885_v58 = vpop.f32.mrf.mxu0  ;;  %v4887_v5 = vpop.f32.mrf.mxu1  ;;  %918 = vmax.xlane.f32.xlu2 %v917_v43 }
 0x1eb   : > { %v796_v6 = vpop.f32.mrf.mxu2  ;;  %v845_v35 = vpop.f32.mrf.mxu3 }
 0x1ec   : > { %v797_v14 = vadd.f32 %v796_v6, %v4883_v41  ;;  %v846_v49 = vadd.f32 %v845_v35, %v4883_v41 }
 0x1ee   : > { %v883_v62 = vmax.f32 %v797_v14, 0.0  ;;  %v884_v26 = vmax.f32 %v846_v49, 0.0  ;;  %v4922_v49 = vpop.permute.xlu0 %464 }
 0x1ef   : > { %1135 = vmatmul.bf16.gmra.mxu2 %v4730_v40  ;;  %1184 = vmatmul.bf16.gmra.mxu3 %v4730_v40  ;;  %6629 = vst [vmem:[#allocation21_spill] sm:$0xff] %v4922_v49 }
 0x1f0   : > { %v920_v32 = vmax.f32 %v883_v62, %v884_v26 }
 0x1f2   : > { %v4897_v25 = vpop.f32.mrf.mxu0  ;;  %v4899_v0 = vpop.f32.mrf.mxu1  ;;  %921 = vmax.xlane.f32.xlu0 %v920_v32 }
 0x1f3   : > { %v799_v18 = vpop.f32.mrf.mxu2  ;;  %v848_v38 = vpop.f32.mrf.mxu3 }
 0x1f4   : > { %v800_v22 = vadd.f32 %v799_v18, %v4895_v29  ;;  %v849_v23 = vadd.f32 %v848_v38, %v4895_v29 }
 0x1f5   : > { %3968 = vmatmul.msk.bf16.gmra.mxu0 %vm549_vm1, %v4906_v50  ;;  %3976 = vmatmul.msk.bf16.gmra.mxu1 %vm549_vm1, %v4906_v50 }
 0x1f6   : > { %v885_v40 = vmax.f32 %v800_v22, 0.0  ;;  %v886_v16 = vmax.f32 %v849_v23, 0.0  ;;  %v4929_v23 = vld [vmem:[%s6428_s1 + $0x30] sm:$0xff] }
 0x1f7   : > { %6630 = vst [vmem:[#allocation22_spill] sm:$0xff] %v4929_v23 }
 0x1f8   : > { %v923_v19 = vmax.f32 %v885_v40, %v886_v16 }
 0x1fa   : > { %v4914_v48 = vpop.f32.mrf.mxu0  ;;  %v4916_v43 = vpop.f32.mrf.mxu1  ;;  %924 = vmax.xlane.f32.xlu1 %v923_v19 }
 0x1fb   : > { %v801_v1 = vpop.f32.mrf.mxu2  ;;  %v850_v53 = vpop.f32.mrf.mxu3 }
 0x1fc   : > { %v802_v6 = vadd.f32 %v801_v1, %v4912_v10  ;;  %v851_v35 = vadd.f32 %v850_v53, %v4912_v10  ;;  %v4935_v19 = vpop.permute.xlu1 %469 }
 0x1fd   : > { %6631 = vst [vmem:[#allocation23_spill] sm:$0xff] %v4935_v19 }
 0x1fe   : > { %v887_v27 = vmax.f32 %v802_v6, 0.0  ;;  %v888_v31 = vmax.f32 %v851_v35, 0.0 }
 0x1ff   : > { %1140 = vmatmul.bf16.gmra.mxu2 %v4741_v30  ;;  %1189 = vmatmul.bf16.gmra.mxu3 %v4741_v30 }
 0x200   : > { %v926_v14 = vmax.f32 %v887_v27, %v888_v31 }
 0x202   : > { %v1342_v62 = vpop.f32.mrf.mxu0  ;;  %v1391_v26 = vpop.f32.mrf.mxu1  ;;  %927 = vmax.xlane.f32.xlu2 %v926_v14 }
 0x203   : > { %v804_v32 = vpop.f32.mrf.mxu2  ;;  %v853_v18 = vpop.f32.mrf.mxu3 }
 0x204   : > { %v805_v38 = vadd.f32 %v804_v32, %v4922_v49  ;;  %v854_v22 = vadd.f32 %v853_v18, %v4922_v49 }
 0x205   : > { %3969 = vmatmul.msk.bf16.gmra.mxu0 %vm549_vm1, %v4929_v23  ;;  %3977 = vmatmul.msk.bf16.gmra.mxu1 %vm549_vm1, %v4929_v23 }
 0x206   : > { %v889_v30 = vmax.f32 %v805_v38, 0.0  ;;  %v890_v40 = vmax.f32 %v854_v22, 0.0  ;;  %v4941_v38 = vpop.permute.xlu2 %474 }
 0x207   : > { %6632 = vst [vmem:[#allocation24_spill] sm:$0xff] %v4941_v38 }
 0x208   : > { %v929_v16 = vmax.f32 %v889_v30, %v890_v40 }
 0x20a   : > { %v1344_v1 = vpop.f32.mrf.mxu0  ;;  %v1393_v53 = vpop.f32.mrf.mxu1  ;;  %930 = vmax.xlane.f32.xlu0 %v929_v16 }
 0x20b   : > { %v806_v6 = vpop.f32.mrf.mxu2  ;;  %v855_v35 = vpop.f32.mrf.mxu3 }
 0x20c   : > { %v807_v27 = vadd.f32 %v806_v6, %v4935_v19  ;;  %v856_v31 = vadd.f32 %v855_v35, %v4935_v19  ;;  %v4948_v35 = vld [vmem:[%s6428_s1 + $0x38] sm:$0xff]  ;;  %v1394_v19 = vadd.f32 %v1393_v53, %v4529_v61  ;;  %v1340_v53 = vadd.f32 %v4914_v48, %v4507_v54 }
 0x20d   : > { %6633 = vst [vmem:[#allocation25_spill] sm:$0xff] %v4948_v35  ;;  %v1387_v48 = vadd.f32 %v4899_v0, %v4496_v51 }
 0x20e   : > { %v891_v14 = vmax.f32 %v807_v27, 0.0  ;;  %v892_v32 = vmax.f32 %v856_v31, 0.0 }
 0x20f   : > { %1145 = vmatmul.bf16.gmra.mxu2 %v4752_v42  ;;  %1194 = vmatmul.bf16.gmra.mxu3 %v4752_v42 }
 0x210   : > { %v932_v18 = vmax.f32 %v891_v14, %v892_v32  ;;  %v4954_v14 = vpop.permute.xlu0 %479 }
 0x212   : > { %v1347_v22 = vpop.f32.mrf.mxu0  ;;  %v1396_v30 = vpop.f32.mrf.mxu1  ;;  %933 = vmax.xlane.f32.xlu1 %v932_v18 }
 0x213   : > { %v809_v40 = vpop.f32.mrf.mxu2  ;;  %v858_v16 = vpop.f32.mrf.mxu3  ;;  %v1348_v32 = vadd.f32 %v1347_v22, %v4502_v52  ;;  %v1397_v18 = vadd.f32 %v1396_v30, %v4502_v52 }
 0x214   : > { %v810_v23 = vadd.f32 %v809_v40, %v4941_v38  ;;  %v859_v6 = vadd.f32 %v858_v16, %v4941_v38  ;;  %v1345_v38 = vadd.f32 %v1344_v1, %v4529_v61 }
 0x215   : > { %3970 = vmatmul.msk.bf16.gmra.mxu0 %vm549_vm1, %v4948_v35  ;;  %3978 = vmatmul.msk.bf16.gmra.mxu1 %vm549_vm1, %v4948_v35  ;;  %v1429_v52 = vmax.f32 %v1348_v32, 0.0 }
 0x216   : > { %v893_v42 = vmax.f32 %v810_v23, 0.0  ;;  %v894_v27 = vmax.f32 %v859_v6, 0.0  ;;  %v1427_v61 = vmax.f32 %v1345_v38, 0.0 }
 0x218   : > { %v935_v31 = vmax.f32 %v893_v42, %v894_v27  ;;  %v1343_v42 = vadd.f32 %v1342_v62, %v4509_v55  ;;  %v1392_v27 = vadd.f32 %v1391_v26, %v4509_v55  ;;  %v1428_v62 = vmax.f32 %v1394_v19, 0.0 }
 0x219   : > { %v1423_v19 = vmax.f32 %v1340_v53, 0.0 }
 0x21a   : > { %v1349_v40 = vpop.f32.mrf.mxu0  ;;  %v1398_v16 = vpop.f32.mrf.mxu1  ;;  %936 = vmax.xlane.f32.xlu2 %v935_v31  ;;  %v1430_v31 = vmax.f32 %v1397_v18, 0.0 }
 0x21b   : > { %v1350_v49 = vadd.f32 %v1349_v40, %v4511_v56  ;;  %v1399_v35 = vadd.f32 %v1398_v16, %v4511_v56  ;;  %v811_v23 = vpop.f32.mrf.mxu2  ;;  %v860_v6 = vpop.f32.mrf.mxu3  ;;  %v1389_v40 = vadd.f32 %v4916_v43, %v4507_v54  ;;  %v1425_v43 = vmax.f32 %v1343_v42, 0.0 }
 0x21c   : > { %v812_v22 = vadd.f32 %v811_v23, %v4954_v14  ;;  %v861_v30 = vadd.f32 %v860_v6, %v4954_v14  ;;  %v4972_v18 = vpop.permute.xlu1 %484  ;;  %v1333_v42 = vadd.f32 %v4872_v34, %v4527_v60 }
 0x21d   : > { %v1431_v10 = vmax.f32 %v1350_v49, 0.0  ;;  %v1432_v1 = vmax.f32 %v1399_v35, 0.0  ;;  %v1338_v49 = vadd.f32 %v4897_v25, %v4496_v51  ;;  %v1426_v35 = vmax.f32 %v1392_v27, 0.0 }
 0x21e   : > { %v895_v16 = vmax.f32 %v812_v22, 0.0  ;;  %v896_v56 = vmax.f32 %v861_v30, 0.0  ;;  %v1424_v38 = vmax.f32 %v1389_v40, 0.0  ;;  %v1445_v6 = vpack.c.bf16 %v1427_v61, %v1425_v43  ;;  %v4991_v61 = vld [vmem:[%s6428_s1] sm:$0xff] }
 0x21f   : > { %v1447_v50 = vpack.c.bf16 %v1431_v10, %v1429_v52  ;;  %v1448_v26 = vpack.c.bf16 %v1432_v1, %v1430_v31  ;;  %1150 = vmatmul.bf16.gmra.mxu2 %v4771_v57  ;;  %1199 = vmatmul.bf16.gmra.mxu3 %v4771_v57  ;;  %v1335_v52 = vadd.f32 %v4885_v58, %v4538_v3  ;;  %v1422_v27 = vmax.f32 %v1387_v48, 0.0 }
 0x220   : > { %v938_v32 = vmax.f32 %v895_v16, %v896_v56  ;;  %v1384_v10 = vadd.f32 %v4887_v5, %v4538_v3  ;;  %v1446_v22 = vpack.c.bf16 %v1428_v62, %v1426_v35  ;;  %v1382_v58 = vadd.f32 %v4874_v21, %v4527_v60  ;;  %v4997_v16 = vpop.permute.xlu2 %489 }
 0x221   : > { %1449 = vmatpush.bf16.msra.mxu2 %v1447_v50  ;;  %1498 = vmatpush.bf16.msra.mxu3 %v1448_v26  ;;  %v1421_v5 = vmax.f32 %v1338_v49, 0.0  ;;  %v1419_v34 = vmax.f32 %v1335_v52, 0.0  ;;  %v1444_v53 = vpack.c.bf16 %v1424_v38, %v1422_v27  ;;  %v1417_v62 = vmax.f32 %v1333_v42, 0.0 }
 0x222   : > { %v1649_v57 = vpop.f32.mrf.mxu0  ;;  %v1698_v56 = vpop.f32.mrf.mxu1  ;;  %939 = vmax.xlane.f32.xlu0 %v938_v32  ;;  %v1420_v1 = vmax.f32 %v1384_v10, 0.0  ;;  %v1418_v26 = vmax.f32 %v1382_v58, 0.0 }
 0x223   : > { %v814_v23 = vpop.f32.mrf.mxu2  ;;  %v863_v25 = vpop.f32.mrf.mxu3  ;;  %v1443_v21 = vpack.c.bf16 %v1423_v19, %v1421_v5  ;;  %v1650_v32 = vadd.f32 %v1649_v57, %v4546_v7  ;;  %v1699_v49 = vadd.f32 %v1698_v56, %v4546_v7  ;;  %v1441_v38 = vpack.c.bf16 %v1419_v34, %v1417_v62 }
 0x224   : > { %v815_v0 = vadd.f32 %v814_v23, %v4972_v18  ;;  %v864_v50 = vadd.f32 %v863_v25, %v4972_v18  ;;  %v1442_v23 = vpack.c.bf16 %v1420_v1, %v1418_v26  ;;  %v5028_v26 = vpop.permute.xlu1 %499 }
 0x225   : > { %1450 = vmatpush.bf16.msra.mxu2 %v1445_v6  ;;  %1499 = vmatpush.bf16.msra.mxu3 %v1446_v22  ;;  %v1738_v57 = vmax.f32 %v1650_v32, 0.0  ;;  %v1739_v22 = vmax.f32 %v1699_v49, 0.0 }
 0x226   : > { %v897_v30 = vmax.f32 %v815_v0, 0.0  ;;  %v898_v31 = vmax.f32 %v864_v50, 0.0  ;;  %3980 = vmatmul.msk.bf16.vlgmr.msra.gmra.mxu0 %vm549_vm1, %v4991_v61  ;;  %3988 = vmatmul.msk.bf16.vlgmr.msra.gmra.mxu1 %vm549_vm1, %v4991_v61 }
 0x228   : > { %v941_v40 = vmax.f32 %v897_v30, %v898_v31  ;;  %v5011_v30 = vpop.permute.xlu0 %494 }
 0x229   : > { %1451 = vmatpush.bf16.msra.mxu2 %v1443_v21  ;;  %1500 = vmatpush.bf16.msra.mxu3 %v1444_v53 }
 0x22a   : > { %v1651_v48 = vpop.f32.mrf.mxu0  ;;  %v1700_v43 = vpop.f32.mrf.mxu1  ;;  %942 = vmax.xlane.f32.xlu1 %v941_v40 }
 0x22b   : > { %v1652_v35 = vadd.f32 %v1651_v48, %v4552_v11  ;;  %v1701_v52 = vadd.f32 %v1700_v43, %v4552_v11  ;;  %v816_v10 = vpop.f32.mrf.mxu2  ;;  %v865_v19 = vpop.f32.mrf.mxu3 }
 0x22c   : > { %v817_v25 = vadd.f32 %v816_v10, %v4997_v16  ;;  %v866_v6 = vadd.f32 %v865_v19, %v4997_v16 }
 0x22d   : > { %v1740_v56 = vmax.f32 %v1652_v35, 0.0  ;;  %v1741_v0 = vmax.f32 %v1701_v52, 0.0  ;;  %1452 = vmatpush.bf16.msra.mxu2 %v1441_v38  ;;  %1501 = vmatpush.bf16.msra.mxu3 %v1442_v23  ;;  %v3328_v38 = vlaneseq }
 0x22e   : > { %v899_v50 = vmax.f32 %v817_v25, 0.0  ;;  %v900_v42 = vmax.f32 %v866_v6, 0.0 }
 0x22f   : > { %1155 = vmatmul.bf16.gmra.mxu2 %v4796_v36  ;;  %1204 = vmatmul.bf16.gmra.mxu3 %v4796_v36  ;;  %v5007_v58 = vpack.c.bf16 %v1740_v56, %v1738_v57  ;;  %v5009_v5 = vpack.c.bf16 %v1741_v0, %v1739_v22  ;;  %v5044_v0 = vand.u32 127, %v3328_v38 }
 0x230   : > { %v944_v27 = vmax.f32 %v899_v50, %v900_v42 }
 0x231   : > { %1453 = vmatpush.bf16.msra.mxu2 %v4866_v13  ;;  %1502 = vmatpush.bf16.msra.mxu3 %v4868_v28  ;;  %v5022_v13 = vld [vmem:[%s6428_s1 + $0x8] sm:$0xff]  ;;  %6634 = vst [vmem:[#allocation26_spill] sm:$0xff] %v5044_v0 }
 0x232   : > { %v1654_v31 = vpop.f32.mrf.mxu0  ;;  %v1703_v34 = vpop.f32.mrf.mxu1  ;;  %945 = vmax.xlane.f32.xlu2 %v944_v27 }
 0x233   : > { %v819_v1 = vpop.f32.mrf.mxu2  ;;  %v868_v21 = vpop.f32.mrf.mxu3 }
 0x234   : > { %v820_v53 = vadd.f32 %v819_v1, %v5011_v30  ;;  %v869_v36 = vadd.f32 %v868_v21, %v5011_v30 }
 0x235   : > { %1454 = vmatpush.bf16.msra.mxu2 %v4844_v45  ;;  %1503 = vmatpush.bf16.msra.mxu3 %v4846_v33  ;;  %v1655_v45 = vadd.f32 %v1654_v31, %v4544_v4  ;;  %v1704_v33 = vadd.f32 %v1703_v34, %v4544_v4 }
 0x236   : > { %v901_v40 = vmax.f32 %v820_v53, 0.0  ;;  %v902_v62 = vmax.f32 %v869_v36, 0.0  ;;  %3981 = vmatmul.msk.bf16.gmra.mxu0 %vm549_vm1, %v5022_v13  ;;  %3989 = vmatmul.msk.bf16.gmra.mxu1 %vm549_vm1, %v5022_v13 }
 0x237   : > { %v1742_v23 = vmax.f32 %v1655_v45, 0.0  ;;  %v1743_v25 = vmax.f32 %v1704_v33, 0.0 }
 0x238   : > { %v947_v28 = vmax.f32 %v901_v40, %v902_v62  ;;  %v5057_v62 = vld [vmem:[%s6428_s1 + $0x10] sm:$0xff] }
 0x239   : > { %1455 = vmatpush.bf16.msra.mxu2 %v4822_v39  ;;  %1504 = vmatpush.bf16.msra.mxu3 %v4824_v20 }
 0x23a   : > { %v1656_v32 = vpop.f32.mrf.mxu0  ;;  %v1705_v49 = vpop.f32.mrf.mxu1  ;;  %948 = vmax.xlane.f32.xlu0 %v947_v28 }
 0x23b   : > { %v1657_v48 = vadd.f32 %v1656_v32, %v4564_v24  ;;  %v1706_v43 = vadd.f32 %v1705_v49, %v4564_v24  ;;  %v821_v35 = vpop.f32.mrf.mxu2  ;;  %v870_v52 = vpop.f32.mrf.mxu3 }
 0x23c   : > { %v822_v10 = vadd.f32 %v821_v35, %v5028_v26  ;;  %v871_v19 = vadd.f32 %v870_v52, %v5028_v26  ;;  %v5068_v35 = vadd.s32 4294967280, %v5044_v0 }
 0x23d   : > { %v1744_v6 = vmax.f32 %v1657_v48, 0.0  ;;  %v1745_v39 = vmax.f32 %v1706_v43, 0.0  ;;  %1456 = vmatpush.bf16.msra.mxu2 %v4800_v9  ;;  %1505 = vmatpush.bf16.msra.mxu3 %v4802_v46  ;;  %v907_v42 = vpop.xlane.xlu2 %906  ;;  %v5049_v9 = vadd.s32 4294967288, %v5044_v0 }
 0x23e   : > { %v903_v20 = vmax.f32 %v822_v10, 0.0  ;;  %v904_v57 = vmax.f32 %v871_v19, 0.0  ;;  %v3330_v36 = vperm.slane %v907_v42, %v5044_v0  ;;  %6636 = vst [vmem:[#allocation28_spill] sm:$0xff] %v5068_v35 }
 0x23f   : > { %v5040_v22 = vpack.c.bf16 %v1744_v6, %v1742_v23  ;;  %v5042_v56 = vpack.c.bf16 %v1745_v39, %v1743_v25  ;;  %6635 = vst [vmem:[#allocation27_spill] sm:$0xff] %v5049_v9 }
 0x240   : > { %1457 = vmatmul.bf16.vlgmr.msra.gmra.mxu2 %v4668_v12  ;;  %1506 = vmatmul.bf16.vlgmr.msra.gmra.mxu3 %v4668_v12  ;;  %v950_v50 = vmax.f32 %v903_v20, %v904_v57 }
 0x242   : > { %v1659_v27 = vpop.f32.mrf.mxu0  ;;  %v1708_v31 = vpop.f32.mrf.mxu1  ;;  %951 = vmax.xlane.f32.xlu1 %v950_v50 }
 0x243   : > { %v1121_v46 = vpop.f32.mrf.mxu2  ;;  %v1170_v34 = vpop.f32.mrf.mxu3  ;;  %v1660_v32 = vadd.f32 %v1659_v27, %v4548_v8  ;;  %v1709_v49 = vadd.f32 %v1708_v31, %v4548_v8 }
 0x244   : > { %v1122_v1 = vadd.f32 %v1121_v46, %v4826_v15  ;;  %v1171_v21 = vadd.f32 %v1170_v34, %v4826_v15 }
 0x245   : > { %v910_v53 = vpop.xlane.xlu0 %909  ;;  %v1746_v6 = vmax.f32 %v1660_v32, 0.0  ;;  %v1747_v39 = vmax.f32 %v1709_v49, 0.0 }
 0x246   : > { %v1210_v40 = vmax.f32 %v1122_v1, 0.0  ;;  %v1211_v12 = vmax.f32 %v1171_v21, 0.0  ;;  %3982 = vmatmul.msk.bf16.gmra.mxu0 %vm549_vm1, %v5057_v62  ;;  %3990 = vmatmul.msk.bf16.gmra.mxu1 %vm549_vm1, %v5057_v62  ;;  %v3332_v28 = vperm.slane %v910_v53, %v5049_v9  ;;  %v5083_v21 = vld [vmem:[%s6430_s3 + $0x8] sm:$0xff] }
 0x247   : > { %6637 = vst [vmem:[#allocation29_spill] sm:$0xff] %v5083_v21 }
 0x248   : > { %v3334_v45 = vsel %vm3333_vm2, %v3332_v28, %v3330_v36  ;;  %v1242_v33 = vmax.f32 %v1210_v40, %v1211_v12  ;;  %v5088_v12 = vadd.s32 4294967272, %v5044_v0 }
 0x24a   : > { %v1661_v48 = vpop.f32.mrf.mxu0  ;;  %v1710_v43 = vpop.f32.mrf.mxu1  ;;  %1243 = vmax.xlane.f32.xlu2 %v1242_v33  ;;  %6638 = vst [vmem:[#allocation30_spill] sm:$0xff] %v5088_v12 }
 0x24b   : > { %v1662_v52 = vadd.f32 %v1661_v48, %v4536_v2  ;;  %v1711_v10 = vadd.f32 %v1710_v43, %v4536_v2  ;;  %v1123_v19 = vpop.f32.mrf.mxu2  ;;  %v1172_v38 = vpop.f32.mrf.mxu3 }
 0x24c   : > { %v1124_v23 = vadd.f32 %v1123_v19, %v4834_v47  ;;  %v1173_v25 = vadd.f32 %v1172_v38, %v4834_v47 }
 0x24d   : > { %v1748_v20 = vmax.f32 %v1662_v52, 0.0  ;;  %v1749_v57 = vmax.f32 %v1711_v10, 0.0  ;;  %v913_v50 = vpop.xlane.xlu1 %912  ;;  %v5095_v52 = vld [vmem:[%s6428_s1 + $0x18] sm:$0xff] }
 0x24e   : > { %v1212_v42 = vmax.f32 %v1124_v23, 0.0  ;;  %v1213_v27 = vmax.f32 %v1173_v25, 0.0  ;;  %v3336_v31 = vperm.slane %v913_v50, %v5068_v35  ;;  %6639 = vst [vmem:[#allocation31_spill] sm:$0xff] %v5095_v52 }
 0x24f   : > { %v5075_v46 = vpack.c.bf16 %v1748_v20, %v1746_v6  ;;  %v5077_v34 = vpack.c.bf16 %v1749_v57, %v1747_v39  ;;  %v5106_v20 = vadd.s32 4294967264, %v5044_v0 }
 0x250   : > { %v3338_v1 = vsel %vm3337_vm3, %v3336_v31, %v3334_v45  ;;  %1462 = vmatmul.bf16.gmra.mxu2 %v5083_v21  ;;  %1511 = vmatmul.bf16.gmra.mxu3 %v5083_v21  ;;  %v1245_v53 = vmax.f32 %v1212_v42, %v1213_v27 }
 0x251   : > { %6640 = vst [vmem:[#allocation32_spill] sm:$0xff] %v5106_v20 }
 0x252   : > { %v1664_v36 = vpop.f32.mrf.mxu0  ;;  %v1713_v40 = vpop.f32.mrf.mxu1  ;;  %1246 = vmax.xlane.f32.xlu0 %v1245_v53 }
 0x253   : > { %v1126_v28 = vpop.f32.mrf.mxu2  ;;  %v1175_v33 = vpop.f32.mrf.mxu3  ;;  %v1665_v23 = vadd.f32 %v1664_v36, %v4525_v59  ;;  %v1714_v25 = vadd.f32 %v1713_v40, %v4525_v59 }
 0x254   : > { %v1127_v45 = vadd.f32 %v1126_v28, %v4848_v17  ;;  %v1176_v32 = vadd.f32 %v1175_v33, %v4848_v17 }
 0x255   : > { %v916_v49 = vpop.xlane.xlu2 %915  ;;  %v1750_v53 = vmax.f32 %v1665_v23, 0.0  ;;  %v1751_v36 = vmax.f32 %v1714_v25, 0.0 }
 0x256   : > { %v1214_v48 = vmax.f32 %v1127_v45, 0.0  ;;  %v1215_v43 = vmax.f32 %v1176_v32, 0.0  ;;  %3983 = vmatmul.msk.bf16.gmra.mxu0 %vm549_vm1, %v5095_v52  ;;  %3991 = vmatmul.msk.bf16.gmra.mxu1 %vm549_vm1, %v5095_v52  ;;  %v3340_v10 = vperm.slane %v916_v49, %v5088_v12 }
 0x258   : > { %v3342_v19 = vsel %vm3341_vm4, %v3340_v10, %v3338_v1  ;;  %v1248_v38 = vmax.f32 %v1214_v48, %v1215_v43 }
 0x25a   : > { %v1666_v6 = vpop.f32.mrf.mxu0  ;;  %v1715_v39 = vpop.f32.mrf.mxu1  ;;  %1249 = vmax.xlane.f32.xlu1 %v1248_v38  ;;  %v5121_v38 = vld [vmem:[%s6430_s3 + $0x10] sm:$0xff] }
 0x25b   : > { %v1667_v57 = vadd.f32 %v1666_v6, %v4534_v63  ;;  %v1716_v50 = vadd.f32 %v1715_v39, %v4534_v63  ;;  %v1128_v42 = vpop.f32.mrf.mxu2  ;;  %v1177_v27 = vpop.f32.mrf.mxu3  ;;  %6641 = vst [vmem:[#allocation33_spill] sm:$0xff] %v5121_v38  ;;  %v5130_v39 = vadd.s32 4294967256, %v5044_v0 }
 0x25c   : > { %v1129_v31 = vadd.f32 %v1128_v42, %v4856_v37  ;;  %v1178_v1 = vadd.f32 %v1177_v27, %v4856_v37 }
 0x25d   : > { %v1752_v40 = vmax.f32 %v1667_v57, 0.0  ;;  %v1753_v28 = vmax.f32 %v1716_v50, 0.0  ;;  %v919_v33 = vpop.xlane.xlu2 %918  ;;  %6642 = vst [vmem:[#allocation34_spill] sm:$0xff] %v5130_v39 }
 0x25e   : > { %v1216_v45 = vmax.f32 %v1129_v31, 0.0  ;;  %v1217_v32 = vmax.f32 %v1178_v1, 0.0  ;;  %v3344_v49 = vperm.slane %v919_v33, %v5106_v20  ;;  %v3996_v33 = vld [vmem:[%s4351_s21 + $0x28] sm:$0xff] }
 0x25f   : > { %v5113_v48 = vpack.c.bf16 %v1752_v40, %v1750_v53  ;;  %v5115_v43 = vpack.c.bf16 %v1753_v28, %v1751_v36  ;;  %v5137_v53 = vld [vmem:[%s6428_s1 + $0x20] sm:$0xff] }
 0x260   : > { %v3346_v10 = vsel %vm3345_vm5, %v3344_v49, %v3342_v19  ;;  %1467 = vmatmul.bf16.gmra.mxu2 %v5121_v38  ;;  %1516 = vmatmul.bf16.gmra.mxu3 %v5121_v38  ;;  %v1251_v23 = vmax.f32 %v1216_v45, %v1217_v32  ;;  %6643 = vst [vmem:[#allocation35_spill] sm:$0xff] %v5137_v53  ;;  %v2304_v45 = vunpack.c.l.b16 %v3996_v33  ;;  %v2305_v32 = vunpack.c.h.b16 %v3996_v33 }
 0x262   : > { %v5125_v25 = vpop.f32.mrf.mxu0  ;;  %v5127_v6 = vpop.f32.mrf.mxu1  ;;  %1252 = vmax.xlane.f32.xlu2 %v1251_v23 }
 0x263   : > { %v1131_v19 = vpop.f32.mrf.mxu2  ;;  %v1180_v57 = vpop.f32.mrf.mxu3 }
 0x264   : > { %v1132_v50 = vadd.f32 %v1131_v19, %v4870_v44  ;;  %v1181_v42 = vadd.f32 %v1180_v57, %v4870_v44  ;;  %v5151_v19 = vadd.s32 4294967248, %v5044_v0 }
 0x265   : > { %v922_v27 = vpop.xlane.xlu0 %921 }
 0x266   : > { %v1218_v31 = vmax.f32 %v1132_v50, 0.0  ;;  %v1219_v1 = vmax.f32 %v1181_v42, 0.0  ;;  %3984 = vmatmul.msk.bf16.gmra.mxu0 %vm549_vm1, %v5137_v53  ;;  %3992 = vmatmul.msk.bf16.gmra.mxu1 %vm549_vm1, %v5137_v53  ;;  %v3348_v36 = vperm.slane %v922_v27, %v5130_v39  ;;  %6644 = vst [vmem:[#allocation36_spill] sm:$0xff] %v5151_v19  ;;  %v2306_v42 = vpack.c.b16 %v2304_v45, %v2304_v45  ;;  %v5162_v45 = vld [vmem:[%s6430_s3 + $0x18] sm:$0xff] }
 0x267   : > { %v2307_v53 = vpack.c.b16 %v2305_v32, %v2305_v32  ;;  %6645 = vst [vmem:[#allocation37_spill] sm:$0xff] %v5162_v45 }
 0x268   : > { %v3350_v40 = vsel %vm3349_vm6, %v3348_v36, %v3346_v10  ;;  %v1254_v28 = vmax.f32 %v1218_v31, %v1219_v1  ;;  %v2309_v1 = vsel %vm574_vm0, %v2306_v42, 0 }
 0x269   : > { %v2312_v36 = vsel %vm574_vm0, %v2307_v53, 0  ;;  %2321 = vmatpush.bf16.msrb.mxu0 %v2309_v1 }
 0x26a   : > { %v5146_v49 = vpop.f32.mrf.mxu0  ;;  %v5148_v23 = vpop.f32.mrf.mxu1  ;;  %1255 = vmax.xlane.f32.xlu0 %v1254_v28  ;;  %2370 = vmatpush.bf16.msrb.mxu1 %v2312_v36 }
 0x26b   : > { %v1133_v57 = vpop.f32.mrf.mxu2  ;;  %v1182_v50 = vpop.f32.mrf.mxu3 }
 0x26c   : > { %v1134_v27 = vadd.f32 %v1133_v57, %v4883_v41  ;;  %v1183_v10 = vadd.f32 %v1182_v50, %v4883_v41  ;;  %v5171_v50 = vadd.s32 4294967240, %v5044_v0 }
 0x26d   : > { %v925_v31 = vpop.xlane.xlu1 %924 }
 0x26e   : > { %v1220_v33 = vmax.f32 %v1134_v27, 0.0  ;;  %v1221_v39 = vmax.f32 %v1183_v10, 0.0  ;;  %v3352_v28 = vperm.slane %v925_v31, %v5151_v19  ;;  %6646 = vst [vmem:[#allocation38_spill] sm:$0xff] %v5171_v50 }
 0x270   : > { %v3354_v44 = vsel %vm3353_vm7, %v3352_v28, %v3350_v40  ;;  %1472 = vmatmul.bf16.gmra.mxu2 %v5162_v45  ;;  %1521 = vmatmul.bf16.gmra.mxu3 %v5162_v45  ;;  %v1257_v32 = vmax.f32 %v1220_v33, %v1221_v39  ;;  %v6647_v28 = vld [vmem:[#allocation19_spill] sm:$0xff] }
 0x272   : > { %v5166_v57 = vpop.f32.mrf.mxu0  ;;  %v5168_v53 = vpop.f32.mrf.mxu1  ;;  %1258 = vmax.xlane.f32.xlu1 %v1257_v32 }
 0x273   : > { %v1136_v42 = vpop.f32.mrf.mxu2  ;;  %v1185_v40 = vpop.f32.mrf.mxu3 }
 0x274   : > { %v1137_v27 = vadd.f32 %v1136_v42, %v4895_v29  ;;  %v1186_v10 = vadd.f32 %v1185_v40, %v4895_v29  ;;  %v5186_v40 = vadd.s32 4294967232, %v5044_v0  ;;  %v6649_v29 = vld [vmem:[#allocation20_spill] sm:$0xff] }
 0x275   : > { %v928_v31 = vpop.xlane.xlu2 %927 }
 0x276   : > { %v1222_v1 = vmax.f32 %v1137_v27, 0.0  ;;  %v1223_v36 = vmax.f32 %v1186_v10, 0.0  ;;  %3985 = vmatmul.msk.bf16.gmra.mxu0 %vm549_vm1, %v6647_v28  ;;  %3993 = vmatmul.msk.bf16.gmra.mxu1 %vm549_vm1, %v6647_v28  ;;  %v3356_v39 = vperm.slane %v928_v31, %v5171_v50  ;;  %6648 = vst [vmem:[#allocation19_spill] sm:$0xff] %v5186_v40 }
 0x278   : > { %v3358_v33 = vsel %vm3357_vm8, %v3356_v39, %v3354_v44  ;;  %v1260_v32 = vmax.f32 %v1222_v1, %v1223_v36  ;;  %v5195_v36 = vld [vmem:[%s6430_s3 + $0x20] sm:$0xff] }
 0x279   : > { %6650 = vst [vmem:[#allocation39_spill] sm:$0xff] %v5195_v36 }
 0x27a   : > { %v5181_v45 = vpop.f32.mrf.mxu0  ;;  %v5183_v42 = vpop.f32.mrf.mxu1  ;;  %1261 = vmax.xlane.f32.xlu2 %v1260_v32 }
 0x27b   : > { %v1138_v27 = vpop.f32.mrf.mxu2  ;;  %v1187_v10 = vpop.f32.mrf.mxu3 }
 0x27c   : > { %v1139_v19 = vadd.f32 %v1138_v27, %v6649_v29  ;;  %v1188_v41 = vadd.f32 %v1187_v10, %v6649_v29  ;;  %v6652_v10 = vld [vmem:[#allocation21_spill] sm:$0xff] }
 0x27d   : > { %v931_v28 = vpop.xlane.xlu0 %930 }
 0x27e   : > { %v1224_v31 = vmax.f32 %v1139_v19, 0.0  ;;  %v1225_v50 = vmax.f32 %v1188_v41, 0.0  ;;  %v3360_v44 = vperm.slane %v931_v28, %v5186_v40  ;;  %v5204_v41 = vadd.s32 4294967224, %v5044_v0 }
 0x280   : > { %v3362_v1 = vsel %vm3361_vm9, %v3360_v44, %v3358_v33  ;;  %1477 = vmatmul.bf16.gmra.mxu2 %v5195_v36  ;;  %1526 = vmatmul.bf16.gmra.mxu3 %v5195_v36  ;;  %v1263_v39 = vmax.f32 %v1224_v31, %v1225_v50  ;;  %6651 = vst [vmem:[#allocation40_spill] sm:$0xff] %v5204_v41  ;;  %v6653_v36 = vld [vmem:[#allocation22_spill] sm:$0xff] }
 0x282   : > { %v5199_v32 = vpop.f32.mrf.mxu0  ;;  %v5201_v27 = vpop.f32.mrf.mxu1  ;;  %1264 = vmax.xlane.f32.xlu0 %v1263_v39 }
 0x283   : > { %v1141_v19 = vpop.f32.mrf.mxu2  ;;  %v1190_v33 = vpop.f32.mrf.mxu3 }
 0x284   : > { %v1142_v28 = vadd.f32 %v1141_v19, %v6652_v10  ;;  %v1191_v44 = vadd.f32 %v1190_v33, %v6652_v10  ;;  %v5215_v19 = vadd.s32 4294967216, %v5044_v0 }
 0x285   : > { %v934_v40 = vpop.xlane.xlu1 %933 }
 0x286   : > { %v1226_v29 = vmax.f32 %v1142_v28, 0.0  ;;  %v1227_v38 = vmax.f32 %v1191_v44, 0.0  ;;  %3986 = vmatmul.msk.bf16.gmra.mxu0 %vm549_vm1, %v6653_v36  ;;  %3994 = vmatmul.msk.bf16.gmra.mxu1 %vm549_vm1, %v6653_v36  ;;  %v3364_v50 = vperm.slane %v934_v40, %v5204_v41  ;;  %6654 = vst [vmem:[#allocation22_spill] sm:$0xff] %v5215_v19  ;;  %v6655_v44 = vld [vmem:[#allocation23_spill] sm:$0xff]  ;;  %v6659_v41 = vld [vmem:[#allocation25_spill] sm:$0xff] }
 0x288   : > { %v3366_v31 = vsel %vm3365_vm10, %v3364_v50, %v3362_v1  ;;  %v1266_v39 = vmax.f32 %v1226_v29, %v1227_v38  ;;  %v5224_v38 = vld [vmem:[%s6430_s3 + $0x28] sm:$0xff] }
 0x289   : > { %6656 = vst [vmem:[#allocation41_spill] sm:$0xff] %v5224_v38 }
 0x28a   : > { %v1681_v20 = vpop.f32.mrf.mxu0  ;;  %v1730_v37 = vpop.f32.mrf.mxu1  ;;  %1267 = vmax.xlane.f32.xlu1 %v1266_v39 }
 0x28b   : > { %v1143_v33 = vpop.f32.mrf.mxu2  ;;  %v1192_v28 = vpop.f32.mrf.mxu3 }
 0x28c   : > { %v1144_v10 = vadd.f32 %v1143_v33, %v6655_v44  ;;  %v1193_v63 = vadd.f32 %v1192_v28, %v6655_v44  ;;  %v6658_v33 = vld [vmem:[#allocation24_spill] sm:$0xff] }
 0x28d   : > { %v937_v59 = vpop.xlane.xlu2 %936 }
 0x28e   : > { %v1228_v36 = vmax.f32 %v1144_v10, 0.0  ;;  %v1229_v12 = vmax.f32 %v1193_v63, 0.0  ;;  %v3368_v40 = vperm.slane %v937_v59, %v5215_v19  ;;  %v5229_v10 = vadd.s32 4294967208, %v5044_v0 }
 0x290   : > { %v3370_v29 = vsel %vm3369_vm11, %v3368_v40, %v3366_v31  ;;  %1482 = vmatmul.bf16.gmra.mxu2 %v5224_v38  ;;  %1531 = vmatmul.bf16.gmra.mxu3 %v5224_v38  ;;  %v1269_v1 = vmax.f32 %v1228_v36, %v1229_v12  ;;  %6657 = vst [vmem:[#allocation42_spill] sm:$0xff] %v5229_v10  ;;  %v6660_v38 = vld [vmem:[#allocation5_spill] sm:$0xff] }
 0x292   : > { %v1684_v50 = vpop.f32.mrf.mxu0  ;;  %v1733_v39 = vpop.f32.mrf.mxu1  ;;  %1270 = vmax.xlane.f32.xlu2 %v1269_v1 }
 0x293   : > { %v1146_v63 = vpop.f32.mrf.mxu2  ;;  %v1195_v59 = vpop.f32.mrf.mxu3  ;;  %v1685_v52 = vadd.f32 %v1684_v50, %v6660_v38 }
 0x294   : > { %v1147_v31 = vadd.f32 %v1146_v63, %v6658_v33  ;;  %v1196_v28 = vadd.f32 %v1195_v59, %v6658_v33  ;;  %v1734_v63 = vadd.f32 %v1733_v39, %v6660_v38  ;;  %v5243_v59 = vadd.f32 %v5181_v45, %v4507_v54 }
 0x295   : > { %v940_v40 = vpop.xlane.xlu0 %939  ;;  %v5246_v33 = vadd.s32 4294967200, %v5044_v0  ;;  %v1680_v45 = vadd.f32 %v5199_v32, %v4509_v55  ;;  %v1766_v17 = vmax.f32 %v1685_v52, 0.0 }
 0x296   : > { %v1230_v19 = vmax.f32 %v1147_v31, 0.0  ;;  %v1231_v44 = vmax.f32 %v1196_v28, 0.0  ;;  %3987 = vmatmul.msk.bf16.gmra.mxu0 %vm549_vm1, %v6659_v41  ;;  %3995 = vmatmul.msk.bf16.gmra.mxu1 %vm549_vm1, %v6659_v41  ;;  %v3372_v12 = vperm.slane %v940_v40, %v5229_v10  ;;  %v6661_v41 = vld [vmem:[#allocation8_spill] sm:$0xff] }
 0x297   : > { %v1682_v40 = vadd.f32 %v1681_v20, %v6661_v41  ;;  %v1767_v20 = vmax.f32 %v1734_v63, 0.0  ;;  %v5267_v63 = vld [vmem:[%s6430_s3 + $0x30] sm:$0xff] }
 0x298   : > { %v3374_v36 = vsel %vm3373_vm12, %v3372_v12, %v3370_v29  ;;  %v1272_v1 = vmax.f32 %v1230_v19, %v1231_v44  ;;  %v1731_v29 = vadd.f32 %v1730_v37, %v6661_v41  ;;  %v6662_v19 = vld [vmem:[#allocation6_spill] sm:$0xff] }
 0x299   : > { %v1764_v32 = vmax.f32 %v1682_v40, 0.0 }
 0x29a   : > { %v1686_v31 = vpop.f32.mrf.mxu0  ;;  %v1735_v28 = vpop.f32.mrf.mxu1  ;;  %1273 = vmax.xlane.f32.xlu0 %v1272_v1  ;;  %v1729_v1 = vadd.f32 %v5201_v27, %v4509_v55  ;;  %v1765_v47 = vmax.f32 %v1731_v29, 0.0 }
 0x29b   : > { %v1687_v44 = vadd.f32 %v1686_v31, %v6662_v19  ;;  %v1736_v50 = vadd.f32 %v1735_v28, %v6662_v19  ;;  %v1148_v39 = vpop.f32.mrf.mxu2  ;;  %v1197_v12 = vpop.f32.mrf.mxu3  ;;  %v1726_v31 = vadd.f32 %v5183_v42, %v4507_v54 }
 0x29c   : > { %v1149_v38 = vadd.f32 %v1148_v39, %v4954_v14  ;;  %v1198_v10 = vadd.f32 %v1197_v12, %v4954_v14  ;;  %v1675_v39 = vadd.f32 %v5166_v57, %v4496_v51  ;;  %v1721_v57 = vadd.f32 %v5148_v23, %v4538_v3 }
 0x29d   : > { %v1768_v21 = vmax.f32 %v1687_v44, 0.0  ;;  %v1769_v37 = vmax.f32 %v1736_v50, 0.0  ;;  %v943_v41 = vpop.xlane.xlu1 %942 }
 0x29e   : > { %v1232_v28 = vmax.f32 %v1149_v38, 0.0  ;;  %v1233_v19 = vmax.f32 %v1198_v10, 0.0  ;;  %v3376_v35 = vperm.slane %v943_v41, %v5246_v33  ;;  %v1724_v38 = vadd.f32 %v5168_v53, %v4496_v51 }
 0x29f   : > { %v1784_v2 = vpack.c.bf16 %v1768_v21, %v1766_v17  ;;  %v1785_v27 = vpack.c.bf16 %v1769_v37, %v1767_v20  ;;  %v1762_v17 = vmax.f32 %v1680_v45, 0.0  ;;  %v1763_v21 = vmax.f32 %v1729_v1, 0.0 }
 0x2a0   : > { %v3378_v52 = vsel %vm3377_vm13, %v3376_v35, %v3374_v36  ;;  %1487 = vmatmul.bf16.gmra.mxu2 %v5267_v63  ;;  %1536 = vmatmul.bf16.gmra.mxu3 %v5267_v63  ;;  %v1275_v42 = vmax.f32 %v1232_v28, %v1233_v19  ;;  %v1672_v35 = vadd.f32 %v5146_v49, %v4538_v3  ;;  %v5278_v10 = vadd.s32 4294967192, %v5044_v0 }
 0x2a1   : > { %1786 = vmatpush.bf16.msrb.mxu2 %v1784_v2  ;;  %1835 = vmatpush.bf16.msrb.mxu3 %v1785_v27  ;;  %v1760_v36 = vmax.f32 %v5243_v59, 0.0  ;;  %v1761_v41 = vmax.f32 %v1726_v31, 0.0  ;;  %v1782_v53 = vpack.c.bf16 %v1764_v32, %v1762_v17  ;;  %v1783_v19 = vpack.c.bf16 %v1765_v47, %v1763_v21 }
 0x2a2   : > { %1276 = vmax.xlane.f32.xlu1 %v1275_v42  ;;  %v1670_v2 = vadd.f32 %v5125_v25, %v4527_v60  ;;  %v1719_v49 = vadd.f32 %v5127_v6, %v4527_v60  ;;  %v1758_v44 = vmax.f32 %v1675_v39, 0.0  ;;  %v1759_v12 = vmax.f32 %v1724_v38, 0.0 }
 0x2a3   : > { %v1986_v40 = vpop.f32.mrf.mxu0  ;;  %v2035_v29 = vpop.f32.mrf.mxu1  ;;  %v1756_v20 = vmax.f32 %v1672_v35, 0.0  ;;  %v1757_v47 = vmax.f32 %v1721_v57, 0.0  ;;  %v5296_v21 = vadd.s32 4294967184, %v5044_v0 }
 0x2a4   : > { %v1151_v50 = vpop.f32.mrf.mxu2  ;;  %v1200_v23 = vpop.f32.mrf.mxu3  ;;  %v1780_v31 = vpack.c.bf16 %v1760_v36, %v1758_v44  ;;  %v1781_v28 = vpack.c.bf16 %v1761_v41, %v1759_v12  ;;  %v1754_v27 = vmax.f32 %v1670_v2, 0.0  ;;  %v1755_v39 = vmax.f32 %v1719_v49, 0.0 }
 0x2a5   : > { %v1152_v45 = vadd.f32 %v1151_v50, %v4972_v18  ;;  %v1201_v1 = vadd.f32 %v1200_v23, %v4972_v18  ;;  %1787 = vmatpush.bf16.msrb.mxu2 %v1782_v53  ;;  %1836 = vmatpush.bf16.msrb.mxu3 %v1783_v19  ;;  %v946_v59 = vpop.xlane.xlu2 %945  ;;  %v1987_v42 = vadd.f32 %v1986_v40, %v4546_v7 }
 0x2a6   : > { %3997 = vmatmul.msk.bf16.vlgmr.msrb.gmra.mxu0 %vm549_vm1, %v4991_v61  ;;  %4005 = vmatmul.msk.bf16.vlgmr.msrb.gmra.mxu1 %vm549_vm1, %v4991_v61  ;;  %v3380_v25 = vperm.slane %v946_v59, %v5278_v10  ;;  %v2036_v17 = vadd.f32 %v2035_v29, %v4546_v7  ;;  %v1778_v57 = vpack.c.bf16 %v1756_v20, %v1754_v27  ;;  %v5307_v20 = vld [vmem:[%s6430_s3 + $0x38] sm:$0xff] }
 0x2a7   : > { %v1234_v6 = vmax.f32 %v1152_v45, 0.0  ;;  %v1235_v37 = vmax.f32 %v1201_v1, 0.0  ;;  %v1779_v36 = vpack.c.bf16 %v1757_v47, %v1755_v39  ;;  %v2075_v40 = vmax.f32 %v1987_v42, 0.0 }
 0x2a8   : > { %v3382_v32 = vsel %vm6543_vm14, %v3380_v25, %v3378_v52  ;;  %v2076_v44 = vmax.f32 %v2036_v17, 0.0 }
 0x2a9   : > { %1788 = vmatpush.bf16.msrb.mxu2 %v1780_v31  ;;  %1837 = vmatpush.bf16.msrb.mxu3 %v1781_v28  ;;  %v1278_v38 = vmax.f32 %v1234_v6, %v1235_v37  ;;  %v5318_v37 = vadd.s32 4294967176, %v5044_v0 }
 0x2ab   : > { %v1988_v61 = vpop.f32.mrf.mxu0  ;;  %v2037_v35 = vpop.f32.mrf.mxu1  ;;  %1279 = vmax.xlane.f32.xlu2 %v1278_v38 }
 0x2ac   : > { %v1989_v41 = vadd.f32 %v1988_v61, %v4552_v11  ;;  %v2038_v52 = vadd.f32 %v2037_v35, %v4552_v11  ;;  %v1153_v53 = vpop.f32.mrf.mxu2  ;;  %v1202_v19 = vpop.f32.mrf.mxu3 }
 0x2ad   : > { %v1154_v2 = vadd.f32 %v1153_v53, %v4997_v16  ;;  %v1203_v49 = vadd.f32 %v1202_v19, %v4997_v16  ;;  %1789 = vmatpush.bf16.msrb.mxu2 %v1778_v57  ;;  %1838 = vmatpush.bf16.msrb.mxu3 %v1779_v36  ;;  %v949_v29 = vpop.xlane.xlu0 %948 }
 0x2ae   : > { %v2077_v50 = vmax.f32 %v1989_v41, 0.0  ;;  %v2078_v23 = vmax.f32 %v2038_v52, 0.0  ;;  %v3384_v12 = vperm.slane %v949_v29, %v5296_v21 }
 0x2af   : > { %v1236_v45 = vmax.f32 %v1154_v2, 0.0  ;;  %v1237_v1 = vmax.f32 %v1203_v49, 0.0 }
 0x2b0   : > { %v3386_v59 = vsel %vm6512_vm15, %v3384_v12, %v3382_v32  ;;  %1492 = vmatmul.bf16.gmra.mxu2 %v5307_v20  ;;  %1541 = vmatmul.bf16.gmra.mxu3 %v5307_v20  ;;  %v5311_v47 = vpack.c.bf16 %v2077_v50, %v2075_v40  ;;  %v5313_v25 = vpack.c.bf16 %v2078_v23, %v2076_v44  ;;  %vm3389_vm15 = vcmask 1048512   ;;  %v5345_v50 = vld [vmem:[%s6430_s3] sm:$0xff] }
 0x2b1   : > { %1790 = vmatpush.bf16.msrb.mxu2 %v5113_v48  ;;  %1839 = vmatpush.bf16.msrb.mxu3 %v5115_v43  ;;  %v1281_v6 = vmax.f32 %v1236_v45, %v1237_v1 }
 0x2b3   : > { %v1991_v31 = vpop.f32.mrf.mxu0  ;;  %v2040_v28 = vpop.f32.mrf.mxu1  ;;  %1282 = vmax.xlane.f32.xlu0 %v1281_v6 }
 0x2b4   : > { %v1156_v32 = vpop.f32.mrf.mxu2  ;;  %v1205_v27 = vpop.f32.mrf.mxu3  ;;  %v2041_v35 = vadd.f32 %v2040_v28, %v4544_v4 }
 0x2b5   : > { %v1157_v39 = vadd.f32 %v1156_v32, %v5011_v30  ;;  %v1206_v42 = vadd.f32 %v1205_v27, %v5011_v30  ;;  %1791 = vmatpush.bf16.msrb.mxu2 %v5075_v46  ;;  %1840 = vmatpush.bf16.msrb.mxu3 %v5077_v34  ;;  %v952_v48 = vpop.xlane.xlu1 %951  ;;  %v1992_v34 = vadd.f32 %v1991_v31, %v4544_v4 }
 0x2b6   : > { %3998 = vmatmul.msk.bf16.gmra.mxu0 %vm549_vm1, %v5022_v13  ;;  %4006 = vmatmul.msk.bf16.gmra.mxu1 %vm549_vm1, %v5022_v13  ;;  %v3388_v43 = vperm.slane %v952_v48, %v5318_v37  ;;  %v2080_v40 = vmax.f32 %v2041_v35, 0.0 }
 0x2b7   : > { %v1238_v38 = vmax.f32 %v1157_v39, 0.0  ;;  %v1239_v17 = vmax.f32 %v1206_v42, 0.0 }
 0x2b8   : > { %v5330_v61 = vsel %vm3389_vm15, %v3388_v43, %v3386_v59 }
 0x2b9   : > { %1792 = vmatpush.bf16.msrb.mxu2 %v5040_v22  ;;  %1841 = vmatpush.bf16.msrb.mxu3 %v5042_v56  ;;  %v1284_v46 = vmax.f32 %v1238_v38, %v1239_v17  ;;  %v2079_v56 = vmax.f32 %v1992_v34, 0.0 }
 0x2bb   : > { %v1993_v57 = vpop.f32.mrf.mxu0  ;;  %v2042_v36 = vpop.f32.mrf.mxu1  ;;  %1285 = vmax.xlane.f32.xlu1 %v1284_v46 }
 0x2bc   : > { %v1994_v13 = vadd.f32 %v1993_v57, %v4564_v24  ;;  %v2043_v41 = vadd.f32 %v2042_v36, %v4564_v24  ;;  %v1158_v52 = vpop.f32.mrf.mxu2  ;;  %v1207_v53 = vpop.f32.mrf.mxu3  ;;  %v6663_v57 = vld [vmem:[#allocation10_spill] sm:$0xff] }
 0x2bd   : > { %v1159_v19 = vadd.f32 %v1158_v52, %v5028_v26  ;;  %v1208_v22 = vadd.f32 %v1207_v53, %v5028_v26  ;;  %1793 = vmatpush.bf16.msrb.mxu2 %v5007_v58  ;;  %1842 = vmatpush.bf16.msrb.mxu3 %v5009_v5  ;;  %v1244_v12 = vpop.xlane.xlu2 %1243  ;;  %v6664_v53 = vld [vmem:[#allocation13_spill] sm:$0xff] }
 0x2be   : > { %v2081_v2 = vmax.f32 %v1994_v13, 0.0  ;;  %v2082_v49 = vmax.f32 %v2043_v41, 0.0  ;;  %v3408_v27 = vperm.slane %v1244_v12, %v5044_v0 }
 0x2bf   : > { %v1240_v29 = vmax.f32 %v1159_v19, 0.0  ;;  %v1241_v44 = vmax.f32 %v1208_v22, 0.0 }
 0x2c0   : > { %1794 = vmatmul.bf16.vlgmr.msrb.gmra.mxu2 %v5345_v50  ;;  %1843 = vmatmul.bf16.vlgmr.msrb.gmra.mxu3 %v5345_v50  ;;  %v5349_v23 = vpack.c.bf16 %v2081_v2, %v2079_v56  ;;  %v5351_v58 = vpack.c.bf16 %v2082_v49, %v2080_v40 }
 0x2c1   : > { %v1287_v5 = vmax.f32 %v1240_v29, %v1241_v44  ;;  %v6665_v29 = vld [vmem:[#allocation28_spill] sm:$0xff] }
 0x2c3   : > { %v1996_v45 = vpop.f32.mrf.mxu0  ;;  %v2045_v1 = vpop.f32.mrf.mxu1  ;;  %1288 = vmax.xlane.f32.xlu2 %v1287_v5 }
 0x2c4   : > { %v1458_v59 = vpop.f32.mrf.mxu2  ;;  %v1507_v6 = vpop.f32.mrf.mxu3  ;;  %v1997_v38 = vadd.f32 %v1996_v45, %v4548_v8  ;;  %v2046_v46 = vadd.f32 %v2045_v1, %v4548_v8  ;;  %v6666_v1 = vld [vmem:[#allocation29_spill] sm:$0xff] }
 0x2c5   : > { %v1459_v31 = vadd.f32 %v1458_v59, %v4826_v15  ;;  %v1508_v28 = vadd.f32 %v1507_v6, %v4826_v15  ;;  %v1247_v32 = vpop.xlane.xlu0 %1246 }
 0x2c6   : > { %3999 = vmatmul.msk.bf16.gmra.mxu0 %vm549_vm1, %v5057_v62  ;;  %4007 = vmatmul.msk.bf16.gmra.mxu1 %vm549_vm1, %v5057_v62  ;;  %v3409_v39 = vperm.slane %v1247_v32, %v5049_v9  ;;  %v2083_v52 = vmax.f32 %v1997_v38, 0.0  ;;  %v2084_v40 = vmax.f32 %v2046_v46, 0.0  ;;  %v6669_v46 = vld [vmem:[#allocation30_spill] sm:$0xff] }
 0x2c7   : > { %v1547_v42 = vmax.f32 %v1459_v31, 0.0  ;;  %v1548_v48 = vmax.f32 %v1508_v28, 0.0 }
 0x2c8   : > { %v3410_v43 = vsel %vm3333_vm2, %v3409_v39, %v3408_v27 }
 0x2c9   : > { %v1579_v17 = vmax.f32 %v1547_v42, %v1548_v48  ;;  %v6667_v42 = vld [vmem:[#allocation14_spill] sm:$0xff] }
 0x2cb   : > { %v1998_v34 = vpop.f32.mrf.mxu0  ;;  %v2047_v35 = vpop.f32.mrf.mxu1  ;;  %1580 = vmax.xlane.f32.xlu0 %v1579_v17 }
 0x2cc   : > { %v1999_v36 = vadd.f32 %v1998_v34, %v6663_v57  ;;  %v2048_v13 = vadd.f32 %v2047_v35, %v6663_v57  ;;  %v1460_v41 = vpop.f32.mrf.mxu2  ;;  %v1509_v62 = vpop.f32.mrf.mxu3  ;;  %v6691_v57 = vld [vmem:[#allocation22_spill] sm:$0xff] }
 0x2cd   : > { %v1461_v19 = vadd.f32 %v1460_v41, %v6664_v53  ;;  %v1510_v22 = vadd.f32 %v1509_v62, %v6664_v53  ;;  %v1250_v56 = vpop.xlane.xlu1 %1249  ;;  %v6670_v41 = vld [vmem:[#allocation7_spill] sm:$0xff] }
 0x2ce   : > { %v2085_v2 = vmax.f32 %v1999_v36, 0.0  ;;  %v2086_v49 = vmax.f32 %v2048_v13, 0.0  ;;  %v3411_v44 = vperm.slane %v1250_v56, %v6665_v29 }
 0x2cf   : > { %v1549_v5 = vmax.f32 %v1461_v19, 0.0  ;;  %v1550_v12 = vmax.f32 %v1510_v22, 0.0 }
 0x2d0   : > { %v3412_v45 = vsel %vm3337_vm3, %v3411_v44, %v3410_v43  ;;  %1799 = vmatmul.bf16.gmra.mxu2 %v6666_v1  ;;  %1848 = vmatmul.bf16.gmra.mxu3 %v6666_v1  ;;  %v5372_v59 = vpack.c.bf16 %v2085_v2, %v2083_v52  ;;  %v5374_v6 = vpack.c.bf16 %v2086_v49, %v2084_v40  ;;  %v6668_v43 = vld [vmem:[#allocation31_spill] sm:$0xff]  ;;  %v6671_v40 = vld [vmem:[#allocation9_spill] sm:$0xff] }
 0x2d1   : > { %v1582_v31 = vmax.f32 %v1549_v5, %v1550_v12  ;;  %v6672_v1 = vld [vmem:[#allocation15_spill] sm:$0xff] }
 0x2d3   : > { %v2001_v28 = vpop.f32.mrf.mxu0  ;;  %v2050_v32 = vpop.f32.mrf.mxu1  ;;  %1583 = vmax.xlane.f32.xlu1 %v1582_v31 }
 0x2d4   : > { %v1463_v27 = vpop.f32.mrf.mxu2  ;;  %v1512_v39 = vpop.f32.mrf.mxu3  ;;  %v2002_v62 = vadd.f32 %v2001_v28, %v6670_v41  ;;  %v2051_v19 = vadd.f32 %v2050_v32, %v6670_v41 }
 0x2d5   : > { %v1464_v48 = vadd.f32 %v1463_v27, %v6667_v42  ;;  %v1513_v38 = vadd.f32 %v1512_v39, %v6667_v42  ;;  %v1253_v17 = vpop.xlane.xlu2 %1252 }
 0x2d6   : > { %4000 = vmatmul.msk.bf16.gmra.mxu0 %vm549_vm1, %v6668_v43  ;;  %4008 = vmatmul.msk.bf16.gmra.mxu1 %vm549_vm1, %v6668_v43  ;;  %v3413_v34 = vperm.slane %v1253_v17, %v6669_v46  ;;  %v2087_v12 = vmax.f32 %v2002_v62, 0.0  ;;  %v2088_v39 = vmax.f32 %v2051_v19, 0.0 }
 0x2d7   : > { %v1551_v35 = vmax.f32 %v1464_v48, 0.0  ;;  %v1552_v36 = vmax.f32 %v1513_v38, 0.0  ;;  %v6673_v38 = vld [vmem:[#allocation32_spill] sm:$0xff] }
 0x2d8   : > { %v3414_v13 = vsel %vm3341_vm4, %v3413_v34, %v3412_v45 }
 0x2d9   : > { %v1585_v52 = vmax.f32 %v1551_v35, %v1552_v36  ;;  %v6674_v35 = vld [vmem:[#allocation33_spill] sm:$0xff] }
 0x2db   : > { %v2003_v22 = vpop.f32.mrf.mxu0  ;;  %v2052_v56 = vpop.f32.mrf.mxu1  ;;  %1586 = vmax.xlane.f32.xlu2 %v1585_v52 }
 0x2dc   : > { %v2004_v2 = vadd.f32 %v2003_v22, %v6671_v40  ;;  %v2053_v49 = vadd.f32 %v2052_v56, %v6671_v40  ;;  %v1465_v44 = vpop.f32.mrf.mxu2  ;;  %v1514_v5 = vpop.f32.mrf.mxu3 }
 0x2dd   : > { %v1466_v31 = vadd.f32 %v1465_v44, %v6672_v1  ;;  %v1515_v27 = vadd.f32 %v1514_v5, %v6672_v1  ;;  %v1256_v45 = vpop.xlane.xlu0 %1255 }
 0x2de   : > { %v2089_v28 = vmax.f32 %v2004_v2, 0.0  ;;  %v2090_v48 = vmax.f32 %v2053_v49, 0.0  ;;  %v3415_v32 = vperm.slane %v1256_v45, %v6673_v38  ;;  %v6675_v49 = vld [vmem:[#allocation16_spill] sm:$0xff] }
 0x2df   : > { %v1553_v17 = vmax.f32 %v1466_v31, 0.0  ;;  %v1554_v43 = vmax.f32 %v1515_v27, 0.0  ;;  %v6676_v31 = vld [vmem:[#allocation35_spill] sm:$0xff] }
 0x2e0   : > { %v3416_v34 = vsel %vm3345_vm5, %v3415_v32, %v3414_v13  ;;  %1804 = vmatmul.bf16.gmra.mxu2 %v6674_v35  ;;  %1853 = vmatmul.bf16.gmra.mxu3 %v6674_v35  ;;  %v5394_v36 = vpack.c.bf16 %v2089_v28, %v2087_v12  ;;  %v5396_v62 = vpack.c.bf16 %v2090_v48, %v2088_v39  ;;  %v6677_v12 = vld [vmem:[#allocation34_spill] sm:$0xff]  ;;  %v4013_v48 = vld [vmem:[%s4351_s21 + $0x30] sm:$0xff] }
 0x2e1   : > { %v1588_v52 = vmax.f32 %v1553_v17, %v1554_v43  ;;  %v2641_v17 = vunpack.c.l.b16 %v4013_v48  ;;  %v2642_v43 = vunpack.c.h.b16 %v4013_v48 }
 0x2e3   : > { %v5398_v22 = vpop.f32.mrf.mxu0  ;;  %v5400_v19 = vpop.f32.mrf.mxu1  ;;  %1589 = vmax.xlane.f32.xlu0 %v1588_v52 }
 0x2e4   : > { %v1468_v56 = vpop.f32.mrf.mxu2  ;;  %v1517_v2 = vpop.f32.mrf.mxu3 }
 0x2e5   : > { %v1469_v44 = vadd.f32 %v1468_v56, %v6675_v49  ;;  %v1518_v13 = vadd.f32 %v1517_v2, %v6675_v49  ;;  %v1259_v5 = vpop.xlane.xlu1 %1258  ;;  %v2643_v56 = vpack.c.b16 %v2641_v17, %v2641_v17  ;;  %v2644_v2 = vpack.c.b16 %v2642_v43, %v2642_v43  ;;  %v6680_v17 = vld [vmem:[#allocation37_spill] sm:$0xff] }
 0x2e6   : > { %4001 = vmatmul.msk.bf16.gmra.mxu0 %vm549_vm1, %v6676_v31  ;;  %4009 = vmatmul.msk.bf16.gmra.mxu1 %vm549_vm1, %v6676_v31  ;;  %v3417_v27 = vperm.slane %v1259_v5, %v6677_v12  ;;  %v6678_v31 = vld [vmem:[#allocation17_spill] sm:$0xff] }
 0x2e7   : > { %v1555_v45 = vmax.f32 %v1469_v44, 0.0  ;;  %v1556_v39 = vmax.f32 %v1518_v13, 0.0  ;;  %v2649_v5 = vsel %vm574_vm0, %v2644_v2, 0 }
 0x2e8   : > { %v3418_v28 = vsel %vm3349_vm6, %v3417_v27, %v3416_v34  ;;  %v2646_v34 = vsel %vm574_vm0, %v2643_v56, 0  ;;  %v6679_v27 = vld [vmem:[#allocation36_spill] sm:$0xff]  ;;  %2707 = vmatpush.bf16.msra.mxu1 %v2649_v5 }
 0x2e9   : > { %v1591_v32 = vmax.f32 %v1555_v45, %v1556_v39  ;;  %2658 = vmatpush.bf16.msra.mxu0 %v2646_v34 }
 0x2eb   : > { %v5411_v35 = vpop.f32.mrf.mxu0  ;;  %v5413_v52 = vpop.f32.mrf.mxu1  ;;  %1592 = vmax.xlane.f32.xlu1 %v1591_v32 }
 0x2ec   : > { %v1470_v49 = vpop.f32.mrf.mxu2  ;;  %v1519_v38 = vpop.f32.mrf.mxu3 }
 0x2ed   : > { %v1471_v1 = vadd.f32 %v1470_v49, %v6678_v31  ;;  %v1520_v44 = vadd.f32 %v1519_v38, %v6678_v31  ;;  %v1262_v13 = vpop.xlane.xlu2 %1261  ;;  %v6681_v31 = vld [vmem:[#allocation18_spill] sm:$0xff] }
 0x2ee   : > { %v3419_v45 = vperm.slane %v1262_v13, %v6679_v27  ;;  %v6684_v27 = vld [vmem:[#allocation20_spill] sm:$0xff] }
 0x2ef   : > { %v1557_v39 = vmax.f32 %v1471_v1, 0.0  ;;  %v1558_v48 = vmax.f32 %v1520_v44, 0.0  ;;  %v6683_v44 = vld [vmem:[#allocation38_spill] sm:$0xff] }
 0x2f0   : > { %v3420_v32 = vsel %vm3353_vm7, %v3419_v45, %v3418_v28  ;;  %1809 = vmatmul.bf16.gmra.mxu2 %v6680_v17  ;;  %1858 = vmatmul.bf16.gmra.mxu3 %v6680_v17  ;;  %v5432_v28 = vld [vmem:[%s6428_s1 + $0x28] sm:$0xff] }
 0x2f1   : > { %v1594_v49 = vmax.f32 %v1557_v39, %v1558_v48  ;;  %6682 = vst [vmem:[#allocation25_spill] sm:$0xff] %v5432_v28 }
 0x2f3   : > { %v5423_v43 = vpop.f32.mrf.mxu0  ;;  %v5425_v38 = vpop.f32.mrf.mxu1  ;;  %1595 = vmax.xlane.f32.xlu2 %v1594_v49 }
 0x2f4   : > { %v1473_v56 = vpop.f32.mrf.mxu2  ;;  %v1522_v2 = vpop.f32.mrf.mxu3 }
 0x2f5   : > { %v1474_v13 = vadd.f32 %v1473_v56, %v6681_v31  ;;  %v1523_v34 = vadd.f32 %v1522_v2, %v6681_v31  ;;  %v1265_v1 = vpop.xlane.xlu0 %1264 }
 0x2f6   : > { %4002 = vmatmul.msk.bf16.gmra.mxu0 %vm549_vm1, %v5432_v28  ;;  %4010 = vmatmul.msk.bf16.gmra.mxu1 %vm549_vm1, %v5432_v28  ;;  %v3421_v5 = vperm.slane %v1265_v1, %v6683_v44  ;;  %v6685_v28 = vld [vmem:[#allocation19_spill] sm:$0xff] }
 0x2f7   : > { %v1559_v45 = vmax.f32 %v1474_v13, 0.0  ;;  %v1560_v39 = vmax.f32 %v1523_v34, 0.0 }
 0x2f8   : > { %v3422_v48 = vsel %vm3357_vm8, %v3421_v5, %v3420_v32  ;;  %v6686_v32 = vld [vmem:[#allocation39_spill] sm:$0xff] }
 0x2f9   : > { %v1597_v17 = vmax.f32 %v1559_v45, %v1560_v39 }
 0x2fb   : > { %v5440_v49 = vpop.f32.mrf.mxu0  ;;  %v5442_v56 = vpop.f32.mrf.mxu1  ;;  %1598 = vmax.xlane.f32.xlu0 %v1597_v17 }
 0x2fc   : > { %v1475_v2 = vpop.f32.mrf.mxu2  ;;  %v1524_v31 = vpop.f32.mrf.mxu3 }
 0x2fd   : > { %v1476_v12 = vadd.f32 %v1475_v2, %v6684_v27  ;;  %v1525_v40 = vadd.f32 %v1524_v31, %v6684_v27  ;;  %v1268_v41 = vpop.xlane.xlu1 %1267  ;;  %v6687_v2 = vld [vmem:[#allocation21_spill] sm:$0xff] }
 0x2fe   : > { %v3423_v46 = vperm.slane %v1268_v41, %v6685_v28  ;;  %v5455_v41 = vld [vmem:[%s6428_s1 + $0x30] sm:$0xff] }
 0x2ff   : > { %v1561_v1 = vmax.f32 %v1476_v12, 0.0  ;;  %v1562_v13 = vmax.f32 %v1525_v40, 0.0  ;;  %6688 = vst [vmem:[#allocation29_spill] sm:$0xff] %v5455_v41 }
 0x300   : > { %v3424_v34 = vsel %vm3361_vm9, %v3423_v46, %v3422_v48  ;;  %1814 = vmatmul.bf16.gmra.mxu2 %v6686_v32  ;;  %1863 = vmatmul.bf16.gmra.mxu3 %v6686_v32  ;;  %v6689_v46 = vld [vmem:[#allocation40_spill] sm:$0xff] }
 0x301   : > { %v1600_v5 = vmax.f32 %v1561_v1, %v1562_v13 }
 0x303   : > { %v2016_v45 = vpop.f32.mrf.mxu0  ;;  %v2065_v39 = vpop.f32.mrf.mxu1  ;;  %1601 = vmax.xlane.f32.xlu1 %v1600_v5 }
 0x304   : > { %v1478_v17 = vpop.f32.mrf.mxu2  ;;  %v1527_v44 = vpop.f32.mrf.mxu3 }
 0x305   : > { %v1479_v42 = vadd.f32 %v1478_v17, %v6687_v2  ;;  %v1528_v31 = vadd.f32 %v1527_v44, %v6687_v2  ;;  %v1271_v27 = vpop.xlane.xlu2 %1270  ;;  %v6690_v2 = vld [vmem:[#allocation23_spill] sm:$0xff] }
 0x306   : > { %4003 = vmatmul.msk.bf16.gmra.mxu0 %vm549_vm1, %v5455_v41  ;;  %4011 = vmatmul.msk.bf16.gmra.mxu1 %vm549_vm1, %v5455_v41  ;;  %v3425_v40 = vperm.slane %v1271_v27, %v6689_v46  ;;  %v6692_v27 = vld [vmem:[#allocation41_spill] sm:$0xff]  ;;  %v6697_v46 = vld [vmem:[#allocation8_spill] sm:$0xff] }
 0x307   : > { %v1563_v12 = vmax.f32 %v1479_v42, 0.0  ;;  %v1564_v48 = vmax.f32 %v1528_v31, 0.0 }
 0x308   : > { %v3426_v1 = vsel %vm3365_vm10, %v3425_v40, %v3424_v34 }
 0x309   : > { %v1603_v13 = vmax.f32 %v1563_v12, %v1564_v48 }
 0x30b   : > { %v2018_v44 = vpop.f32.mrf.mxu0  ;;  %v2067_v32 = vpop.f32.mrf.mxu1  ;;  %1604 = vmax.xlane.f32.xlu2 %v1603_v13  ;;  %v6693_v13 = vld [vmem:[#allocation24_spill] sm:$0xff] }
 0x30c   : > { %v1480_v5 = vpop.f32.mrf.mxu2  ;;  %v1529_v17 = vpop.f32.mrf.mxu3 }
 0x30d   : > { %v1481_v28 = vadd.f32 %v1480_v5, %v6690_v2  ;;  %v1530_v29 = vadd.f32 %v1529_v17, %v6690_v2  ;;  %v1274_v53 = vpop.xlane.xlu0 %1273 }
 0x30e   : > { %v3427_v8 = vperm.slane %v1274_v53, %v6691_v57  ;;  %v5474_v53 = vld [vmem:[%s6428_s1 + $0x38] sm:$0xff] }
 0x30f   : > { %v1565_v41 = vmax.f32 %v1481_v28, 0.0  ;;  %v1566_v9 = vmax.f32 %v1530_v29, 0.0  ;;  %6694 = vst [vmem:[#allocation31_spill] sm:$0xff] %v5474_v53 }
 0x310   : > { %v3428_v42 = vsel %vm3369_vm11, %v3427_v8, %v3426_v1  ;;  %1819 = vmatmul.bf16.gmra.mxu2 %v6692_v27  ;;  %1868 = vmatmul.bf16.gmra.mxu3 %v6692_v27  ;;  %v6695_v8 = vld [vmem:[#allocation42_spill] sm:$0xff]  ;;  %v6696_v27 = vld [vmem:[#allocation5_spill] sm:$0xff] }
 0x311   : > { %v1606_v34 = vmax.f32 %v1565_v41, %v1566_v9 }
 0x313   : > { %v2021_v31 = vpop.f32.mrf.mxu0  ;;  %v2070_v40 = vpop.f32.mrf.mxu1  ;;  %1607 = vmax.xlane.f32.xlu0 %v1606_v34 }
 0x314   : > { %v1483_v12 = vpop.f32.mrf.mxu2  ;;  %v1532_v48 = vpop.f32.mrf.mxu3  ;;  %v2022_v34 = vadd.f32 %v2021_v31, %v6696_v27  ;;  %v2017_v31 = vadd.f32 %v2016_v45, %v4509_v55 }
 0x315   : > { %v1484_v5 = vadd.f32 %v1483_v12, %v6693_v13  ;;  %v1533_v17 = vadd.f32 %v1532_v48, %v6693_v13  ;;  %v1277_v2 = vpop.xlane.xlu1 %1276  ;;  %v2071_v12 = vadd.f32 %v2070_v40, %v6696_v27  ;;  %v5486_v48 = vadd.f32 %v5440_v49, %v4507_v54 }
 0x316   : > { %4004 = vmatmul.msk.bf16.gmra.mxu0 %vm549_vm1, %v5474_v53  ;;  %4012 = vmatmul.msk.bf16.gmra.mxu1 %vm549_vm1, %v5474_v53  ;;  %v3429_v9 = vperm.slane %v1277_v2, %v6695_v8  ;;  %v2019_v53 = vadd.f32 %v2018_v44, %v6697_v46  ;;  %v2068_v2 = vadd.f32 %v2067_v32, %v6697_v46  ;;  %v2103_v27 = vmax.f32 %v2022_v34, 0.0 }
 0x317   : > { %v1567_v29 = vmax.f32 %v1484_v5, 0.0  ;;  %v1568_v28 = vmax.f32 %v1533_v17, 0.0  ;;  %v6698_v5 = vld [vmem:[#allocation6_spill] sm:$0xff]  ;;  %v2066_v40 = vadd.f32 %v2065_v39, %v4509_v55  ;;  %v2063_v32 = vadd.f32 %v5442_v56, %v4507_v54 }
 0x318   : > { %v3430_v41 = vsel %vm3373_vm12, %v3429_v9, %v3428_v42  ;;  %v2101_v46 = vmax.f32 %v2019_v53, 0.0  ;;  %v2102_v45 = vmax.f32 %v2068_v2, 0.0  ;;  %v2061_v56 = vadd.f32 %v5425_v38, %v4496_v51 }
 0x319   : > { %v1609_v1 = vmax.f32 %v1567_v29, %v1568_v28  ;;  %v2058_v53 = vadd.f32 %v5413_v52, %v4538_v3  ;;  %v2056_v52 = vadd.f32 %v5400_v19, %v4527_v60 }
 0x31b   : > { %v2023_v13 = vpop.f32.mrf.mxu0  ;;  %v2072_v57 = vpop.f32.mrf.mxu1  ;;  %1610 = vmax.xlane.f32.xlu1 %v1609_v1  ;;  %v2104_v1 = vmax.f32 %v2071_v12, 0.0 }
 0x31c   : > { %v2024_v17 = vadd.f32 %v2023_v13, %v6698_v5  ;;  %v2073_v42 = vadd.f32 %v2072_v57, %v6698_v5  ;;  %v1485_v9 = vpop.f32.mrf.mxu2  ;;  %v1534_v29 = vpop.f32.mrf.mxu3 }
 0x31d   : > { %v1486_v49 = vadd.f32 %v1485_v9, %v4954_v14  ;;  %v1535_v28 = vadd.f32 %v1534_v29, %v4954_v14  ;;  %v2100_v9 = vmax.f32 %v2066_v40, 0.0  ;;  %v2096_v40 = vmax.f32 %v2061_v56, 0.0 }
 0x31e   : > { %v2105_v8 = vmax.f32 %v2024_v17, 0.0  ;;  %v2106_v44 = vmax.f32 %v2073_v42, 0.0  ;;  %v1280_v0 = vpop.xlane.xlu2 %1279  ;;  %v2012_v17 = vadd.f32 %v5423_v43, %v4496_v51  ;;  %v2099_v42 = vmax.f32 %v2017_v31, 0.0 }
 0x31f   : > { %v1569_v13 = vmax.f32 %v1486_v49, 0.0  ;;  %v1570_v57 = vmax.f32 %v1535_v28, 0.0  ;;  %v3431_v5 = vperm.slane %v1280_v0, %v5246_v33  ;;  %v2009_v0 = vadd.f32 %v5411_v35, %v4538_v3 }
 0x320   : > { %v2121_v15 = vpack.c.bf16 %v2105_v8, %v2103_v27  ;;  %v2122_v39 = vpack.c.bf16 %v2106_v44, %v2104_v1  ;;  %1824 = vmatmul.bf16.gmra.mxu2 %v5267_v63  ;;  %1873 = vmatmul.bf16.gmra.mxu3 %v5267_v63  ;;  %v2098_v27 = vmax.f32 %v2063_v32, 0.0  ;;  %v2120_v38 = vpack.c.bf16 %v2102_v45, %v2100_v9 }
 0x321   : > { %v3432_v34 = vsel %vm3377_vm13, %v3431_v5, %v3430_v41  ;;  %v1612_v12 = vmax.f32 %v1569_v13, %v1570_v57  ;;  %v2097_v41 = vmax.f32 %v5486_v48, 0.0  ;;  %v2119_v5 = vpack.c.bf16 %v2101_v46, %v2099_v42  ;;  %v5520_v46 = vld [vmem:[%s6428_s1] sm:$0xff] }
 0x322   : > { %2123 = vmatpush.bf16.msra.mxu2 %v2121_v15  ;;  %2172 = vmatpush.bf16.msra.mxu3 %v2122_v39  ;;  %v2007_v35 = vadd.f32 %v5398_v22, %v4527_v60  ;;  %v2095_v31 = vmax.f32 %v2012_v17, 0.0  ;;  %v2093_v19 = vmax.f32 %v2009_v0, 0.0  ;;  %v2094_v1 = vmax.f32 %v2058_v53, 0.0 }
 0x323   : > { %v2323_v63 = vpop.f32.mrf.mxu0  ;;  %v2372_v8 = vpop.f32.mrf.mxu1  ;;  %1613 = vmax.xlane.f32.xlu2 %v1612_v12  ;;  %v2118_v32 = vpack.c.bf16 %v2098_v27, %v2096_v40  ;;  %v2092_v39 = vmax.f32 %v2056_v52, 0.0 }
 0x324   : > { %v1488_v43 = vpop.f32.mrf.mxu2  ;;  %v1537_v2 = vpop.f32.mrf.mxu3  ;;  %v2117_v44 = vpack.c.bf16 %v2097_v41, %v2095_v31  ;;  %v2091_v45 = vmax.f32 %v2007_v35, 0.0  ;;  %v2324_v12 = vadd.f32 %v2323_v63, %v4546_v7  ;;  %v2373_v17 = vadd.f32 %v2372_v8, %v4546_v7 }
 0x325   : > { %v1489_v29 = vadd.f32 %v1488_v43, %v4972_v18  ;;  %v1538_v15 = vadd.f32 %v1537_v2, %v4972_v18 }
 0x326   : > { %2124 = vmatpush.bf16.msra.mxu2 %v2119_v5  ;;  %2173 = vmatpush.bf16.msra.mxu3 %v2120_v38  ;;  %v1283_v48 = vpop.xlane.xlu0 %1282  ;;  %v2115_v27 = vpack.c.bf16 %v2093_v19, %v2091_v45  ;;  %v2412_v63 = vmax.f32 %v2324_v12, 0.0  ;;  %v2413_v5 = vmax.f32 %v2373_v17, 0.0 }
 0x327   : > { %v1571_v49 = vmax.f32 %v1489_v29, 0.0  ;;  %v1572_v28 = vmax.f32 %v1538_v15, 0.0  ;;  %4014 = vmatmul.msk.bf16.vlgmr.msra.gmra.mxu0 %vm549_vm1, %v5520_v46  ;;  %4022 = vmatmul.msk.bf16.vlgmr.msra.gmra.mxu1 %vm549_vm1, %v5520_v46  ;;  %v3433_v22 = vperm.slane %v1283_v48, %v5278_v10 }
 0x329   : > { %v3434_v13 = vsel %vm6543_vm14, %v3433_v22, %v3432_v34  ;;  %v1615_v57 = vmax.f32 %v1571_v49, %v1572_v28  ;;  %v2116_v34 = vpack.c.bf16 %v2094_v1, %v2092_v39  ;;  %vm6699_vm14 = vcmask 982912  }
 0x32a   : > { %2125 = vmatpush.bf16.msra.mxu2 %v2117_v44  ;;  %2174 = vmatpush.bf16.msra.mxu3 %v2118_v32 }
 0x32b   : > { %v2325_v56 = vpop.f32.mrf.mxu0  ;;  %v2374_v42 = vpop.f32.mrf.mxu1  ;;  %1616 = vmax.xlane.f32.xlu0 %v1615_v57 }
 0x32c   : > { %v2326_v9 = vadd.f32 %v2325_v56, %v4552_v11  ;;  %v2375_v0 = vadd.f32 %v2374_v42, %v4552_v11  ;;  %v1490_v53 = vpop.f32.mrf.mxu2  ;;  %v1539_v41 = vpop.f32.mrf.mxu3 }
 0x32d   : > { %v1491_v43 = vadd.f32 %v1490_v53, %v4997_v16  ;;  %v1540_v2 = vadd.f32 %v1539_v41, %v4997_v16 }
 0x32e   : > { %v2414_v8 = vmax.f32 %v2326_v9, 0.0  ;;  %v2415_v38 = vmax.f32 %v2375_v0, 0.0  ;;  %2126 = vmatpush.bf16.msra.mxu2 %v2115_v27  ;;  %2175 = vmatpush.bf16.msra.mxu3 %v2116_v34  ;;  %v1286_v29 = vpop.xlane.xlu1 %1285 }
 0x32f   : > { %v1573_v15 = vmax.f32 %v1491_v43, 0.0  ;;  %v1574_v35 = vmax.f32 %v1540_v2, 0.0  ;;  %v3435_v52 = vperm.slane %v1286_v29, %v5296_v21 }
 0x330   : > { %1829 = vmatmul.bf16.gmra.mxu2 %v5307_v20  ;;  %1878 = vmatmul.bf16.gmra.mxu3 %v5307_v20  ;;  %v5537_v31 = vpack.c.bf16 %v2414_v8, %v2412_v63  ;;  %v5539_v40 = vpack.c.bf16 %v2415_v38, %v2413_v5 }
 0x331   : > { %v3436_v48 = vsel %vm6699_vm14, %v3435_v52, %v3434_v13  ;;  %v1618_v49 = vmax.f32 %v1573_v15, %v1574_v35  ;;  %vm3728_vm14 = vcmask 1040384  }
 0x332   : > { %2127 = vmatpush.bf16.msra.mxu2 %v5394_v36  ;;  %2176 = vmatpush.bf16.msra.mxu3 %v5396_v62  ;;  %v5551_v36 = vld [vmem:[%s6428_s1 + $0x8] sm:$0xff] }
 0x333   : > { %v2328_v28 = vpop.f32.mrf.mxu0  ;;  %v2377_v22 = vpop.f32.mrf.mxu1  ;;  %1619 = vmax.xlane.f32.xlu1 %v1618_v49 }
 0x334   : > { %v1493_v19 = vpop.f32.mrf.mxu2  ;;  %v1542_v1 = vpop.f32.mrf.mxu3  ;;  %v2329_v45 = vadd.f32 %v2328_v28, %v4544_v4  ;;  %v2378_v39 = vadd.f32 %v2377_v22, %v4544_v4  ;;  %v6701_v28 = vld [vmem:[#allocation26_spill] sm:$0xff] }
 0x335   : > { %v1494_v44 = vadd.f32 %v1493_v19, %v5011_v30  ;;  %v1543_v20 = vadd.f32 %v1542_v1, %v5011_v30 }
 0x336   : > { %2128 = vmatpush.bf16.msra.mxu2 %v5372_v59  ;;  %2177 = vmatpush.bf16.msra.mxu3 %v5374_v6  ;;  %v1289_v32 = vpop.xlane.xlu2 %1288  ;;  %v2416_v34 = vmax.f32 %v2329_v45, 0.0 }
 0x337   : > { %v1575_v13 = vmax.f32 %v1494_v44, 0.0  ;;  %v1576_v57 = vmax.f32 %v1543_v20, 0.0  ;;  %4015 = vmatmul.msk.bf16.gmra.mxu0 %vm549_vm1, %v5551_v36  ;;  %4023 = vmatmul.msk.bf16.gmra.mxu1 %vm549_vm1, %v5551_v36  ;;  %v3437_v62 = vperm.slane %v1289_v32, %v5318_v37  ;;  %v6703_v44 = vld [vmem:[#allocation27_spill] sm:$0xff] }
 0x339   : > { %v3438_v59 = vsel %vm3389_vm15, %v3437_v62, %v3436_v48  ;;  %v1621_v6 = vmax.f32 %v1575_v13, %v1576_v57  ;;  %v6704_v57 = vld [vmem:[#allocation11_spill] sm:$0xff] }
 0x33a   : > { %v5562_v12 = vsel %vm3728_vm14, %v5330_v61, %v3438_v59  ;;  %2129 = vmatpush.bf16.msra.mxu2 %v5349_v23  ;;  %2178 = vmatpush.bf16.msra.mxu3 %v5351_v58  ;;  %v2417_v61 = vmax.f32 %v2378_v39, 0.0  ;;  %v6705_v39 = vld [vmem:[#allocation10_spill] sm:$0xff]  ;;  %vm6741_vm14 = vcmask 917312  }
 0x33b   : > { %v2330_v17 = vpop.f32.mrf.mxu0  ;;  %v2379_v56 = vpop.f32.mrf.mxu1  ;;  %1622 = vmax.xlane.f32.xlu2 %v1621_v6 }
 0x33c   : > { %v2331_v42 = vadd.f32 %v2330_v17, %v4564_v24  ;;  %v2380_v9 = vadd.f32 %v2379_v56, %v4564_v24  ;;  %v1495_v0 = vpop.f32.mrf.mxu2  ;;  %v1544_v53 = vpop.f32.mrf.mxu3 }
 0x33d   : > { %v1496_v41 = vadd.f32 %v1495_v0, %v5028_v26  ;;  %v1545_v27 = vadd.f32 %v1544_v53, %v5028_v26  ;;  %v6706_v0 = vld [vmem:[#allocation13_spill] sm:$0xff] }
 0x33e   : > { %v2418_v43 = vmax.f32 %v2331_v42, 0.0  ;;  %v2419_v2 = vmax.f32 %v2380_v9, 0.0  ;;  %2130 = vmatpush.bf16.msra.mxu2 %v5311_v47  ;;  %2179 = vmatpush.bf16.msra.mxu3 %v5313_v25  ;;  %v1581_v38 = vpop.xlane.xlu0 %1580  ;;  %v6700_v47 = vld [vmem:[#allocation12_spill] sm:$0xff] }
 0x33f   : > { %v1577_v23 = vmax.f32 %v1496_v41, 0.0  ;;  %v1578_v58 = vmax.f32 %v1545_v27, 0.0  ;;  %v3456_v22 = vperm.slane %v1581_v38, %v6701_v28 }
 0x340   : > { %v5572_v63 = vpack.c.bf16 %v2418_v43, %v2416_v34  ;;  %v5574_v5 = vpack.c.bf16 %v2419_v2, %v2417_v61 }
 0x341   : > { %2131 = vmatmul.bf16.vlgmr.msra.gmra.mxu2 %v5345_v50  ;;  %2180 = vmatmul.bf16.vlgmr.msra.gmra.mxu3 %v5345_v50  ;;  %v1624_v8 = vmax.f32 %v1577_v23, %v1578_v58  ;;  %v5584_v50 = vld [vmem:[%s6428_s1 + $0x10] sm:$0xff] }
 0x342   : > { %6702 = vst [vmem:[#allocation33_spill] sm:$0xff] %v5584_v50 }
 0x343   : > { %v2333_v29 = vpop.f32.mrf.mxu0  ;;  %v2382_v15 = vpop.f32.mrf.mxu1  ;;  %1625 = vmax.xlane.f32.xlu0 %v1624_v8  ;;  %v6707_v8 = vld [vmem:[#allocation28_spill] sm:$0xff] }
 0x344   : > { %v1795_v35 = vpop.f32.mrf.mxu2  ;;  %v1844_v52 = vpop.f32.mrf.mxu3  ;;  %v2334_v62 = vadd.f32 %v2333_v29, %v6704_v57  ;;  %v2383_v59 = vadd.f32 %v2382_v15, %v6704_v57 }
 0x345   : > { %v1796_v48 = vadd.f32 %v1795_v35, %v6700_v47  ;;  %v1845_v25 = vadd.f32 %v1844_v52, %v6700_v47  ;;  %v5607_v52 = vld [vmem:[%s6430_s3 + $0x8] sm:$0xff] }
 0x346   : > { %v1584_v49 = vpop.xlane.xlu1 %1583  ;;  %v2420_v27 = vmax.f32 %v2334_v62, 0.0  ;;  %v2421_v34 = vmax.f32 %v2383_v59, 0.0  ;;  %6708 = vst [vmem:[#allocation35_spill] sm:$0xff] %v5607_v52 }
 0x347   : > { %v1884_v19 = vmax.f32 %v1796_v48, 0.0  ;;  %v1885_v1 = vmax.f32 %v1845_v25, 0.0  ;;  %4016 = vmatmul.msk.bf16.gmra.mxu0 %vm549_vm1, %v5584_v50  ;;  %4024 = vmatmul.msk.bf16.gmra.mxu1 %vm549_vm1, %v5584_v50  ;;  %v3457_v20 = vperm.slane %v1584_v49, %v6703_v44  ;;  %v6740_v44 = vld [vmem:[#allocation6_spill] sm:$0xff] }
 0x349   : > { %v3458_v32 = vsel %vm3333_vm2, %v3457_v20, %v3456_v22  ;;  %v1916_v13 = vmax.f32 %v1884_v19, %v1885_v1  ;;  %v6709_v1 = vld [vmem:[#allocation14_spill] sm:$0xff] }
 0x34b   : > { %v2335_v6 = vpop.f32.mrf.mxu0  ;;  %v2384_v45 = vpop.f32.mrf.mxu1  ;;  %1917 = vmax.xlane.f32.xlu1 %v1916_v13 }
 0x34c   : > { %v2336_v17 = vadd.f32 %v2335_v6, %v6705_v39  ;;  %v2385_v56 = vadd.f32 %v2384_v45, %v6705_v39  ;;  %v1797_v42 = vpop.f32.mrf.mxu2  ;;  %v1846_v9 = vpop.f32.mrf.mxu3  ;;  %v5616_v6 = vld [vmem:[%s6428_s1 + $0x18] sm:$0xff] }
 0x34d   : > { %v1798_v53 = vadd.f32 %v1797_v42, %v6706_v0  ;;  %v1847_v41 = vadd.f32 %v1846_v9, %v6706_v0  ;;  %6710 = vst [vmem:[#allocation37_spill] sm:$0xff] %v5616_v6  ;;  %v6711_v45 = vld [vmem:[#allocation30_spill] sm:$0xff]  ;;  %v6712_v9 = vld [vmem:[#allocation7_spill] sm:$0xff] }
 0x34e   : > { %v2422_v61 = vmax.f32 %v2336_v17, 0.0  ;;  %v2423_v43 = vmax.f32 %v2385_v56, 0.0  ;;  %v1587_v2 = vpop.xlane.xlu2 %1586  ;;  %v6733_v39 = vld [vmem:[#allocation22_spill] sm:$0xff] }
 0x34f   : > { %v1886_v23 = vmax.f32 %v1798_v53, 0.0  ;;  %v1887_v58 = vmax.f32 %v1847_v41, 0.0  ;;  %v3459_v38 = vperm.slane %v1587_v2, %v6707_v8 }
 0x350   : > { %v5599_v29 = vpack.c.bf16 %v2422_v61, %v2420_v27  ;;  %v5601_v15 = vpack.c.bf16 %v2423_v43, %v2421_v34  ;;  %v6713_v61 = vld [vmem:[#allocation9_spill] sm:$0xff] }
 0x351   : > { %v3460_v35 = vsel %vm3337_vm3, %v3459_v38, %v3458_v32  ;;  %2136 = vmatmul.bf16.gmra.mxu2 %v5607_v52  ;;  %2185 = vmatmul.bf16.gmra.mxu3 %v5607_v52  ;;  %v1919_v48 = vmax.f32 %v1886_v23, %v1887_v58  ;;  %v6714_v38 = vld [vmem:[#allocation15_spill] sm:$0xff] }
 0x353   : > { %v2338_v25 = vpop.f32.mrf.mxu0  ;;  %v2387_v49 = vpop.f32.mrf.mxu1  ;;  %1920 = vmax.xlane.f32.xlu2 %v1919_v48 }
 0x354   : > { %v1800_v22 = vpop.f32.mrf.mxu2  ;;  %v1849_v19 = vpop.f32.mrf.mxu3  ;;  %v2339_v53 = vadd.f32 %v2338_v25, %v6712_v9  ;;  %v2388_v41 = vadd.f32 %v2387_v49, %v6712_v9 }
 0x355   : > { %v1801_v20 = vadd.f32 %v1800_v22, %v6709_v1  ;;  %v1850_v13 = vadd.f32 %v1849_v19, %v6709_v1 }
 0x356   : > { %v1590_v32 = vpop.xlane.xlu0 %1589  ;;  %v2424_v19 = vmax.f32 %v2339_v53, 0.0 }
 0x357   : > { %v1888_v62 = vmax.f32 %v1801_v20, 0.0  ;;  %v1889_v59 = vmax.f32 %v1850_v13, 0.0  ;;  %4017 = vmatmul.msk.bf16.gmra.mxu0 %vm549_vm1, %v5616_v6  ;;  %4025 = vmatmul.msk.bf16.gmra.mxu1 %vm549_vm1, %v5616_v6  ;;  %v3461_v17 = vperm.slane %v1590_v32, %v6711_v45 }
 0x359   : > { %v3462_v56 = vsel %vm3341_vm4, %v3461_v17, %v3460_v35  ;;  %v1922_v42 = vmax.f32 %v1888_v62, %v1889_v59  ;;  %v2425_v35 = vmax.f32 %v2388_v41, 0.0  ;;  %v6715_v62 = vld [vmem:[#allocation32_spill] sm:$0xff] }
 0x35b   : > { %v2340_v27 = vpop.f32.mrf.mxu0  ;;  %v2389_v34 = vpop.f32.mrf.mxu1  ;;  %1923 = vmax.xlane.f32.xlu0 %v1922_v42 }
 0x35c   : > { %v2341_v43 = vadd.f32 %v2340_v27, %v6713_v61  ;;  %v2390_v2 = vadd.f32 %v2389_v34, %v6713_v61  ;;  %v1802_v23 = vpop.f32.mrf.mxu2  ;;  %v1851_v58 = vpop.f32.mrf.mxu3  ;;  %v5639_v34 = vld [vmem:[%s6430_s3 + $0x10] sm:$0xff] }
 0x35d   : > { %v1803_v48 = vadd.f32 %v1802_v23, %v6714_v38  ;;  %v1852_v22 = vadd.f32 %v1851_v58, %v6714_v38  ;;  %6716 = vst [vmem:[#allocation39_spill] sm:$0xff] %v5639_v34  ;;  %v6717_v58 = vld [vmem:[#allocation16_spill] sm:$0xff]  ;;  %v6720_v38 = vld [vmem:[#allocation17_spill] sm:$0xff] }
 0x35e   : > { %v2426_v20 = vmax.f32 %v2341_v43, 0.0  ;;  %v2427_v13 = vmax.f32 %v2390_v2, 0.0  ;;  %v1593_v25 = vpop.xlane.xlu1 %1592 }
 0x35f   : > { %v1890_v32 = vmax.f32 %v1803_v48, 0.0  ;;  %v1891_v49 = vmax.f32 %v1852_v22, 0.0  ;;  %v3463_v59 = vperm.slane %v1593_v25, %v6715_v62 }
 0x360   : > { %v5631_v17 = vpack.c.bf16 %v2426_v20, %v2424_v19  ;;  %v5633_v42 = vpack.c.bf16 %v2427_v13, %v2425_v35  ;;  %v5652_v20 = vld [vmem:[%s6428_s1 + $0x20] sm:$0xff]  ;;  %v6719_v13 = vld [vmem:[#allocation34_spill] sm:$0xff] }
 0x361   : > { %v3464_v27 = vsel %vm3345_vm5, %v3463_v59, %v3462_v56  ;;  %2141 = vmatmul.bf16.gmra.mxu2 %v5639_v34  ;;  %2190 = vmatmul.bf16.gmra.mxu3 %v5639_v34  ;;  %v1925_v53 = vmax.f32 %v1890_v32, %v1891_v49  ;;  %6718 = vst [vmem:[#allocation41_spill] sm:$0xff] %v5652_v20  ;;  %v4030_v59 = vld [vmem:[%s4351_s21 + $0x38] sm:$0xff] }
 0x363   : > { %v5643_v41 = vpop.f32.mrf.mxu0  ;;  %v5645_v43 = vpop.f32.mrf.mxu1  ;;  %1926 = vmax.xlane.f32.xlu1 %v1925_v53  ;;  %v2978_v53 = vunpack.c.l.b16 %v4030_v59 }
 0x364   : > { %v1805_v2 = vpop.f32.mrf.mxu2  ;;  %v1854_v23 = vpop.f32.mrf.mxu3 }
 0x365   : > { %v1806_v56 = vadd.f32 %v1805_v2, %v6717_v58  ;;  %v1855_v48 = vadd.f32 %v1854_v23, %v6717_v58  ;;  %v2979_v2 = vunpack.c.h.b16 %v4030_v59  ;;  %v2980_v34 = vpack.c.b16 %v2978_v53, %v2978_v53  ;;  %v6721_v59 = vld [vmem:[#allocation36_spill] sm:$0xff]  ;;  %v5674_v53 = vld [vmem:[%s6430_s3 + $0x18] sm:$0xff] }
 0x366   : > { %v1596_v22 = vpop.xlane.xlu2 %1595  ;;  %6722 = vst [vmem:[#allocation43_spill] sm:$0xff] %v5674_v53 }
 0x367   : > { %v1892_v19 = vmax.f32 %v1806_v56, 0.0  ;;  %v1893_v35 = vmax.f32 %v1855_v48, 0.0  ;;  %4018 = vmatmul.msk.bf16.gmra.mxu0 %vm549_vm1, %v5652_v20  ;;  %4026 = vmatmul.msk.bf16.gmra.mxu1 %vm549_vm1, %v5652_v20  ;;  %v3465_v25 = vperm.slane %v1596_v22, %v6719_v13  ;;  %v2981_v62 = vpack.c.b16 %v2979_v2, %v2979_v2  ;;  %v6723_v2 = vld [vmem:[#allocation18_spill] sm:$0xff] }
 0x369   : > { %v3466_v32 = vsel %vm3349_vm6, %v3465_v25, %v3464_v27  ;;  %v1928_v49 = vmax.f32 %v1892_v19, %v1893_v35  ;;  %v2983_v27 = vsel %vm574_vm0, %v2980_v34, 0  ;;  %v2986_v19 = vsel %vm574_vm0, %v2981_v62, 0 }
 0x36a   : > { %2995 = vmatpush.bf16.msrb.mxu0 %v2983_v27  ;;  %3044 = vmatpush.bf16.msrb.mxu1 %v2986_v19  ;;  %v6724_v19 = vld [vmem:[#allocation25_spill] sm:$0xff] }
 0x36b   : > { %v5661_v23 = vpop.f32.mrf.mxu0  ;;  %v5663_v56 = vpop.f32.mrf.mxu1  ;;  %1929 = vmax.xlane.f32.xlu2 %v1928_v49 }
 0x36c   : > { %v1807_v48 = vpop.f32.mrf.mxu2  ;;  %v1856_v58 = vpop.f32.mrf.mxu3 }
 0x36d   : > { %v1808_v61 = vadd.f32 %v1807_v48, %v6720_v38  ;;  %v1857_v20 = vadd.f32 %v1856_v58, %v6720_v38 }
 0x36e   : > { %v1599_v22 = vpop.xlane.xlu0 %1598 }
 0x36f   : > { %v1894_v35 = vmax.f32 %v1808_v61, 0.0  ;;  %v1895_v25 = vmax.f32 %v1857_v20, 0.0  ;;  %v3467_v13 = vperm.slane %v1599_v22, %v6721_v59 }
 0x371   : > { %v3468_v49 = vsel %vm3353_vm7, %v3467_v13, %v3466_v32  ;;  %2146 = vmatmul.bf16.gmra.mxu2 %v5674_v53  ;;  %2195 = vmatmul.bf16.gmra.mxu3 %v5674_v53  ;;  %v1931_v34 = vmax.f32 %v1894_v35, %v1895_v25  ;;  %v6725_v35 = vld [vmem:[#allocation38_spill] sm:$0xff] }
 0x373   : > { %v5678_v58 = vpop.f32.mrf.mxu0  ;;  %v5680_v61 = vpop.f32.mrf.mxu1  ;;  %1932 = vmax.xlane.f32.xlu0 %v1931_v34 }
 0x374   : > { %v1810_v62 = vpop.f32.mrf.mxu2  ;;  %v1859_v20 = vpop.f32.mrf.mxu3 }
 0x375   : > { %v1811_v48 = vadd.f32 %v1810_v62, %v6723_v2  ;;  %v1860_v13 = vadd.f32 %v1859_v20, %v6723_v2 }
 0x376   : > { %v1602_v32 = vpop.xlane.xlu1 %1601 }
 0x377   : > { %v1896_v22 = vmax.f32 %v1811_v48, 0.0  ;;  %v1897_v27 = vmax.f32 %v1860_v13, 0.0  ;;  %4019 = vmatmul.msk.bf16.gmra.mxu0 %vm549_vm1, %v6724_v19  ;;  %4027 = vmatmul.msk.bf16.gmra.mxu1 %vm549_vm1, %v6724_v19  ;;  %v3469_v25 = vperm.slane %v1602_v32, %v6725_v35  ;;  %v6726_v48 = vld [vmem:[#allocation20_spill] sm:$0xff]  ;;  %v6727_v19 = vld [vmem:[#allocation19_spill] sm:$0xff] }
 0x379   : > { %v3470_v53 = vsel %vm3357_vm8, %v3469_v25, %v3468_v49  ;;  %v1934_v34 = vmax.f32 %v1896_v22, %v1897_v27  ;;  %v5701_v49 = vld [vmem:[%s6430_s3 + $0x20] sm:$0xff] }
 0x37a   : > { %6728 = vst [vmem:[#allocation25_spill] sm:$0xff] %v5701_v49 }
 0x37b   : > { %v5690_v59 = vpop.f32.mrf.mxu0  ;;  %v5692_v38 = vpop.f32.mrf.mxu1  ;;  %1935 = vmax.xlane.f32.xlu1 %v1934_v34 }
 0x37c   : > { %v1812_v62 = vpop.f32.mrf.mxu2  ;;  %v1861_v20 = vpop.f32.mrf.mxu3 }
 0x37d   : > { %v1813_v13 = vadd.f32 %v1812_v62, %v6726_v48  ;;  %v1862_v2 = vadd.f32 %v1861_v20, %v6726_v48 }
 0x37e   : > { %v1605_v9 = vpop.xlane.xlu2 %1604 }
 0x37f   : > { %v1898_v45 = vmax.f32 %v1813_v13, 0.0  ;;  %v1899_v6 = vmax.f32 %v1862_v2, 0.0  ;;  %v3471_v1 = vperm.slane %v1605_v9, %v6727_v19  ;;  %v6729_v2 = vld [vmem:[#allocation21_spill] sm:$0xff] }
 0x380   : > { %v6730_v19 = vld [vmem:[#allocation29_spill] sm:$0xff] }
 0x381   : > { %v3472_v32 = vsel %vm3361_vm9, %v3471_v1, %v3470_v53  ;;  %2151 = vmatmul.bf16.gmra.mxu2 %v5701_v49  ;;  %2200 = vmatmul.bf16.gmra.mxu3 %v5701_v49  ;;  %v1937_v22 = vmax.f32 %v1898_v45, %v1899_v6  ;;  %v6731_v49 = vld [vmem:[#allocation40_spill] sm:$0xff] }
 0x383   : > { %v2353_v27 = vpop.f32.mrf.mxu0  ;;  %v2402_v25 = vpop.f32.mrf.mxu1  ;;  %1938 = vmax.xlane.f32.xlu2 %v1937_v22 }
 0x384   : > { %v1815_v34 = vpop.f32.mrf.mxu2  ;;  %v1864_v62 = vpop.f32.mrf.mxu3 }
 0x385   : > { %v1816_v20 = vadd.f32 %v1815_v34, %v6729_v2  ;;  %v1865_v9 = vadd.f32 %v1864_v62, %v6729_v2  ;;  %v6732_v62 = vld [vmem:[#allocation23_spill] sm:$0xff] }
 0x386   : > { %v1608_v1 = vpop.xlane.xlu0 %1607 }
 0x387   : > { %v1900_v53 = vmax.f32 %v1816_v20, 0.0  ;;  %v1901_v13 = vmax.f32 %v1865_v9, 0.0  ;;  %4020 = vmatmul.msk.bf16.gmra.mxu0 %vm549_vm1, %v6730_v19  ;;  %4028 = vmatmul.msk.bf16.gmra.mxu1 %vm549_vm1, %v6730_v19  ;;  %v3473_v6 = vperm.slane %v1608_v1, %v6731_v49 }
 0x389   : > { %v3474_v45 = vsel %vm3365_vm10, %v3473_v6, %v3472_v32  ;;  %v1940_v22 = vmax.f32 %v1900_v53, %v1901_v13  ;;  %v5720_v32 = vld [vmem:[%s6430_s3 + $0x28] sm:$0xff] }
 0x38a   : > { %6734 = vst [vmem:[#allocation29_spill] sm:$0xff] %v5720_v32  ;;  %v6735_v6 = vld [vmem:[#allocation24_spill] sm:$0xff] }
 0x38b   : > { %v2355_v48 = vpop.f32.mrf.mxu0  ;;  %v2404_v35 = vpop.f32.mrf.mxu1  ;;  %1941 = vmax.xlane.f32.xlu0 %v1940_v22 }
 0x38c   : > { %v1817_v34 = vpop.f32.mrf.mxu2  ;;  %v1866_v52 = vpop.f32.mrf.mxu3 }
 0x38d   : > { %v1818_v2 = vadd.f32 %v1817_v34, %v6732_v62  ;;  %v1867_v20 = vadd.f32 %v1866_v52, %v6732_v62 }
 0x38e   : > { %v1611_v9 = vpop.xlane.xlu1 %1610 }
 0x38f   : > { %v1902_v8 = vmax.f32 %v1818_v2, 0.0  ;;  %v1903_v0 = vmax.f32 %v1867_v20, 0.0  ;;  %v3475_v57 = vperm.slane %v1611_v9, %v6733_v39  ;;  %v6736_v9 = vld [vmem:[#allocation31_spill] sm:$0xff]  ;;  %v6738_v39 = vld [vmem:[#allocation5_spill] sm:$0xff] }
 0x391   : > { %v3476_v19 = vsel %vm3369_vm11, %v3475_v57, %v3474_v45  ;;  %2156 = vmatmul.bf16.gmra.mxu2 %v5720_v32  ;;  %2205 = vmatmul.bf16.gmra.mxu3 %v5720_v32  ;;  %v1943_v1 = vmax.f32 %v1902_v8, %v1903_v0  ;;  %v6737_v32 = vld [vmem:[#allocation42_spill] sm:$0xff] }
 0x393   : > { %v2358_v53 = vpop.f32.mrf.mxu0  ;;  %v2407_v13 = vpop.f32.mrf.mxu1  ;;  %1944 = vmax.xlane.f32.xlu1 %v1943_v1 }
 0x394   : > { %v1820_v52 = vpop.f32.mrf.mxu2  ;;  %v1869_v2 = vpop.f32.mrf.mxu3  ;;  %v2359_v62 = vadd.f32 %v2358_v53, %v6738_v39  ;;  %v2354_v53 = vadd.f32 %v2353_v27, %v4509_v55 }
 0x395   : > { %v1821_v22 = vadd.f32 %v1820_v52, %v6735_v6  ;;  %v1870_v34 = vadd.f32 %v1869_v2, %v6735_v6  ;;  %v2408_v52 = vadd.f32 %v2407_v13, %v6738_v39  ;;  %v5736_v2 = vadd.f32 %v5690_v59, %v4507_v54  ;;  %v6739_v6 = vld [vmem:[#allocation8_spill] sm:$0xff] }
 0x396   : > { %v1614_v57 = vpop.xlane.xlu2 %1613  ;;  %v2356_v49 = vadd.f32 %v2355_v48, %v6739_v6  ;;  %v2403_v13 = vadd.f32 %v2402_v25, %v4509_v55  ;;  %v2440_v39 = vmax.f32 %v2359_v62, 0.0  ;;  %v5753_v62 = vld [vmem:[%s6430_s3 + $0x30] sm:$0xff] }
 0x397   : > { %v1904_v45 = vmax.f32 %v1821_v22, 0.0  ;;  %v1905_v20 = vmax.f32 %v1870_v34, 0.0  ;;  %4021 = vmatmul.msk.bf16.gmra.mxu0 %vm549_vm1, %v6736_v9  ;;  %4029 = vmatmul.msk.bf16.gmra.mxu1 %vm549_vm1, %v6736_v9  ;;  %v3477_v0 = vperm.slane %v1614_v57, %v6737_v32  ;;  %v2405_v9 = vadd.f32 %v2404_v35, %v6739_v6 }
 0x398   : > { %v2400_v35 = vadd.f32 %v5692_v38, %v4507_v54  ;;  %v2438_v6 = vmax.f32 %v2356_v49, 0.0  ;;  %v2437_v49 = vmax.f32 %v2403_v13, 0.0 }
 0x399   : > { %v3478_v8 = vsel %vm3373_vm12, %v3477_v0, %v3476_v19  ;;  %v1946_v1 = vmax.f32 %v1904_v45, %v1905_v20  ;;  %v2439_v27 = vmax.f32 %v2405_v9, 0.0 }
 0x39a   : > { %v2435_v9 = vmax.f32 %v2400_v35, 0.0 }
 0x39b   : > { %v2360_v22 = vpop.f32.mrf.mxu0  ;;  %v2409_v34 = vpop.f32.mrf.mxu1  ;;  %1947 = vmax.xlane.f32.xlu2 %v1946_v1  ;;  %v2441_v1 = vmax.f32 %v2408_v52, 0.0  ;;  %v2349_v52 = vadd.f32 %v5678_v58, %v4496_v51 }
 0x39c   : > { %v2361_v57 = vadd.f32 %v2360_v22, %v6740_v44  ;;  %v2410_v19 = vadd.f32 %v2409_v34, %v6740_v44  ;;  %v1822_v45 = vpop.f32.mrf.mxu2  ;;  %v1871_v20 = vpop.f32.mrf.mxu3 }
 0x39d   : > { %v1823_v59 = vadd.f32 %v1822_v45, %v4954_v14  ;;  %v1872_v0 = vadd.f32 %v1871_v20, %v4954_v14  ;;  %v2457_v20 = vpack.c.bf16 %v2439_v27, %v2437_v49 }
 0x39e   : > { %v2442_v32 = vmax.f32 %v2361_v57, 0.0  ;;  %v2443_v48 = vmax.f32 %v2410_v19, 0.0  ;;  %v1617_v50 = vpop.xlane.xlu0 %1616 }
 0x39f   : > { %v1906_v22 = vmax.f32 %v1823_v59, 0.0  ;;  %v1907_v34 = vmax.f32 %v1872_v0, 0.0  ;;  %v3479_v44 = vperm.slane %v1617_v50, %v5246_v33  ;;  %v2398_v50 = vadd.f32 %v5680_v61, %v4496_v51 }
 0x3a0   : > { %v2458_v28 = vpack.c.bf16 %v2442_v32, %v2440_v39  ;;  %v2459_v25 = vpack.c.bf16 %v2443_v48, %v2441_v1  ;;  %v2436_v39 = vmax.f32 %v2354_v53, 0.0  ;;  %v2395_v32 = vadd.f32 %v5663_v56, %v4538_v3 }
 0x3a1   : > { %v3480_v45 = vsel %vm3377_vm13, %v3479_v44, %v3478_v8  ;;  %2161 = vmatmul.bf16.gmra.mxu2 %v5753_v62  ;;  %2210 = vmatmul.bf16.gmra.mxu3 %v5753_v62  ;;  %v1949_v38 = vmax.f32 %v1906_v22, %v1907_v34  ;;  %v2346_v44 = vadd.f32 %v5661_v23, %v4538_v3  ;;  %v2434_v8 = vmax.f32 %v5736_v2, 0.0 }
 0x3a2   : > { %2460 = vmatpush.bf16.msrb.mxu2 %v2458_v28  ;;  %2509 = vmatpush.bf16.msrb.mxu3 %v2459_v25  ;;  %v2456_v58 = vpack.c.bf16 %v2438_v6, %v2436_v39  ;;  %v2344_v61 = vadd.f32 %v5643_v41, %v4527_v60  ;;  %v2393_v28 = vadd.f32 %v5645_v43, %v4527_v60  ;;  %v2432_v23 = vmax.f32 %v2349_v52, 0.0 }
 0x3a3   : > { %1950 = vmax.xlane.f32.xlu0 %v1949_v38  ;;  %v2433_v59 = vmax.f32 %v2398_v50, 0.0  ;;  %v2430_v1 = vmax.f32 %v2346_v44, 0.0  ;;  %v2431_v6 = vmax.f32 %v2395_v32, 0.0 }
 0x3a4   : > { %v2660_v57 = vpop.f32.mrf.mxu0  ;;  %v2709_v19 = vpop.f32.mrf.mxu1  ;;  %v2454_v35 = vpack.c.bf16 %v2434_v8, %v2432_v23  ;;  %v2428_v27 = vmax.f32 %v2344_v61, 0.0  ;;  %v2429_v25 = vmax.f32 %v2393_v28, 0.0 }
 0x3a5   : > { %v1825_v53 = vpop.f32.mrf.mxu2  ;;  %v1874_v13 = vpop.f32.mrf.mxu3  ;;  %v2455_v22 = vpack.c.bf16 %v2435_v9, %v2433_v59  ;;  %v2661_v38 = vadd.f32 %v2660_v57, %v4546_v7  ;;  %v2710_v50 = vadd.f32 %v2709_v19, %v4546_v7 }
 0x3a6   : > { %v1826_v56 = vadd.f32 %v1825_v53, %v4972_v18  ;;  %v1875_v0 = vadd.f32 %v1874_v13, %v4972_v18  ;;  %2461 = vmatpush.bf16.msrb.mxu2 %v2456_v58  ;;  %2510 = vmatpush.bf16.msrb.mxu3 %v2457_v20  ;;  %v1620_v2 = vpop.xlane.xlu1 %1619  ;;  %v2453_v44 = vpack.c.bf16 %v2431_v6, %v2429_v25 }
 0x3a7   : > { %4031 = vmatmul.msk.bf16.vlgmr.msrb.gmra.mxu0 %vm549_vm1, %v5520_v46  ;;  %4039 = vmatmul.msk.bf16.vlgmr.msrb.gmra.mxu1 %vm549_vm1, %v5520_v46  ;;  %v3481_v41 = vperm.slane %v1620_v2, %v5278_v10  ;;  %v2452_v46 = vpack.c.bf16 %v2430_v1, %v2428_v27  ;;  %v2749_v58 = vmax.f32 %v2661_v38, 0.0  ;;  %v2750_v19 = vmax.f32 %v2710_v50, 0.0 }
 0x3a8   : > { %v1908_v43 = vmax.f32 %v1826_v56, 0.0  ;;  %v1909_v48 = vmax.f32 %v1875_v0, 0.0  ;;  %v5789_v0 = vld [vmem:[%s6430_s3 + $0x38] sm:$0xff] }
 0x3a9   : > { %v3482_v34 = vsel %vm6741_vm14, %v3481_v41, %v3480_v45  ;;  %vm6742_vm14 = vcmask 982912  }
 0x3aa   : > { %2462 = vmatpush.bf16.msrb.mxu2 %v2454_v35  ;;  %2511 = vmatpush.bf16.msrb.mxu3 %v2455_v22  ;;  %v1952_v52 = vmax.f32 %v1908_v43, %v1909_v48 }
 0x3ac   : > { %v2662_v39 = vpop.f32.mrf.mxu0  ;;  %v2711_v49 = vpop.f32.mrf.mxu1  ;;  %1953 = vmax.xlane.f32.xlu1 %v1952_v52 }
 0x3ad   : > { %v2663_v32 = vadd.f32 %v2662_v39, %v4552_v11  ;;  %v2712_v8 = vadd.f32 %v2711_v49, %v4552_v11  ;;  %v1827_v9 = vpop.f32.mrf.mxu2  ;;  %v1876_v45 = vpop.f32.mrf.mxu3 }
 0x3ae   : > { %v1828_v20 = vadd.f32 %v1827_v9, %v4997_v16  ;;  %v1877_v57 = vadd.f32 %v1876_v45, %v4997_v16  ;;  %2463 = vmatpush.bf16.msrb.mxu2 %v2452_v46  ;;  %2512 = vmatpush.bf16.msrb.mxu3 %v2453_v44  ;;  %v1623_v61 = vpop.xlane.xlu2 %1622 }
 0x3af   : > { %v2751_v28 = vmax.f32 %v2663_v32, 0.0  ;;  %v2752_v53 = vmax.f32 %v2712_v8, 0.0  ;;  %v3483_v13 = vperm.slane %v1623_v61, %v5296_v21 }
 0x3b0   : > { %v1910_v23 = vmax.f32 %v1828_v20, 0.0  ;;  %v1911_v59 = vmax.f32 %v1877_v57, 0.0  ;;  %v5825_v57 = vld [vmem:[%s6430_s3] sm:$0xff] }
 0x3b1   : > { %v3484_v56 = vsel %vm6742_vm14, %v3483_v13, %v3482_v34  ;;  %2166 = vmatmul.bf16.gmra.mxu2 %v5789_v0  ;;  %2215 = vmatmul.bf16.gmra.mxu3 %v5789_v0  ;;  %v5793_v2 = vpack.c.bf16 %v2751_v28, %v2749_v58  ;;  %v5795_v1 = vpack.c.bf16 %v2752_v53, %v2750_v19  ;;  %vm3730_vm14 = vcmask 1041408  }
 0x3b2   : > { %2464 = vmatpush.bf16.msrb.mxu2 %v5631_v17  ;;  %2513 = vmatpush.bf16.msrb.mxu3 %v5633_v42  ;;  %v1955_v6 = vmax.f32 %v1910_v23, %v1911_v59 }
 0x3b4   : > { %v2665_v41 = vpop.f32.mrf.mxu0  ;;  %v2714_v43 = vpop.f32.mrf.mxu1  ;;  %1956 = vmax.xlane.f32.xlu2 %v1955_v6 }
 0x3b5   : > { %v1830_v48 = vpop.f32.mrf.mxu2  ;;  %v1879_v35 = vpop.f32.mrf.mxu3  ;;  %v2715_v50 = vadd.f32 %v2714_v43, %v4544_v4 }
 0x3b6   : > { %v1831_v22 = vadd.f32 %v1830_v48, %v5011_v30  ;;  %v1880_v34 = vadd.f32 %v1879_v35, %v5011_v30  ;;  %2465 = vmatpush.bf16.msrb.mxu2 %v5599_v29  ;;  %2514 = vmatpush.bf16.msrb.mxu3 %v5601_v15  ;;  %v1626_v27 = vpop.xlane.xlu0 %1625  ;;  %v2666_v15 = vadd.f32 %v2665_v41, %v4544_v4  ;;  %v6743_v41 = vld [vmem:[#allocation26_spill] sm:$0xff]  ;;  %v6744_v48 = vld [vmem:[#allocation33_spill] sm:$0xff]  ;;  %v6745_v35 = vld [vmem:[#allocation27_spill] sm:$0xff] }
 0x3b7   : > { %4032 = vmatmul.msk.bf16.gmra.mxu0 %vm549_vm1, %v5551_v36  ;;  %4040 = vmatmul.msk.bf16.gmra.mxu1 %vm549_vm1, %v5551_v36  ;;  %v3485_v17 = vperm.slane %v1626_v27, %v5318_v37  ;;  %v2754_v8 = vmax.f32 %v2715_v50, 0.0 }
 0x3b8   : > { %v1912_v42 = vmax.f32 %v1831_v22, 0.0  ;;  %v1913_v25 = vmax.f32 %v1880_v34, 0.0 }
 0x3b9   : > { %v3486_v38 = vsel %vm3389_vm15, %v3485_v17, %v3484_v56 }
 0x3ba   : > { %v5810_v52 = vsel %vm3730_vm14, %v5562_v12, %v3486_v38  ;;  %2466 = vmatpush.bf16.msrb.mxu2 %v5572_v63  ;;  %2515 = vmatpush.bf16.msrb.mxu3 %v5574_v5  ;;  %v1958_v29 = vmax.f32 %v1912_v42, %v1913_v25  ;;  %v2753_v5 = vmax.f32 %v2666_v15, 0.0  ;;  %v6746_v42 = vld [vmem:[#allocation11_spill] sm:$0xff]  ;;  %vm6781_vm14 = vcmask 982912  }
 0x3bc   : > { %v2667_v36 = vpop.f32.mrf.mxu0  ;;  %v2716_v39 = vpop.f32.mrf.mxu1  ;;  %1959 = vmax.xlane.f32.xlu0 %v1958_v29 }
 0x3bd   : > { %v2668_v49 = vadd.f32 %v2667_v36, %v4564_v24  ;;  %v2717_v46 = vadd.f32 %v2716_v39, %v4564_v24  ;;  %v1832_v44 = vpop.f32.mrf.mxu2  ;;  %v1881_v32 = vpop.f32.mrf.mxu3  ;;  %v6747_v36 = vld [vmem:[#allocation10_spill] sm:$0xff] }
 0x3be   : > { %v1833_v12 = vadd.f32 %v1832_v44, %v5028_v26  ;;  %v1882_v63 = vadd.f32 %v1881_v32, %v5028_v26  ;;  %2467 = vmatpush.bf16.msrb.mxu2 %v5537_v31  ;;  %2516 = vmatpush.bf16.msrb.mxu3 %v5539_v40  ;;  %v1918_v19 = vpop.xlane.xlu1 %1917 }
 0x3bf   : > { %v2755_v9 = vmax.f32 %v2668_v49, 0.0  ;;  %v2756_v45 = vmax.f32 %v2717_v46, 0.0  ;;  %v3504_v43 = vperm.slane %v1918_v19, %v6743_v41 }
 0x3c0   : > { %v1914_v58 = vmax.f32 %v1833_v12, 0.0  ;;  %v1915_v20 = vmax.f32 %v1882_v63, 0.0  ;;  %v6748_v12 = vld [vmem:[#allocation13_spill] sm:$0xff] }
 0x3c1   : > { %2468 = vmatmul.bf16.vlgmr.msrb.gmra.mxu2 %v5825_v57  ;;  %2517 = vmatmul.bf16.vlgmr.msrb.gmra.mxu3 %v5825_v57  ;;  %v5829_v61 = vpack.c.bf16 %v2755_v9, %v2753_v5  ;;  %v5831_v31 = vpack.c.bf16 %v2756_v45, %v2754_v8 }
 0x3c2   : > { %v1961_v40 = vmax.f32 %v1914_v58, %v1915_v20  ;;  %v6749_v20 = vld [vmem:[#allocation28_spill] sm:$0xff] }
 0x3c4   : > { %v2670_v28 = vpop.f32.mrf.mxu0  ;;  %v2719_v53 = vpop.f32.mrf.mxu1  ;;  %1962 = vmax.xlane.f32.xlu1 %v1961_v40 }
 0x3c5   : > { %v2132_v13 = vpop.f32.mrf.mxu2  ;;  %v2181_v23 = vpop.f32.mrf.mxu3  ;;  %v2671_v25 = vadd.f32 %v2670_v28, %v6746_v42  ;;  %v2720_v29 = vadd.f32 %v2719_v53, %v6746_v42 }
 0x3c6   : > { %v2133_v59 = vadd.f32 %v2132_v13, %v6700_v47  ;;  %v2182_v56 = vadd.f32 %v2181_v23, %v6700_v47  ;;  %v1921_v6 = vpop.xlane.xlu2 %1920  ;;  %v6750_v13 = vld [vmem:[#allocation35_spill] sm:$0xff] }
 0x3c7   : > { %4033 = vmatmul.msk.bf16.gmra.mxu0 %vm549_vm1, %v6744_v48  ;;  %4041 = vmatmul.msk.bf16.gmra.mxu1 %vm549_vm1, %v6744_v48  ;;  %v3505_v22 = vperm.slane %v1921_v6, %v6745_v35  ;;  %v2757_v32 = vmax.f32 %v2671_v25, 0.0  ;;  %v2758_v9 = vmax.f32 %v2720_v29, 0.0  ;;  %v6753_v29 = vld [vmem:[#allocation30_spill] sm:$0xff] }
 0x3c8   : > { %v2221_v34 = vmax.f32 %v2133_v59, 0.0  ;;  %v2222_v27 = vmax.f32 %v2182_v56, 0.0 }
 0x3c9   : > { %v3506_v17 = vsel %vm3333_vm2, %v3505_v22, %v3504_v43 }
 0x3ca   : > { %v2253_v38 = vmax.f32 %v2221_v34, %v2222_v27  ;;  %v6751_v34 = vld [vmem:[#allocation14_spill] sm:$0xff] }
 0x3cc   : > { %v2672_v15 = vpop.f32.mrf.mxu0  ;;  %v2721_v50 = vpop.f32.mrf.mxu1  ;;  %2254 = vmax.xlane.f32.xlu2 %v2253_v38 }
 0x3cd   : > { %v2673_v39 = vadd.f32 %v2672_v15, %v6747_v36  ;;  %v2722_v49 = vadd.f32 %v2721_v50, %v6747_v36  ;;  %v2134_v46 = vpop.f32.mrf.mxu2  ;;  %v2183_v44 = vpop.f32.mrf.mxu3  ;;  %v6773_v36 = vld [vmem:[#allocation22_spill] sm:$0xff] }
 0x3ce   : > { %v2135_v63 = vadd.f32 %v2134_v46, %v6748_v12  ;;  %v2184_v5 = vadd.f32 %v2183_v44, %v6748_v12  ;;  %v1924_v8 = vpop.xlane.xlu0 %1923  ;;  %v6754_v46 = vld [vmem:[#allocation7_spill] sm:$0xff] }
 0x3cf   : > { %v2759_v45 = vmax.f32 %v2673_v39, 0.0  ;;  %v2760_v58 = vmax.f32 %v2722_v49, 0.0  ;;  %v3507_v40 = vperm.slane %v1924_v8, %v6749_v20 }
 0x3d0   : > { %v2223_v19 = vmax.f32 %v2135_v63, 0.0  ;;  %v2224_v28 = vmax.f32 %v2184_v5, 0.0 }
 0x3d1   : > { %v3508_v53 = vsel %vm3337_vm3, %v3507_v40, %v3506_v17  ;;  %2473 = vmatmul.bf16.gmra.mxu2 %v6750_v13  ;;  %2522 = vmatmul.bf16.gmra.mxu3 %v6750_v13  ;;  %v5852_v23 = vpack.c.bf16 %v2759_v45, %v2757_v32  ;;  %v5854_v59 = vpack.c.bf16 %v2760_v58, %v2758_v9  ;;  %v6752_v17 = vld [vmem:[#allocation37_spill] sm:$0xff]  ;;  %v6756_v13 = vld [vmem:[#allocation15_spill] sm:$0xff] }
 0x3d2   : > { %v2256_v56 = vmax.f32 %v2223_v19, %v2224_v28  ;;  %v6755_v9 = vld [vmem:[#allocation9_spill] sm:$0xff] }
 0x3d4   : > { %v2675_v6 = vpop.f32.mrf.mxu0  ;;  %v2724_v43 = vpop.f32.mrf.mxu1  ;;  %2257 = vmax.xlane.f32.xlu0 %v2256_v56 }
 0x3d5   : > { %v2137_v48 = vpop.f32.mrf.mxu2  ;;  %v2186_v22 = vpop.f32.mrf.mxu3  ;;  %v2676_v44 = vadd.f32 %v2675_v6, %v6754_v46  ;;  %v2725_v63 = vadd.f32 %v2724_v43, %v6754_v46 }
 0x3d6   : > { %v2138_v27 = vadd.f32 %v2137_v48, %v6751_v34  ;;  %v2187_v25 = vadd.f32 %v2186_v22, %v6751_v34  ;;  %v1927_v38 = vpop.xlane.xlu1 %1926 }
 0x3d7   : > { %4034 = vmatmul.msk.bf16.gmra.mxu0 %vm549_vm1, %v6752_v17  ;;  %4042 = vmatmul.msk.bf16.gmra.mxu1 %vm549_vm1, %v6752_v17  ;;  %v3509_v15 = vperm.slane %v1927_v38, %v6753_v29  ;;  %v2761_v28 = vmax.f32 %v2676_v44, 0.0  ;;  %v2762_v22 = vmax.f32 %v2725_v63, 0.0 }
 0x3d8   : > { %v2225_v50 = vmax.f32 %v2138_v27, 0.0  ;;  %v2226_v39 = vmax.f32 %v2187_v25, 0.0  ;;  %v6757_v25 = vld [vmem:[#allocation32_spill] sm:$0xff] }
 0x3d9   : > { %v3510_v49 = vsel %vm3341_vm4, %v3509_v15, %v3508_v53 }
 0x3da   : > { %v2259_v32 = vmax.f32 %v2225_v50, %v2226_v39  ;;  %v6758_v50 = vld [vmem:[#allocation39_spill] sm:$0xff] }
 0x3dc   : > { %v2677_v5 = vpop.f32.mrf.mxu0  ;;  %v2726_v8 = vpop.f32.mrf.mxu1  ;;  %2260 = vmax.xlane.f32.xlu1 %v2259_v32 }
 0x3dd   : > { %v2678_v45 = vadd.f32 %v2677_v5, %v6755_v9  ;;  %v2727_v58 = vadd.f32 %v2726_v8, %v6755_v9  ;;  %v2139_v40 = vpop.f32.mrf.mxu2  ;;  %v2188_v19 = vpop.f32.mrf.mxu3 }
 0x3de   : > { %v2140_v56 = vadd.f32 %v2139_v40, %v6756_v13  ;;  %v2189_v48 = vadd.f32 %v2188_v19, %v6756_v13  ;;  %v1930_v53 = vpop.xlane.xlu2 %1929 }
 0x3df   : > { %v2763_v6 = vmax.f32 %v2678_v45, 0.0  ;;  %v2764_v27 = vmax.f32 %v2727_v58, 0.0  ;;  %v3511_v43 = vperm.slane %v1930_v53, %v6757_v25  ;;  %v6759_v58 = vld [vmem:[#allocation16_spill] sm:$0xff] }
 0x3e0   : > { %v2227_v38 = vmax.f32 %v2140_v56, 0.0  ;;  %v2228_v17 = vmax.f32 %v2189_v48, 0.0  ;;  %v6760_v56 = vld [vmem:[#allocation41_spill] sm:$0xff] }
 0x3e1   : > { %v3512_v15 = vsel %vm3345_vm5, %v3511_v43, %v3510_v49  ;;  %2478 = vmatmul.bf16.gmra.mxu2 %v6758_v50  ;;  %2527 = vmatmul.bf16.gmra.mxu3 %v6758_v50  ;;  %v5874_v39 = vpack.c.bf16 %v2763_v6, %v2761_v28  ;;  %v5876_v44 = vpack.c.bf16 %v2764_v27, %v2762_v22  ;;  %v6761_v28 = vld [vmem:[#allocation34_spill] sm:$0xff] }
 0x3e2   : > { %v2262_v32 = vmax.f32 %v2227_v38, %v2228_v17 }
 0x3e4   : > { %v5878_v5 = vpop.f32.mrf.mxu0  ;;  %v5880_v63 = vpop.f32.mrf.mxu1  ;;  %2263 = vmax.xlane.f32.xlu2 %v2262_v32  ;;  %v6762_v32 = vld [vmem:[#allocation17_spill] sm:$0xff] }
 0x3e5   : > { %v2142_v8 = vpop.f32.mrf.mxu2  ;;  %v2191_v45 = vpop.f32.mrf.mxu3 }
 0x3e6   : > { %v2143_v40 = vadd.f32 %v2142_v8, %v6759_v58  ;;  %v2192_v49 = vadd.f32 %v2191_v45, %v6759_v58  ;;  %v1933_v19 = vpop.xlane.xlu0 %1932 }
 0x3e7   : > { %4035 = vmatmul.msk.bf16.gmra.mxu0 %vm549_vm1, %v6760_v56  ;;  %4043 = vmatmul.msk.bf16.gmra.mxu1 %vm549_vm1, %v6760_v56  ;;  %v3513_v48 = vperm.slane %v1933_v19, %v6761_v28  ;;  %v6763_v56 = vld [vmem:[#allocation36_spill] sm:$0xff] }
 0x3e8   : > { %v2229_v53 = vmax.f32 %v2143_v40, 0.0  ;;  %v2230_v22 = vmax.f32 %v2192_v49, 0.0  ;;  %v6767_v28 = vld [vmem:[#allocation20_spill] sm:$0xff] }
 0x3e9   : > { %v3514_v6 = vsel %vm3349_vm6, %v3513_v48, %v3512_v15  ;;  %v6764_v15 = vld [vmem:[#allocation43_spill] sm:$0xff] }
 0x3ea   : > { %v2265_v27 = vmax.f32 %v2229_v53, %v2230_v22 }
 0x3ec   : > { %v5890_v43 = vpop.f32.mrf.mxu0  ;;  %v5892_v38 = vpop.f32.mrf.mxu1  ;;  %2266 = vmax.xlane.f32.xlu0 %v2265_v27 }
 0x3ed   : > { %v2144_v17 = vpop.f32.mrf.mxu2  ;;  %v2193_v50 = vpop.f32.mrf.mxu3 }
 0x3ee   : > { %v2145_v8 = vadd.f32 %v2144_v17, %v6762_v32  ;;  %v2194_v45 = vadd.f32 %v2193_v50, %v6762_v32  ;;  %v1936_v58 = vpop.xlane.xlu1 %1935  ;;  %v6765_v50 = vld [vmem:[#allocation18_spill] sm:$0xff] }
 0x3ef   : > { %v3515_v25 = vperm.slane %v1936_v58, %v6763_v56 }
 0x3f0   : > { %v2231_v19 = vmax.f32 %v2145_v8, 0.0  ;;  %v2232_v40 = vmax.f32 %v2194_v45, 0.0 }
 0x3f1   : > { %v3516_v49 = vsel %vm3353_vm7, %v3515_v25, %v3514_v6  ;;  %2483 = vmatmul.bf16.gmra.mxu2 %v6764_v15  ;;  %2532 = vmatmul.bf16.gmra.mxu3 %v6764_v15  ;;  %v4160_v25 = vld [vmem:[%s6428_s1 + $0x28] sm:$0xff]  ;;  %v6766_v6 = vld [vmem:[#allocation38_spill] sm:$0xff] }
 0x3f2   : > { %v2268_v48 = vmax.f32 %v2231_v19, %v2232_v40 }
 0x3f4   : > { %v5900_v53 = vpop.f32.mrf.mxu0  ;;  %v5902_v22 = vpop.f32.mrf.mxu1  ;;  %2269 = vmax.xlane.f32.xlu1 %v2268_v48 }
 0x3f5   : > { %v2147_v27 = vpop.f32.mrf.mxu2  ;;  %v2196_v17 = vpop.f32.mrf.mxu3 }
 0x3f6   : > { %v2148_v32 = vadd.f32 %v2147_v27, %v6765_v50  ;;  %v2197_v58 = vadd.f32 %v2196_v17, %v6765_v50  ;;  %v1939_v8 = vpop.xlane.xlu2 %1938 }
 0x3f7   : > { %4036 = vmatmul.msk.bf16.gmra.mxu0 %vm549_vm1, %v4160_v25  ;;  %4044 = vmatmul.msk.bf16.gmra.mxu1 %vm549_vm1, %v4160_v25  ;;  %v3517_v45 = vperm.slane %v1939_v8, %v6766_v6  ;;  %v6768_v25 = vld [vmem:[#allocation19_spill] sm:$0xff] }
 0x3f8   : > { %v2233_v19 = vmax.f32 %v2148_v32, 0.0  ;;  %v2234_v40 = vmax.f32 %v2197_v58, 0.0 }
 0x3f9   : > { %v3518_v15 = vsel %vm3357_vm8, %v3517_v45, %v3516_v49  ;;  %v6769_v49 = vld [vmem:[#allocation25_spill] sm:$0xff] }
 0x3fa   : > { %v2271_v48 = vmax.f32 %v2233_v19, %v2234_v40 }
 0x3fc   : > { %v5913_v56 = vpop.f32.mrf.mxu0  ;;  %v5915_v27 = vpop.f32.mrf.mxu1  ;;  %2272 = vmax.xlane.f32.xlu2 %v2271_v48 }
 0x3fd   : > { %v2149_v17 = vpop.f32.mrf.mxu2  ;;  %v2198_v50 = vpop.f32.mrf.mxu3 }
 0x3fe   : > { %v2150_v13 = vadd.f32 %v2149_v17, %v6767_v28  ;;  %v2199_v9 = vadd.f32 %v2198_v50, %v6767_v28  ;;  %v1942_v46 = vpop.xlane.xlu0 %1941  ;;  %v6770_v17 = vld [vmem:[#allocation21_spill] sm:$0xff] }
 0x3ff   : > { %v3519_v29 = vperm.slane %v1942_v46, %v6768_v25  ;;  %v4161_v46 = vld [vmem:[%s6428_s1 + $0x30] sm:$0xff] }
 0x400   : > { %v2235_v8 = vmax.f32 %v2150_v13, 0.0  ;;  %v2236_v32 = vmax.f32 %v2199_v9, 0.0 }
 0x401   : > { %v3520_v58 = vsel %vm3361_vm9, %v3519_v29, %v3518_v15  ;;  %2488 = vmatmul.bf16.gmra.mxu2 %v6769_v49  ;;  %2537 = vmatmul.bf16.gmra.mxu3 %v6769_v49  ;;  %v6771_v29 = vld [vmem:[#allocation40_spill] sm:$0xff] }
 0x402   : > { %v2274_v45 = vmax.f32 %v2235_v8, %v2236_v32 }
 0x404   : > { %v2690_v19 = vpop.f32.mrf.mxu0  ;;  %v2739_v40 = vpop.f32.mrf.mxu1  ;;  %2275 = vmax.xlane.f32.xlu0 %v2274_v45 }
 0x405   : > { %v2152_v48 = vpop.f32.mrf.mxu2  ;;  %v2201_v6 = vpop.f32.mrf.mxu3 }
 0x406   : > { %v2153_v34 = vadd.f32 %v2152_v48, %v6770_v17  ;;  %v2202_v50 = vadd.f32 %v2201_v6, %v6770_v17  ;;  %v1945_v28 = vpop.xlane.xlu1 %1944  ;;  %v6772_v17 = vld [vmem:[#allocation23_spill] sm:$0xff] }
 0x407   : > { %4037 = vmatmul.msk.bf16.gmra.mxu0 %vm549_vm1, %v4161_v46  ;;  %4045 = vmatmul.msk.bf16.gmra.mxu1 %vm549_vm1, %v4161_v46  ;;  %v3521_v9 = vperm.slane %v1945_v28, %v6771_v29  ;;  %v6774_v28 = vld [vmem:[#allocation29_spill] sm:$0xff]  ;;  %v6778_v29 = vld [vmem:[#allocation8_spill] sm:$0xff] }
 0x408   : > { %v2237_v13 = vmax.f32 %v2153_v34, 0.0  ;;  %v2238_v15 = vmax.f32 %v2202_v50, 0.0 }
 0x409   : > { %v3522_v8 = vsel %vm3365_vm10, %v3521_v9, %v3520_v58 }
 0x40a   : > { %v2277_v32 = vmax.f32 %v2237_v13, %v2238_v15 }
 0x40c   : > { %v2692_v49 = vpop.f32.mrf.mxu0  ;;  %v2741_v45 = vpop.f32.mrf.mxu1  ;;  %2278 = vmax.xlane.f32.xlu1 %v2277_v32  ;;  %v6775_v32 = vld [vmem:[#allocation24_spill] sm:$0xff] }
 0x40d   : > { %v2154_v6 = vpop.f32.mrf.mxu2  ;;  %v2203_v48 = vpop.f32.mrf.mxu3 }
 0x40e   : > { %v2155_v25 = vadd.f32 %v2154_v6, %v6772_v17  ;;  %v2204_v20 = vadd.f32 %v2203_v48, %v6772_v17  ;;  %v1948_v12 = vpop.xlane.xlu2 %1947 }
 0x40f   : > { %v3523_v42 = vperm.slane %v1948_v12, %v6773_v36  ;;  %v4162_v12 = vld [vmem:[%s6428_s1 + $0x38] sm:$0xff] }
 0x410   : > { %v2239_v46 = vmax.f32 %v2155_v25, 0.0  ;;  %v2240_v35 = vmax.f32 %v2204_v20, 0.0 }
 0x411   : > { %v3524_v34 = vsel %vm3369_vm11, %v3523_v42, %v3522_v8  ;;  %2493 = vmatmul.bf16.gmra.mxu2 %v6774_v28  ;;  %2542 = vmatmul.bf16.gmra.mxu3 %v6774_v28  ;;  %v6776_v42 = vld [vmem:[#allocation42_spill] sm:$0xff]  ;;  %v6777_v28 = vld [vmem:[#allocation5_spill] sm:$0xff] }
 0x412   : > { %v2280_v58 = vmax.f32 %v2239_v46, %v2240_v35 }
 0x414   : > { %v2695_v50 = vpop.f32.mrf.mxu0  ;;  %v2744_v9 = vpop.f32.mrf.mxu1  ;;  %2281 = vmax.xlane.f32.xlu2 %v2280_v58 }
 0x415   : > { %v2157_v13 = vpop.f32.mrf.mxu2  ;;  %v2206_v15 = vpop.f32.mrf.mxu3  ;;  %v2696_v58 = vadd.f32 %v2695_v50, %v6777_v28  ;;  %v2691_v50 = vadd.f32 %v2690_v19, %v4509_v55 }
 0x416   : > { %v2158_v6 = vadd.f32 %v2157_v13, %v6775_v32  ;;  %v2207_v48 = vadd.f32 %v2206_v15, %v6775_v32  ;;  %v1951_v17 = vpop.xlane.xlu0 %1950  ;;  %v2745_v13 = vadd.f32 %v2744_v9, %v6777_v28  ;;  %v5951_v15 = vadd.f32 %v5913_v56, %v4507_v54 }
 0x417   : > { %4038 = vmatmul.msk.bf16.gmra.mxu0 %vm549_vm1, %v4162_v12  ;;  %4046 = vmatmul.msk.bf16.gmra.mxu1 %vm549_vm1, %v4162_v12  ;;  %v3525_v35 = vperm.slane %v1951_v17, %v6776_v42  ;;  %v2693_v12 = vadd.f32 %v2692_v49, %v6778_v29  ;;  %v2742_v17 = vadd.f32 %v2741_v45, %v6778_v29  ;;  %v2777_v28 = vmax.f32 %v2696_v58, 0.0 }
 0x418   : > { %v2241_v20 = vmax.f32 %v2158_v6, 0.0  ;;  %v2242_v25 = vmax.f32 %v2207_v48, 0.0  ;;  %v6779_v6 = vld [vmem:[#allocation6_spill] sm:$0xff]  ;;  %v2740_v9 = vadd.f32 %v2739_v40, %v4509_v55  ;;  %v2737_v45 = vadd.f32 %v5915_v27, %v4507_v54 }
 0x419   : > { %v3526_v8 = vsel %vm3373_vm12, %v3525_v35, %v3524_v34  ;;  %v2775_v29 = vmax.f32 %v2693_v12, 0.0  ;;  %v2776_v19 = vmax.f32 %v2742_v17, 0.0  ;;  %v2735_v27 = vadd.f32 %v5902_v22, %v4496_v51 }
 0x41a   : > { %v2283_v46 = vmax.f32 %v2241_v20, %v2242_v25  ;;  %v2772_v12 = vmax.f32 %v2737_v45, 0.0  ;;  %vm6780_vm1 = vcmask 917312  }
 0x41c   : > { %v2697_v32 = vpop.f32.mrf.mxu0  ;;  %v2746_v36 = vpop.f32.mrf.mxu1  ;;  %2284 = vmax.xlane.f32.xlu0 %v2283_v46  ;;  %v2778_v46 = vmax.f32 %v2745_v13, 0.0 }
 0x41d   : > { %v2698_v48 = vadd.f32 %v2697_v32, %v6779_v6  ;;  %v2747_v34 = vadd.f32 %v2746_v36, %v6779_v6  ;;  %v2159_v35 = vpop.f32.mrf.mxu2  ;;  %v2208_v20 = vpop.f32.mrf.mxu3 }
 0x41e   : > { %v2160_v56 = vadd.f32 %v2159_v35, %v4954_v14  ;;  %v2209_v25 = vadd.f32 %v2208_v20, %v4954_v14  ;;  %v2774_v35 = vmax.f32 %v2740_v9, 0.0  ;;  %v2770_v9 = vmax.f32 %v2735_v27, 0.0 }
 0x41f   : > { %v2779_v42 = vmax.f32 %v2698_v48, 0.0  ;;  %v2780_v49 = vmax.f32 %v2747_v34, 0.0  ;;  %v1954_v41 = vpop.xlane.xlu1 %1953  ;;  %v2686_v48 = vadd.f32 %v5900_v53, %v4496_v51  ;;  %v2773_v34 = vmax.f32 %v2691_v50, 0.0 }
 0x420   : > { %v2243_v32 = vmax.f32 %v2160_v56, 0.0  ;;  %v2244_v36 = vmax.f32 %v2209_v25, 0.0  ;;  %v3527_v6 = vperm.slane %v1954_v41, %v5246_v33  ;;  %v2683_v41 = vadd.f32 %v5890_v43, %v4538_v3 }
 0x421   : > { %v2795_v47 = vpack.c.bf16 %v2779_v42, %v2777_v28  ;;  %v2796_v40 = vpack.c.bf16 %v2780_v49, %v2778_v46  ;;  %2498 = vmatmul.bf16.gmra.mxu2 %v5753_v62  ;;  %2547 = vmatmul.bf16.gmra.mxu3 %v5753_v62  ;;  %v2732_v42 = vadd.f32 %v5892_v38, %v4538_v3  ;;  %v2769_v50 = vmax.f32 %v2686_v48, 0.0 }
 0x422   : > { %v3528_v58 = vsel %vm3377_vm13, %v3527_v6, %v3526_v8  ;;  %v2286_v13 = vmax.f32 %v2243_v32, %v2244_v36  ;;  %v2771_v8 = vmax.f32 %v5951_v15, 0.0  ;;  %v2793_v53 = vpack.c.bf16 %v2775_v29, %v2773_v34 }
 0x423   : > { %2797 = vmatpush.bf16.msra.mxu2 %v2795_v47  ;;  %2846 = vmatpush.bf16.msra.mxu3 %v2796_v40  ;;  %v2794_v17 = vpack.c.bf16 %v2776_v19, %v2774_v35  ;;  %v2681_v43 = vadd.f32 %v5878_v5, %v4527_v60  ;;  %v2730_v38 = vadd.f32 %v5880_v63, %v4527_v60  ;;  %v2767_v46 = vmax.f32 %v2683_v41, 0.0 }
 0x424   : > { %v2997_v62 = vpop.f32.mrf.mxu0  ;;  %v3046_v28 = vpop.f32.mrf.mxu1  ;;  %2287 = vmax.xlane.f32.xlu1 %v2286_v13  ;;  %v2768_v49 = vmax.f32 %v2732_v42, 0.0  ;;  %v2791_v45 = vpack.c.bf16 %v2771_v8, %v2769_v50  ;;  %v2792_v32 = vpack.c.bf16 %v2772_v12, %v2770_v9 }
 0x425   : > { %v2162_v6 = vpop.f32.mrf.mxu2  ;;  %v2211_v22 = vpop.f32.mrf.mxu3  ;;  %v2765_v5 = vmax.f32 %v2681_v43, 0.0  ;;  %v2766_v40 = vmax.f32 %v2730_v38, 0.0  ;;  %v2998_v63 = vadd.f32 %v2997_v62, %v4546_v7  ;;  %v3047_v13 = vadd.f32 %v3046_v28, %v4546_v7 }
 0x426   : > { %v2163_v20 = vadd.f32 %v2162_v6, %v4972_v18  ;;  %v2212_v47 = vadd.f32 %v2211_v22, %v4972_v18 }
 0x427   : > { %2798 = vmatpush.bf16.msra.mxu2 %v2793_v53  ;;  %2847 = vmatpush.bf16.msra.mxu3 %v2794_v17  ;;  %v1957_v15 = vpop.xlane.xlu2 %1956  ;;  %v2789_v34 = vpack.c.bf16 %v2767_v46, %v2765_v5  ;;  %v2790_v35 = vpack.c.bf16 %v2768_v49, %v2766_v40  ;;  %v3086_v62 = vmax.f32 %v2998_v63, 0.0  ;;  %v3087_v17 = vmax.f32 %v3047_v13, 0.0 }
 0x428   : > { %v2245_v56 = vmax.f32 %v2163_v20, 0.0  ;;  %v2246_v29 = vmax.f32 %v2212_v47, 0.0  ;;  %v3529_v25 = vperm.slane %v1957_v15, %v5278_v10 }
 0x42a   : > { %v3530_v36 = vsel %vm6780_vm1, %v3529_v25, %v3528_v58  ;;  %v2289_v19 = vmax.f32 %v2245_v56, %v2246_v29  ;;  %vm3732_vm1 = vcmask 1042432  }
 0x42b   : > { %2799 = vmatpush.bf16.msra.mxu2 %v2791_v45  ;;  %2848 = vmatpush.bf16.msra.mxu3 %v2792_v32 }
 0x42c   : > { %v2999_v48 = vpop.f32.mrf.mxu0  ;;  %v3048_v27 = vpop.f32.mrf.mxu1  ;;  %2290 = vmax.xlane.f32.xlu2 %v2289_v19 }
 0x42d   : > { %v3000_v41 = vadd.f32 %v2999_v48, %v4552_v11  ;;  %v3049_v42 = vadd.f32 %v3048_v27, %v4552_v11  ;;  %v2164_v8 = vpop.f32.mrf.mxu2  ;;  %v2213_v58 = vpop.f32.mrf.mxu3 }
 0x42e   : > { %v2165_v12 = vadd.f32 %v2164_v8, %v4997_v16  ;;  %v2214_v53 = vadd.f32 %v2213_v58, %v4997_v16 }
 0x42f   : > { %v3088_v7 = vmax.f32 %v3000_v41, 0.0  ;;  %v3089_v28 = vmax.f32 %v3049_v42, 0.0  ;;  %2800 = vmatpush.bf16.msra.mxu2 %v2789_v34  ;;  %2849 = vmatpush.bf16.msra.mxu3 %v2790_v35  ;;  %v1960_v6 = vpop.xlane.xlu0 %1959 }
 0x430   : > { %v2247_v22 = vmax.f32 %v2165_v12, 0.0  ;;  %v2248_v20 = vmax.f32 %v2214_v53, 0.0  ;;  %v3531_v47 = vperm.slane %v1960_v6, %v5296_v21  ;;  %v6783_v6 = vld [vmem:[#allocation26_spill] sm:$0xff] }
 0x431   : > { %v5991_v43 = vpack.c.bf16 %v3088_v7, %v3086_v62  ;;  %v5993_v11 = vpack.c.bf16 %v3089_v28, %v3087_v17  ;;  %2503 = vmatmul.bf16.gmra.mxu2 %v5789_v0  ;;  %2552 = vmatmul.bf16.gmra.mxu3 %v5789_v0 }
 0x432   : > { %v3532_v38 = vsel %vm6781_vm14, %v3531_v47, %v3530_v36  ;;  %v2292_v50 = vmax.f32 %v2247_v22, %v2248_v20  ;;  %vm6816_vm14 = vcmask 917312  }
 0x433   : > { %2801 = vmatpush.bf16.msra.mxu2 %v5874_v39  ;;  %2850 = vmatpush.bf16.msra.mxu3 %v5876_v44 }
 0x434   : > { %v3002_v9 = vpop.f32.mrf.mxu0  ;;  %v3051_v15 = vpop.f32.mrf.mxu1  ;;  %2293 = vmax.xlane.f32.xlu0 %v2292_v50 }
 0x435   : > { %v2167_v56 = vpop.f32.mrf.mxu2  ;;  %v2216_v29 = vpop.f32.mrf.mxu3  ;;  %v3003_v36 = vadd.f32 %v3002_v9, %v4544_v4  ;;  %v3052_v19 = vadd.f32 %v3051_v15, %v4544_v4  ;;  %v6785_v15 = vld [vmem:[#allocation11_spill] sm:$0xff] }
 0x436   : > { %v2168_v25 = vadd.f32 %v2167_v56, %v5011_v30  ;;  %v2217_v46 = vadd.f32 %v2216_v29, %v5011_v30 }
 0x437   : > { %2802 = vmatpush.bf16.msra.mxu2 %v5852_v23  ;;  %2851 = vmatpush.bf16.msra.mxu3 %v5854_v59  ;;  %v1963_v0 = vpop.xlane.xlu1 %1962  ;;  %v3090_v34 = vmax.f32 %v3003_v36, 0.0 }
 0x438   : > { %v2249_v49 = vmax.f32 %v2168_v25, 0.0  ;;  %v2250_v45 = vmax.f32 %v2217_v46, 0.0  ;;  %v3533_v39 = vperm.slane %v1963_v0, %v5318_v37  ;;  %v6786_v0 = vld [vmem:[#allocation10_spill] sm:$0xff] }
 0x43a   : > { %v3534_v44 = vsel %vm3389_vm15, %v3533_v39, %v3532_v38  ;;  %v2295_v32 = vmax.f32 %v2249_v49, %v2250_v45  ;;  %v6784_v38 = vld [vmem:[#allocation27_spill] sm:$0xff] }
 0x43b   : > { %v6009_v5 = vsel %vm3732_vm1, %v5810_v52, %v3534_v44  ;;  %2803 = vmatpush.bf16.msra.mxu2 %v5829_v61  ;;  %2852 = vmatpush.bf16.msra.mxu3 %v5831_v31  ;;  %v3091_v52 = vmax.f32 %v3052_v19, 0.0  ;;  %vm6817_vm1 = vcmask 982912  }
 0x43c   : > { %v3004_v23 = vpop.f32.mrf.mxu0  ;;  %v3053_v59 = vpop.f32.mrf.mxu1  ;;  %2296 = vmax.xlane.f32.xlu1 %v2295_v32  ;;  %v6787_v32 = vld [vmem:[#allocation13_spill] sm:$0xff] }
 0x43d   : > { %v3005_v40 = vadd.f32 %v3004_v23, %v4564_v24  ;;  %v3054_v63 = vadd.f32 %v3053_v59, %v4564_v24  ;;  %v2169_v13 = vpop.f32.mrf.mxu2  ;;  %v2218_v48 = vpop.f32.mrf.mxu3 }
 0x43e   : > { %v2170_v27 = vadd.f32 %v2169_v13, %v5028_v26  ;;  %v2219_v4 = vadd.f32 %v2218_v48, %v5028_v26 }
 0x43f   : > { %v3092_v35 = vmax.f32 %v3005_v40, 0.0  ;;  %v3093_v41 = vmax.f32 %v3054_v63, 0.0  ;;  %2804 = vmatpush.bf16.msra.mxu2 %v5793_v2  ;;  %2853 = vmatpush.bf16.msra.mxu3 %v5795_v1  ;;  %v2255_v58 = vpop.xlane.xlu2 %2254  ;;  %v6782_v2 = vld [vmem:[#allocation12_spill] sm:$0xff] }
 0x440   : > { %v2251_v61 = vmax.f32 %v2170_v27, 0.0  ;;  %v2252_v31 = vmax.f32 %v2219_v4, 0.0  ;;  %v3552_v22 = vperm.slane %v2255_v58, %v6783_v6  ;;  %v6788_v4 = vld [vmem:[#allocation28_spill] sm:$0xff] }
 0x441   : > { %v6019_v42 = vpack.c.bf16 %v3092_v35, %v3090_v34  ;;  %v6021_v8 = vpack.c.bf16 %v3093_v41, %v3091_v52 }
 0x442   : > { %2805 = vmatmul.bf16.vlgmr.msra.gmra.mxu2 %v5825_v57  ;;  %2854 = vmatmul.bf16.vlgmr.msra.gmra.mxu3 %v5825_v57  ;;  %v2298_v24 = vmax.f32 %v2251_v61, %v2252_v31  ;;  %v6045_v61 = vld [vmem:[%s6430_s3 + $0x8] sm:$0xff] }
 0x444   : > { %v3007_v12 = vpop.f32.mrf.mxu0  ;;  %v3056_v53 = vpop.f32.mrf.mxu1  ;;  %2299 = vmax.xlane.f32.xlu2 %v2298_v24 }
 0x445   : > { %v2469_v62 = vpop.f32.mrf.mxu2  ;;  %v2518_v17 = vpop.f32.mrf.mxu3  ;;  %v3008_v56 = vadd.f32 %v3007_v12, %v6785_v15  ;;  %v3057_v29 = vadd.f32 %v3056_v53, %v6785_v15 }
 0x446   : > { %v2470_v7 = vadd.f32 %v2469_v62, %v6782_v2  ;;  %v2519_v1 = vadd.f32 %v2518_v17, %v6782_v2  ;;  %v6789_v62 = vld [vmem:[#allocation14_spill] sm:$0xff] }
 0x447   : > { %v2258_v28 = vpop.xlane.xlu0 %2257  ;;  %v3094_v23 = vmax.f32 %v3008_v56, 0.0  ;;  %v3095_v59 = vmax.f32 %v3057_v29, 0.0 }
 0x448   : > { %v2558_v20 = vmax.f32 %v2470_v7, 0.0  ;;  %v2559_v47 = vmax.f32 %v2519_v1, 0.0  ;;  %v3553_v50 = vperm.slane %v2258_v28, %v6784_v38 }
 0x44a   : > { %v3554_v57 = vsel %vm3333_vm2, %v3553_v50, %v3552_v22  ;;  %v2590_v9 = vmax.f32 %v2558_v20, %v2559_v47  ;;  %v6790_v20 = vld [vmem:[#allocation30_spill] sm:$0xff] }
 0x44c   : > { %v3009_v25 = vpop.f32.mrf.mxu0  ;;  %v3058_v46 = vpop.f32.mrf.mxu1  ;;  %2591 = vmax.xlane.f32.xlu0 %v2590_v9  ;;  %v6791_v9 = vld [vmem:[#allocation7_spill] sm:$0xff] }
 0x44d   : > { %v3010_v49 = vadd.f32 %v3009_v25, %v6786_v0  ;;  %v3059_v45 = vadd.f32 %v3058_v46, %v6786_v0  ;;  %v2471_v39 = vpop.f32.mrf.mxu2  ;;  %v2520_v44 = vpop.f32.mrf.mxu3  ;;  %v6792_v46 = vld [vmem:[#allocation9_spill] sm:$0xff] }
 0x44e   : > { %v2472_v36 = vadd.f32 %v2471_v39, %v6787_v32  ;;  %v2521_v19 = vadd.f32 %v2520_v44, %v6787_v32  ;;  %v6793_v44 = vld [vmem:[#allocation15_spill] sm:$0xff] }
 0x44f   : > { %v3096_v40 = vmax.f32 %v3010_v49, 0.0  ;;  %v3097_v63 = vmax.f32 %v3059_v45, 0.0  ;;  %v2261_v13 = vpop.xlane.xlu1 %2260 }
 0x450   : > { %v2560_v48 = vmax.f32 %v2472_v36, 0.0  ;;  %v2561_v27 = vmax.f32 %v2521_v19, 0.0  ;;  %v3555_v34 = vperm.slane %v2261_v13, %v6788_v4 }
 0x451   : > { %v6037_v52 = vpack.c.bf16 %v3096_v40, %v3094_v23  ;;  %v6039_v35 = vpack.c.bf16 %v3097_v63, %v3095_v59 }
 0x452   : > { %v3556_v41 = vsel %vm3337_vm3, %v3555_v34, %v3554_v57  ;;  %2810 = vmatmul.bf16.gmra.mxu2 %v6045_v61  ;;  %2859 = vmatmul.bf16.gmra.mxu3 %v6045_v61  ;;  %v2593_v31 = vmax.f32 %v2560_v48, %v2561_v27  ;;  %v6794_v34 = vld [vmem:[#allocation32_spill] sm:$0xff] }
 0x454   : > { %v3012_v24 = vpop.f32.mrf.mxu0  ;;  %v3061_v58 = vpop.f32.mrf.mxu1  ;;  %2594 = vmax.xlane.f32.xlu1 %v2593_v31 }
 0x455   : > { %v2474_v12 = vpop.f32.mrf.mxu2  ;;  %v2523_v53 = vpop.f32.mrf.mxu3  ;;  %v3013_v15 = vadd.f32 %v3012_v24, %v6791_v9  ;;  %v3062_v56 = vadd.f32 %v3061_v58, %v6791_v9 }
 0x456   : > { %v2475_v17 = vadd.f32 %v2474_v12, %v6789_v62  ;;  %v2524_v7 = vadd.f32 %v2523_v53, %v6789_v62  ;;  %v6068_v12 = vld [vmem:[%s6430_s3 + $0x10] sm:$0xff] }
 0x457   : > { %v2264_v1 = vpop.xlane.xlu2 %2263  ;;  %v3098_v23 = vmax.f32 %v3013_v15, 0.0  ;;  %v3099_v59 = vmax.f32 %v3062_v56, 0.0  ;;  %6795 = vst [vmem:[#allocation31_spill] sm:$0xff] %v6068_v12  ;;  %v6797_v56 = vld [vmem:[#allocation34_spill] sm:$0xff] }
 0x458   : > { %v2562_v28 = vmax.f32 %v2475_v17, 0.0  ;;  %v2563_v22 = vmax.f32 %v2524_v7, 0.0  ;;  %v3557_v47 = vperm.slane %v2264_v1, %v6790_v20 }
 0x45a   : > { %v3558_v50 = vsel %vm3341_vm4, %v3557_v47, %v3556_v41  ;;  %v2596_v57 = vmax.f32 %v2562_v28, %v2563_v22  ;;  %v6796_v22 = vld [vmem:[#allocation16_spill] sm:$0xff] }
 0x45c   : > { %v3014_v29 = vpop.f32.mrf.mxu0  ;;  %v3063_v25 = vpop.f32.mrf.mxu1  ;;  %2597 = vmax.xlane.f32.xlu2 %v2596_v57 }
 0x45d   : > { %v3015_v0 = vadd.f32 %v3014_v29, %v6792_v46  ;;  %v3064_v49 = vadd.f32 %v3063_v25, %v6792_v46  ;;  %v2476_v45 = vpop.f32.mrf.mxu2  ;;  %v2525_v39 = vpop.f32.mrf.mxu3 }
 0x45e   : > { %v2477_v36 = vadd.f32 %v2476_v45, %v6793_v44  ;;  %v2526_v19 = vadd.f32 %v2525_v39, %v6793_v44 }
 0x45f   : > { %v3100_v40 = vmax.f32 %v3015_v0, 0.0  ;;  %v3101_v63 = vmax.f32 %v3064_v49, 0.0  ;;  %v2267_v13 = vpop.xlane.xlu0 %2266 }
 0x460   : > { %v2564_v48 = vmax.f32 %v2477_v36, 0.0  ;;  %v2565_v27 = vmax.f32 %v2526_v19, 0.0  ;;  %v3559_v41 = vperm.slane %v2267_v13, %v6794_v34  ;;  %v6798_v36 = vld [vmem:[#allocation17_spill] sm:$0xff]  ;;  %v6799_v13 = vld [vmem:[#allocation36_spill] sm:$0xff] }
 0x461   : > { %v6060_v31 = vpack.c.bf16 %v3100_v40, %v3098_v23  ;;  %v6062_v24 = vpack.c.bf16 %v3101_v63, %v3099_v59  ;;  %v6813_v34 = vld [vmem:[#allocation5_spill] sm:$0xff] }
 0x462   : > { %v3560_v58 = vsel %vm3345_vm5, %v3559_v41, %v3558_v50  ;;  %2815 = vmatmul.bf16.gmra.mxu2 %v6068_v12  ;;  %2864 = vmatmul.bf16.gmra.mxu3 %v6068_v12  ;;  %v2599_v53 = vmax.f32 %v2564_v48, %v2565_v27  ;;  %v6091_v41 = vld [vmem:[%s6430_s3 + $0x18] sm:$0xff] }
 0x463   : > { %6800 = vst [vmem:[#allocation33_spill] sm:$0xff] %v6091_v41 }
 0x464   : > { %v6072_v17 = vpop.f32.mrf.mxu0  ;;  %v6074_v7 = vpop.f32.mrf.mxu1  ;;  %2600 = vmax.xlane.f32.xlu0 %v2599_v53 }
 0x465   : > { %v2479_v1 = vpop.f32.mrf.mxu2  ;;  %v2528_v28 = vpop.f32.mrf.mxu3 }
 0x466   : > { %v2480_v47 = vadd.f32 %v2479_v1, %v6796_v22  ;;  %v2529_v50 = vadd.f32 %v2528_v28, %v6796_v22 }
 0x467   : > { %v2270_v57 = vpop.xlane.xlu1 %2269 }
 0x468   : > { %v2566_v9 = vmax.f32 %v2480_v47, 0.0  ;;  %v2567_v15 = vmax.f32 %v2529_v50, 0.0  ;;  %v3561_v29 = vperm.slane %v2270_v57, %v6797_v56  ;;  %v6801_v50 = vld [vmem:[#allocation18_spill] sm:$0xff] }
 0x46a   : > { %v3562_v25 = vsel %vm3349_vm6, %v3561_v29, %v3560_v58  ;;  %v2602_v46 = vmax.f32 %v2566_v9, %v2567_v15 }
 0x46c   : > { %v6080_v0 = vpop.f32.mrf.mxu0  ;;  %v6082_v49 = vpop.f32.mrf.mxu1  ;;  %2603 = vmax.xlane.f32.xlu1 %v2602_v46  ;;  %v6802_v46 = vld [vmem:[#allocation38_spill] sm:$0xff] }
 0x46d   : > { %v2481_v45 = vpop.f32.mrf.mxu2  ;;  %v2530_v39 = vpop.f32.mrf.mxu3 }
 0x46e   : > { %v2482_v19 = vadd.f32 %v2481_v45, %v6798_v36  ;;  %v2531_v23 = vadd.f32 %v2530_v39, %v6798_v36 }
 0x46f   : > { %v2273_v59 = vpop.xlane.xlu2 %2272 }
 0x470   : > { %v2568_v40 = vmax.f32 %v2482_v19, 0.0  ;;  %v2569_v63 = vmax.f32 %v2531_v23, 0.0  ;;  %v3563_v48 = vperm.slane %v2273_v59, %v6799_v13 }
 0x472   : > { %v3564_v27 = vsel %vm3353_vm7, %v3563_v48, %v3562_v25  ;;  %2820 = vmatmul.bf16.gmra.mxu2 %v6091_v41  ;;  %2869 = vmatmul.bf16.gmra.mxu3 %v6091_v41  ;;  %v2605_v58 = vmax.f32 %v2568_v40, %v2569_v63  ;;  %v6803_v48 = vld [vmem:[#allocation20_spill] sm:$0xff] }
 0x474   : > { %v6095_v53 = vpop.f32.mrf.mxu0  ;;  %v6097_v1 = vpop.f32.mrf.mxu1  ;;  %2606 = vmax.xlane.f32.xlu2 %v2605_v58 }
 0x475   : > { %v2484_v28 = vpop.f32.mrf.mxu2  ;;  %v2533_v47 = vpop.f32.mrf.mxu3 }
 0x476   : > { %v2485_v57 = vadd.f32 %v2484_v28, %v6801_v50  ;;  %v2534_v9 = vadd.f32 %v2533_v47, %v6801_v50 }
 0x477   : > { %v2276_v15 = vpop.xlane.xlu0 %2275 }
 0x478   : > { %v2570_v29 = vmax.f32 %v2485_v57, 0.0  ;;  %v2571_v25 = vmax.f32 %v2534_v9, 0.0  ;;  %v3565_v45 = vperm.slane %v2276_v15, %v6802_v46  ;;  %v6804_v57 = vld [vmem:[#allocation19_spill] sm:$0xff] }
 0x47a   : > { %v3566_v39 = vsel %vm3357_vm8, %v3565_v45, %v3564_v27  ;;  %v2608_v19 = vmax.f32 %v2570_v29, %v2571_v25  ;;  %v6112_v27 = vld [vmem:[%s6430_s3 + $0x20] sm:$0xff] }
 0x47b   : > { %6805 = vst [vmem:[#allocation35_spill] sm:$0xff] %v6112_v27 }
 0x47c   : > { %v3024_v23 = vpop.f32.mrf.mxu0  ;;  %v6103_v59 = vpop.f32.mrf.mxu1  ;;  %2609 = vmax.xlane.f32.xlu0 %v2608_v19 }
 0x47d   : > { %v2486_v40 = vpop.f32.mrf.mxu2  ;;  %v2535_v63 = vpop.f32.mrf.mxu3 }
 0x47e   : > { %v2487_v58 = vadd.f32 %v2486_v40, %v6803_v48  ;;  %v2536_v28 = vadd.f32 %v2535_v63, %v6803_v48  ;;  %v6806_v63 = vld [vmem:[#allocation21_spill] sm:$0xff] }
 0x47f   : > { %v2279_v41 = vpop.xlane.xlu1 %2278 }
 0x480   : > { %v2572_v47 = vmax.f32 %v2487_v58, 0.0  ;;  %v2573_v50 = vmax.f32 %v2536_v28, 0.0  ;;  %v3567_v9 = vperm.slane %v2279_v41, %v6804_v57  ;;  %v6807_v57 = vld [vmem:[#allocation40_spill] sm:$0xff] }
 0x482   : > { %v3568_v15 = vsel %vm3361_vm9, %v3567_v9, %v3566_v39  ;;  %2825 = vmatmul.bf16.gmra.mxu2 %v6112_v27  ;;  %2874 = vmatmul.bf16.gmra.mxu3 %v6112_v27  ;;  %v2611_v29 = vmax.f32 %v2572_v47, %v2573_v50 }
 0x484   : > { %v3027_v25 = vpop.f32.mrf.mxu0  ;;  %v3076_v45 = vpop.f32.mrf.mxu1  ;;  %2612 = vmax.xlane.f32.xlu1 %v2611_v29  ;;  %v6808_v29 = vld [vmem:[#allocation23_spill] sm:$0xff] }
 0x485   : > { %v2489_v19 = vpop.f32.mrf.mxu2  ;;  %v2538_v40 = vpop.f32.mrf.mxu3 }
 0x486   : > { %v2490_v58 = vadd.f32 %v2489_v19, %v6806_v63  ;;  %v2539_v41 = vadd.f32 %v2538_v40, %v6806_v63  ;;  %v6809_v63 = vld [vmem:[#allocation22_spill] sm:$0xff] }
 0x487   : > { %v2282_v39 = vpop.xlane.xlu2 %2281 }
 0x488   : > { %v2574_v28 = vmax.f32 %v2490_v58, 0.0  ;;  %v2575_v9 = vmax.f32 %v2539_v41, 0.0  ;;  %v3569_v48 = vperm.slane %v2282_v39, %v6807_v57 }
 0x48a   : > { %v3570_v46 = vsel %vm3365_vm10, %v3569_v48, %v3568_v15  ;;  %v2614_v13 = vmax.f32 %v2574_v28, %v2575_v9  ;;  %v6127_v48 = vld [vmem:[%s6430_s3 + $0x28] sm:$0xff] }
 0x48b   : > { %6810 = vst [vmem:[#allocation37_spill] sm:$0xff] %v6127_v48 }
 0x48c   : > { %v3029_v36 = vpop.f32.mrf.mxu0  ;;  %v3078_v27 = vpop.f32.mrf.mxu1  ;;  %2615 = vmax.xlane.f32.xlu2 %v2614_v13 }
 0x48d   : > { %v2491_v50 = vpop.f32.mrf.mxu2  ;;  %v2540_v47 = vpop.f32.mrf.mxu3 }
 0x48e   : > { %v2492_v56 = vadd.f32 %v2491_v50, %v6808_v29  ;;  %v2541_v22 = vadd.f32 %v2540_v47, %v6808_v29 }
 0x48f   : > { %v2285_v19 = vpop.xlane.xlu0 %2284 }
 0x490   : > { %v2576_v12 = vmax.f32 %v2492_v56, 0.0  ;;  %v2577_v40 = vmax.f32 %v2541_v22, 0.0  ;;  %v3571_v58 = vperm.slane %v2285_v19, %v6809_v63  ;;  %v6811_v22 = vld [vmem:[#allocation24_spill] sm:$0xff] }
 0x492   : > { %v3572_v41 = vsel %vm3369_vm11, %v3571_v58, %v3570_v46  ;;  %2830 = vmatmul.bf16.gmra.mxu2 %v6127_v48  ;;  %2879 = vmatmul.bf16.gmra.mxu3 %v6127_v48  ;;  %v2617_v13 = vmax.f32 %v2576_v12, %v2577_v40  ;;  %v6812_v58 = vld [vmem:[#allocation42_spill] sm:$0xff]  ;;  %v3025_v40 = vadd.f32 %v3024_v23, %v4507_v54 }
 0x494   : > { %v3032_v15 = vpop.f32.mrf.mxu0  ;;  %v3081_v39 = vpop.f32.mrf.mxu1  ;;  %2618 = vmax.xlane.f32.xlu0 %v2617_v13 }
 0x495   : > { %v2494_v28 = vpop.f32.mrf.mxu2  ;;  %v2543_v56 = vpop.f32.mrf.mxu3  ;;  %v3033_v48 = vadd.f32 %v3032_v15, %v6813_v34  ;;  %v3082_v12 = vadd.f32 %v3081_v39, %v6813_v34  ;;  %v3077_v15 = vadd.f32 %v3076_v45, %v4509_v55 }
 0x496   : > { %v2495_v9 = vadd.f32 %v2494_v28, %v6811_v22  ;;  %v2544_v50 = vadd.f32 %v2543_v56, %v6811_v22  ;;  %v6814_v28 = vld [vmem:[#allocation8_spill] sm:$0xff] }
 0x497   : > { %v2288_v46 = vpop.xlane.xlu1 %2287  ;;  %v3030_v20 = vadd.f32 %v3029_v36, %v6814_v28  ;;  %v3079_v56 = vadd.f32 %v3078_v27, %v6814_v28  ;;  %v3114_v39 = vmax.f32 %v3033_v48, 0.0  ;;  %v3074_v27 = vadd.f32 %v6103_v59, %v4507_v54  ;;  %v6153_v48 = vld [vmem:[%s6430_s3 + $0x30] sm:$0xff] }
 0x498   : > { %v2578_v47 = vmax.f32 %v2495_v9, 0.0  ;;  %v2579_v19 = vmax.f32 %v2544_v50, 0.0  ;;  %v3573_v63 = vperm.slane %v2288_v46, %v6812_v58  ;;  %v6815_v9 = vld [vmem:[#allocation6_spill] sm:$0xff]  ;;  %v3023_v59 = vadd.f32 %v6095_v53, %v4496_v51 }
 0x49a   : > { %v3574_v29 = vsel %vm3373_vm12, %v3573_v63, %v3572_v41  ;;  %v2620_v57 = vmax.f32 %v2578_v47, %v2579_v19  ;;  %v3028_v41 = vadd.f32 %v3027_v25, %v4509_v55  ;;  %v3113_v25 = vmax.f32 %v3079_v56, 0.0 }
 0x49b   : > { %v3069_v56 = vadd.f32 %v6082_v49, %v4538_v3 }
 0x49c   : > { %v3034_v13 = vpop.f32.mrf.mxu0  ;;  %v3083_v44 = vpop.f32.mrf.mxu1  ;;  %2621 = vmax.xlane.f32.xlu1 %v2620_v57  ;;  %v3115_v57 = vmax.f32 %v3082_v12, 0.0  ;;  %v3111_v12 = vmax.f32 %v3077_v15, 0.0 }
 0x49d   : > { %v3035_v50 = vadd.f32 %v3034_v13, %v6815_v9  ;;  %v3084_v46 = vadd.f32 %v3083_v44, %v6815_v9  ;;  %v2496_v58 = vpop.f32.mrf.mxu2  ;;  %v2545_v63 = vpop.f32.mrf.mxu3  ;;  %v3112_v9 = vmax.f32 %v3030_v20, 0.0  ;;  %v3072_v20 = vadd.f32 %v6097_v1, %v4496_v51 }
 0x49e   : > { %v2497_v34 = vadd.f32 %v2496_v58, %v4954_v14  ;;  %v2546_v23 = vadd.f32 %v2545_v63, %v4954_v14  ;;  %v3110_v58 = vmax.f32 %v3028_v41, 0.0  ;;  %v3018_v1 = vadd.f32 %v6072_v17, %v4527_v60 }
 0x49f   : > { %v3116_v47 = vmax.f32 %v3035_v50, 0.0  ;;  %v3117_v36 = vmax.f32 %v3084_v46, 0.0  ;;  %v2291_v19 = vpop.xlane.xlu2 %2290  ;;  %v3108_v50 = vmax.f32 %v3025_v40, 0.0  ;;  %v3109_v46 = vmax.f32 %v3074_v27, 0.0 }
 0x4a0   : > { %v2580_v13 = vmax.f32 %v2497_v34, 0.0  ;;  %v2581_v44 = vmax.f32 %v2546_v23, 0.0  ;;  %v3575_v28 = vperm.slane %v2291_v19, %v5246_v33  ;;  %v3130_v63 = vpack.c.bf16 %v3112_v9, %v3110_v58 }
 0x4a1   : > { %v3132_v22 = vpack.c.bf16 %v3116_v47, %v3114_v39  ;;  %v3133_v55 = vpack.c.bf16 %v3117_v36, %v3115_v57  ;;  %v3131_v34 = vpack.c.bf16 %v3113_v25, %v3111_v12  ;;  %v3107_v41 = vmax.f32 %v3072_v20, 0.0  ;;  %v6180_v12 = vld [vmem:[%s6430_s3 + $0x38] sm:$0xff] }
 0x4a2   : > { %v3576_v45 = vsel %vm3377_vm13, %v3575_v28, %v3574_v29  ;;  %2835 = vmatmul.bf16.gmra.mxu2 %v6153_v48  ;;  %2884 = vmatmul.bf16.gmra.mxu3 %v6153_v48  ;;  %v2623_v54 = vmax.f32 %v2580_v13, %v2581_v44  ;;  %v3020_v29 = vadd.f32 %v6080_v0, %v4538_v3  ;;  %v3105_v47 = vmax.f32 %v3069_v56, 0.0 }
 0x4a3   : > { %3134 = vmatpush.bf16.msrb.mxu2 %v3132_v22  ;;  %3183 = vmatpush.bf16.msrb.mxu3 %v3133_v55  ;;  %v3067_v0 = vadd.f32 %v6074_v7, %v4527_v60  ;;  %v3106_v22 = vmax.f32 %v3023_v59, 0.0  ;;  %v3129_v19 = vpack.c.bf16 %v3109_v46, %v3107_v41  ;;  %v3102_v17 = vmax.f32 %v3018_v1, 0.0 }
 0x4a4   : > { %2624 = vmax.xlane.f32.xlu2 %v2623_v54  ;;  %v3104_v57 = vmax.f32 %v3020_v29, 0.0 }
 0x4a5   : > { %v2499_v23 = vpop.f32.mrf.mxu2  ;;  %v2548_v53 = vpop.f32.mrf.mxu3  ;;  %v3128_v36 = vpack.c.bf16 %v3108_v50, %v3106_v22  ;;  %v3103_v44 = vmax.f32 %v3067_v0, 0.0 }
 0x4a6   : > { %v2500_v39 = vadd.f32 %v2499_v23, %v4972_v18  ;;  %v2549_v51 = vadd.f32 %v2548_v53, %v4972_v18  ;;  %v3126_v60 = vpack.c.bf16 %v3104_v57, %v3102_v17 }
 0x4a7   : > { %3135 = vmatpush.bf16.msrb.mxu2 %v3130_v63  ;;  %3184 = vmatpush.bf16.msrb.mxu3 %v3131_v34  ;;  %v2294_v3 = vpop.xlane.xlu0 %2293  ;;  %v3127_v7 = vpack.c.bf16 %v3105_v47, %v3103_v44 }
 0x4a8   : > { %v2582_v49 = vmax.f32 %v2500_v39, 0.0  ;;  %v2583_v40 = vmax.f32 %v2549_v51, 0.0  ;;  %v3577_v15 = vperm.slane %v2294_v3, %v5278_v10 }
 0x4aa   : > { %v3578_v27 = vsel %vm6816_vm14, %v3577_v15, %v3576_v45  ;;  %v2626_v13 = vmax.f32 %v2582_v49, %v2583_v40 }
 0x4ab   : > { %3136 = vmatpush.bf16.msrb.mxu2 %v3128_v36  ;;  %3185 = vmatpush.bf16.msrb.mxu3 %v3129_v19 }
 0x4ac   : > { %2627 = vmax.xlane.f32.xlu0 %v2626_v13 }
 0x4ad   : > { %v2501_v28 = vpop.f32.mrf.mxu2  ;;  %v2550_v9 = vpop.f32.mrf.mxu3 }
 0x4ae   : > { %v2502_v25 = vadd.f32 %v2501_v28, %v4997_v16  ;;  %v2551_v55 = vadd.f32 %v2550_v9, %v4997_v16 }
 0x4af   : > { %3137 = vmatpush.bf16.msrb.mxu2 %v3126_v60  ;;  %3186 = vmatpush.bf16.msrb.mxu3 %v3127_v7  ;;  %v2297_v54 = vpop.xlane.xlu1 %2296 }
 0x4b0   : > { %v2584_v59 = vmax.f32 %v2502_v25, 0.0  ;;  %v2585_v20 = vmax.f32 %v2551_v55, 0.0  ;;  %v3579_v45 = vperm.slane %v2297_v54, %v5296_v21 }
 0x4b2   : > { %v3580_v58 = vsel %vm6817_vm1, %v3579_v45, %v3578_v27  ;;  %2840 = vmatmul.bf16.gmra.mxu2 %v6180_v12  ;;  %2889 = vmatmul.bf16.gmra.mxu3 %v6180_v12  ;;  %v2629_v29 = vmax.f32 %v2584_v59, %v2585_v20 }
 0x4b3   : > { %3138 = vmatpush.bf16.msrb.mxu2 %v6060_v31  ;;  %3187 = vmatpush.bf16.msrb.mxu3 %v6062_v24 }
 0x4b4   : > { %2630 = vmax.xlane.f32.xlu1 %v2629_v29 }
 0x4b5   : > { %v2504_v56 = vpop.f32.mrf.mxu2  ;;  %v2553_v50 = vpop.f32.mrf.mxu3 }
 0x4b6   : > { %v2505_v46 = vadd.f32 %v2504_v56, %v5011_v30  ;;  %v2554_v63 = vadd.f32 %v2553_v50, %v5011_v30 }
 0x4b7   : > { %3139 = vmatpush.bf16.msrb.mxu2 %v6037_v52  ;;  %3188 = vmatpush.bf16.msrb.mxu3 %v6039_v35  ;;  %v2300_v34 = vpop.xlane.xlu2 %2299 }
 0x4b8   : > { %v2586_v23 = vmax.f32 %v2505_v46, 0.0  ;;  %v2587_v53 = vmax.f32 %v2554_v63, 0.0  ;;  %v3581_v39 = vperm.slane %v2300_v34, %v5318_v37  ;;  %v6818_v46 = vld [vmem:[#allocation30_spill] sm:$0xff] }
 0x4ba   : > { %v3582_v31 = vsel %vm3389_vm15, %v3581_v39, %v3580_v58  ;;  %v2632_v51 = vmax.f32 %v2586_v23, %v2587_v53 }
 0x4bb   : > { %v6194_v24 = vsel %vm574_vm0, %v6009_v5, %v3582_v31  ;;  %3140 = vmatpush.bf16.msrb.mxu2 %v6019_v42  ;;  %3189 = vmatpush.bf16.msrb.mxu3 %v6021_v8  ;;  %v4170_v5 = vld [vmem:[%s6430_s3] sm:$0xff]  ;;  %vm6839_vm0 = vmmov %vm6816_vm14 }
 0x4bc   : > { %2633 = vmax.xlane.f32.xlu2 %v2632_v51  ;;  %vm6840_vm14 = vmmov %vm6817_vm1  ;;  %vm3735_vm1 = vcmask 1044480  }
 0x4bd   : > { %v2506_v52 = vpop.f32.mrf.mxu2  ;;  %v2555_v1 = vpop.f32.mrf.mxu3 }
 0x4be   : > { %v2507_v35 = vadd.f32 %v2506_v52, %v5028_v26  ;;  %v2556_v0 = vadd.f32 %v2555_v1, %v5028_v26 }
 0x4bf   : > { %3141 = vmatpush.bf16.msrb.mxu2 %v5991_v43  ;;  %3190 = vmatpush.bf16.msrb.mxu3 %v5993_v11  ;;  %v2592_v8 = vpop.xlane.xlu0 %2591 }
 0x4c0   : > { %v2588_v22 = vmax.f32 %v2507_v35, 0.0  ;;  %v2589_v41 = vmax.f32 %v2556_v0, 0.0  ;;  %v3600_v11 = vperm.slane %v2592_v8, %v6783_v6  ;;  %v6820_v0 = vld [vmem:[#allocation32_spill] sm:$0xff] }
 0x4c2   : > { %3142 = vmatmul.bf16.vlgmr.msrb.gmra.mxu2 %v4170_v5  ;;  %3191 = vmatmul.bf16.vlgmr.msrb.gmra.mxu3 %v4170_v5  ;;  %v2635_v42 = vmax.f32 %v2588_v22, %v2589_v41  ;;  %v6821_v5 = vld [vmem:[#allocation31_spill] sm:$0xff] }
 0x4c4   : > { %2636 = vmax.xlane.f32.xlu0 %v2635_v42 }
 0x4c5   : > { %v2806_v3 = vpop.f32.mrf.mxu2  ;;  %v2855_v49 = vpop.f32.mrf.mxu3 }
 0x4c6   : > { %v2807_v40 = vadd.f32 %v2806_v3, %v6782_v2  ;;  %v2856_v15 = vadd.f32 %v2855_v49, %v6782_v2  ;;  %v6822_v49 = vld [vmem:[#allocation16_spill] sm:$0xff] }
 0x4c7   : > { %v2595_v43 = vpop.xlane.xlu1 %2594 }
 0x4c8   : > { %v2895_v57 = vmax.f32 %v2807_v40, 0.0  ;;  %v2896_v47 = vmax.f32 %v2856_v15, 0.0  ;;  %v3601_v36 = vperm.slane %v2595_v43, %v6784_v38 }
 0x4ca   : > { %v3602_v19 = vsel %vm3333_vm2, %v3601_v36, %v3600_v11  ;;  %v2927_v27 = vmax.f32 %v2895_v57, %v2896_v47  ;;  %v6823_v47 = vld [vmem:[#allocation34_spill] sm:$0xff] }
 0x4cc   : > { %2928 = vmax.xlane.f32.xlu1 %v2927_v27 }
 0x4cd   : > { %v2808_v13 = vpop.f32.mrf.mxu2  ;;  %v2857_v17 = vpop.f32.mrf.mxu3 }
 0x4ce   : > { %v2809_v44 = vadd.f32 %v2808_v13, %v6787_v32  ;;  %v2858_v60 = vadd.f32 %v2857_v17, %v6787_v32 }
 0x4cf   : > { %v2598_v7 = vpop.xlane.xlu2 %2597 }
 0x4d0   : > { %v2897_v28 = vmax.f32 %v2809_v44, 0.0  ;;  %v2898_v9 = vmax.f32 %v2858_v60, 0.0  ;;  %v3603_v25 = vperm.slane %v2598_v7, %v6788_v4  ;;  %v6824_v44 = vld [vmem:[#allocation17_spill] sm:$0xff] }
 0x4d2   : > { %v3604_v55 = vsel %vm3337_vm3, %v3603_v25, %v3602_v19  ;;  %3147 = vmatmul.bf16.gmra.mxu2 %v6045_v61  ;;  %3196 = vmatmul.bf16.gmra.mxu3 %v6045_v61  ;;  %v2930_v54 = vmax.f32 %v2897_v28, %v2898_v9  ;;  %v6819_v61 = vld [vmem:[#allocation15_spill] sm:$0xff] }
 0x4d4   : > { %2931 = vmax.xlane.f32.xlu2 %v2930_v54 }
 0x4d5   : > { %v2811_v59 = vpop.f32.mrf.mxu2  ;;  %v2860_v20 = vpop.f32.mrf.mxu3 }
 0x4d6   : > { %v2812_v45 = vadd.f32 %v2811_v59, %v6789_v62  ;;  %v2861_v58 = vadd.f32 %v2860_v20, %v6789_v62  ;;  %v6826_v20 = vld [vmem:[#allocation33_spill] sm:$0xff] }
 0x4d7   : > { %v2601_v29 = vpop.xlane.xlu0 %2600 }
 0x4d8   : > { %v2899_v56 = vmax.f32 %v2812_v45, 0.0  ;;  %v2900_v50 = vmax.f32 %v2861_v58, 0.0  ;;  %v3605_v63 = vperm.slane %v2601_v29, %v6818_v46 }
 0x4da   : > { %v3606_v34 = vsel %vm3341_vm4, %v3605_v63, %v3604_v55  ;;  %v2933_v23 = vmax.f32 %v2899_v56, %v2900_v50  ;;  %v6825_v55 = vld [vmem:[#allocation36_spill] sm:$0xff]  ;;  %v6827_v56 = vld [vmem:[#allocation18_spill] sm:$0xff] }
 0x4dc   : > { %2934 = vmax.xlane.f32.xlu0 %v2933_v23 }
 0x4dd   : > { %v2813_v53 = vpop.f32.mrf.mxu2  ;;  %v2862_v39 = vpop.f32.mrf.mxu3 }
 0x4de   : > { %v2814_v31 = vadd.f32 %v2813_v53, %v6819_v61  ;;  %v2863_v51 = vadd.f32 %v2862_v39, %v6819_v61  ;;  %v6828_v39 = vld [vmem:[#allocation38_spill] sm:$0xff] }
 0x4df   : > { %v2604_v52 = vpop.xlane.xlu1 %2603 }
 0x4e0   : > { %v2901_v1 = vmax.f32 %v2814_v31, 0.0  ;;  %v2902_v35 = vmax.f32 %v2863_v51, 0.0  ;;  %v3607_v22 = vperm.slane %v2604_v52, %v6820_v0 }
 0x4e2   : > { %v3608_v41 = vsel %vm3345_vm5, %v3607_v22, %v3606_v34  ;;  %3152 = vmatmul.bf16.gmra.mxu2 %v6821_v5  ;;  %3201 = vmatmul.bf16.gmra.mxu3 %v6821_v5  ;;  %v2936_v42 = vmax.f32 %v2901_v1, %v2902_v35  ;;  %v6829_v22 = vld [vmem:[#allocation20_spill] sm:$0xff] }
 0x4e4   : > { %2937 = vmax.xlane.f32.xlu1 %v2936_v42 }
 0x4e5   : > { %v2816_v8 = vpop.f32.mrf.mxu2  ;;  %v2865_v3 = vpop.f32.mrf.mxu3 }
 0x4e6   : > { %v2817_v40 = vadd.f32 %v2816_v8, %v6822_v49  ;;  %v2866_v15 = vadd.f32 %v2865_v3, %v6822_v49 }
 0x4e7   : > { %v2607_v43 = vpop.xlane.xlu2 %2606 }
 0x4e8   : > { %v2903_v11 = vmax.f32 %v2817_v40, 0.0  ;;  %v2904_v57 = vmax.f32 %v2866_v15, 0.0  ;;  %v3609_v36 = vperm.slane %v2607_v43, %v6823_v47  ;;  %v6830_v40 = vld [vmem:[#allocation19_spill] sm:$0xff] }
 0x4ea   : > { %v3610_v19 = vsel %vm3349_vm6, %v3609_v36, %v3608_v41  ;;  %v2939_v27 = vmax.f32 %v2903_v11, %v2904_v57  ;;  %v6831_v11 = vld [vmem:[#allocation35_spill] sm:$0xff] }
 0x4ec   : > { %2940 = vmax.xlane.f32.xlu2 %v2939_v27  ;;  %v6832_v27 = vld [vmem:[#allocation21_spill] sm:$0xff] }
 0x4ed   : > { %v2818_v13 = vpop.f32.mrf.mxu2  ;;  %v2867_v17 = vpop.f32.mrf.mxu3 }
 0x4ee   : > { %v2819_v60 = vadd.f32 %v2818_v13, %v6824_v44  ;;  %v2868_v7 = vadd.f32 %v2867_v17, %v6824_v44 }
 0x4ef   : > { %v2610_v28 = vpop.xlane.xlu0 %2609 }
 0x4f0   : > { %v2905_v9 = vmax.f32 %v2819_v60, 0.0  ;;  %v2906_v25 = vmax.f32 %v2868_v7, 0.0  ;;  %v3611_v54 = vperm.slane %v2610_v28, %v6825_v55 }
 0x4f2   : > { %v3612_v59 = vsel %vm3353_vm7, %v3611_v54, %v3610_v19  ;;  %3157 = vmatmul.bf16.gmra.mxu2 %v6826_v20  ;;  %3206 = vmatmul.bf16.gmra.mxu3 %v6826_v20  ;;  %v2942_v45 = vmax.f32 %v2905_v9, %v2906_v25  ;;  %v6833_v9 = vld [vmem:[#allocation40_spill] sm:$0xff] }
 0x4f4   : > { %2943 = vmax.xlane.f32.xlu0 %v2942_v45 }
 0x4f5   : > { %v2821_v58 = vpop.f32.mrf.mxu2  ;;  %v2870_v29 = vpop.f32.mrf.mxu3 }
 0x4f6   : > { %v2822_v50 = vadd.f32 %v2821_v58, %v6827_v56  ;;  %v2871_v63 = vadd.f32 %v2870_v29, %v6827_v56  ;;  %v6834_v58 = vld [vmem:[#allocation23_spill] sm:$0xff] }
 0x4f7   : > { %v2613_v34 = vpop.xlane.xlu1 %2612 }
 0x4f8   : > { %v2907_v23 = vmax.f32 %v2822_v50, 0.0  ;;  %v2908_v53 = vmax.f32 %v2871_v63, 0.0  ;;  %v3613_v31 = vperm.slane %v2613_v34, %v6828_v39 }
 0x4fa   : > { %v3614_v51 = vsel %vm3357_vm8, %v3613_v31, %v3612_v59  ;;  %v2945_v52 = vmax.f32 %v2907_v23, %v2908_v53  ;;  %v6835_v53 = vld [vmem:[#allocation22_spill] sm:$0xff] }
 0x4fc   : > { %2946 = vmax.xlane.f32.xlu1 %v2945_v52  ;;  %v6836_v52 = vld [vmem:[#allocation37_spill] sm:$0xff] }
 0x4fd   : > { %v2823_v1 = vpop.f32.mrf.mxu2  ;;  %v2872_v35 = vpop.f32.mrf.mxu3 }
 0x4fe   : > { %v2824_v41 = vadd.f32 %v2823_v1, %v6829_v22  ;;  %v2873_v5 = vadd.f32 %v2872_v35, %v6829_v22 }
 0x4ff   : > { %v2616_v42 = vpop.xlane.xlu2 %2615 }
 0x500   : > { %v2909_v8 = vmax.f32 %v2824_v41, 0.0  ;;  %v2910_v3 = vmax.f32 %v2873_v5, 0.0  ;;  %v3615_v15 = vperm.slane %v2616_v42, %v6830_v40  ;;  %v6837_v5 = vld [vmem:[#allocation24_spill] sm:$0xff] }
 0x502   : > { %v3616_v43 = vsel %vm3361_vm9, %v3615_v15, %v3614_v51  ;;  %3162 = vmatmul.bf16.gmra.mxu2 %v6831_v11  ;;  %3211 = vmatmul.bf16.gmra.mxu3 %v6831_v11  ;;  %v2948_v57 = vmax.f32 %v2909_v8, %v2910_v3  ;;  %v6838_v11 = vld [vmem:[#allocation42_spill] sm:$0xff] }
 0x504   : > { %2949 = vmax.xlane.f32.xlu2 %v2948_v57 }
 0x505   : > { %v2826_v36 = vpop.f32.mrf.mxu2  ;;  %v2875_v19 = vpop.f32.mrf.mxu3 }
 0x506   : > { %v2827_v13 = vadd.f32 %v2826_v36, %v6832_v27  ;;  %v2876_v17 = vadd.f32 %v2875_v19, %v6832_v27 }
 0x507   : > { %v2619_v60 = vpop.xlane.xlu0 %2618 }
 0x508   : > { %v2911_v7 = vmax.f32 %v2827_v13, 0.0  ;;  %v2912_v28 = vmax.f32 %v2876_v17, 0.0  ;;  %v3617_v25 = vperm.slane %v2619_v60, %v6833_v9 }
 0x50a   : > { %v3618_v54 = vsel %vm3365_vm10, %v3617_v25, %v3616_v43  ;;  %v2951_v59 = vmax.f32 %v2911_v7, %v2912_v28 }
 0x50c   : > { %2952 = vmax.xlane.f32.xlu0 %v2951_v59 }
 0x50d   : > { %v2828_v20 = vpop.f32.mrf.mxu2  ;;  %v2877_v45 = vpop.f32.mrf.mxu3 }
 0x50e   : > { %v2829_v29 = vadd.f32 %v2828_v20, %v6834_v58  ;;  %v2878_v50 = vadd.f32 %v2877_v45, %v6834_v58 }
 0x50f   : > { %v2622_v63 = vpop.xlane.xlu1 %2621 }
 0x510   : > { %v2913_v34 = vmax.f32 %v2829_v29, 0.0  ;;  %v2914_v23 = vmax.f32 %v2878_v50, 0.0  ;;  %v3619_v31 = vperm.slane %v2622_v63, %v6835_v53 }
 0x512   : > { %v3620_v51 = vsel %vm3369_vm11, %v3619_v31, %v3618_v54  ;;  %3167 = vmatmul.bf16.gmra.mxu2 %v6836_v52  ;;  %3216 = vmatmul.bf16.gmra.mxu3 %v6836_v52  ;;  %v2954_v1 = vmax.f32 %v2913_v34, %v2914_v23 }
 0x514   : > { %2955 = vmax.xlane.f32.xlu1 %v2954_v1 }
 0x515   : > { %v2831_v35 = vpop.f32.mrf.mxu2  ;;  %v2880_v41 = vpop.f32.mrf.mxu3 }
 0x516   : > { %v2832_v42 = vadd.f32 %v2831_v35, %v6837_v5  ;;  %v2881_v8 = vadd.f32 %v2880_v41, %v6837_v5 }
 0x517   : > { %v2625_v3 = vpop.xlane.xlu2 %2624 }
 0x518   : > { %v2915_v15 = vmax.f32 %v2832_v42, 0.0  ;;  %v2916_v43 = vmax.f32 %v2881_v8, 0.0  ;;  %v3621_v57 = vperm.slane %v2625_v3, %v6838_v11 }
 0x51a   : > { %v3622_v36 = vsel %vm3373_vm12, %v3621_v57, %v3620_v51  ;;  %v2957_v19 = vmax.f32 %v2915_v15, %v2916_v43 }
 0x51c   : > { %2958 = vmax.xlane.f32.xlu2 %v2957_v19 }
 0x51d   : > { %v2833_v13 = vpop.f32.mrf.mxu2  ;;  %v2882_v17 = vpop.f32.mrf.mxu3 }
 0x51e   : > { %v2834_v60 = vadd.f32 %v2833_v13, %v4954_v14  ;;  %v2883_v7 = vadd.f32 %v2882_v17, %v4954_v14 }
 0x51f   : > { %v2628_v28 = vpop.xlane.xlu0 %2627 }
 0x520   : > { %v2917_v25 = vmax.f32 %v2834_v60, 0.0  ;;  %v2918_v54 = vmax.f32 %v2883_v7, 0.0  ;;  %v3623_v59 = vperm.slane %v2628_v28, %v5246_v33 }
 0x522   : > { %v3624_v20 = vsel %vm3377_vm13, %v3623_v59, %v3622_v36  ;;  %3172 = vmatmul.bf16.gmra.mxu2 %v6153_v48  ;;  %3221 = vmatmul.bf16.gmra.mxu3 %v6153_v48  ;;  %v2960_v45 = vmax.f32 %v2917_v25, %v2918_v54 }
 0x524   : > { %2961 = vmax.xlane.f32.xlu0 %v2960_v45 }
 0x525   : > { %v2836_v29 = vpop.f32.mrf.mxu2  ;;  %v2885_v50 = vpop.f32.mrf.mxu3 }
 0x526   : > { %v2837_v63 = vadd.f32 %v2836_v29, %v4972_v18  ;;  %v2886_v34 = vadd.f32 %v2885_v50, %v4972_v18 }
 0x527   : > { %v2631_v23 = vpop.xlane.xlu1 %2630 }
 0x528   : > { %v2919_v31 = vmax.f32 %v2837_v63, 0.0  ;;  %v2920_v51 = vmax.f32 %v2886_v34, 0.0  ;;  %v3625_v52 = vperm.slane %v2631_v23, %v5278_v10 }
 0x52a   : > { %v3626_v1 = vsel %vm6839_vm0, %v3625_v52, %v3624_v20  ;;  %v2963_v35 = vmax.f32 %v2919_v31, %v2920_v51 }
 0x52c   : > { %2964 = vmax.xlane.f32.xlu0 %v2963_v35 }
 0x52d   : > { %v2838_v41 = vpop.f32.mrf.mxu2  ;;  %v2887_v42 = vpop.f32.mrf.mxu3 }
 0x52e   : > { %v2839_v48 = vadd.f32 %v2838_v41, %v4997_v16  ;;  %v2888_v8 = vadd.f32 %v2887_v42, %v4997_v16 }
 0x52f   : > { %v2634_v3 = vpop.xlane.xlu2 %2633 }
 0x530   : > { %v2921_v15 = vmax.f32 %v2839_v48, 0.0  ;;  %v2922_v43 = vmax.f32 %v2888_v8, 0.0  ;;  %v3627_v57 = vperm.slane %v2634_v3, %v5296_v21 }
 0x532   : > { %v3628_v36 = vsel %vm6840_vm14, %v3627_v57, %v3626_v1  ;;  %3177 = vmatmul.bf16.gmra.mxu2 %v6180_v12  ;;  %3226 = vmatmul.bf16.gmra.mxu3 %v6180_v12  ;;  %v2966_v19 = vmax.f32 %v2921_v15, %v2922_v43  ;;  %vm3737_vm14 = vcmask 1045504  }
 0x534   : > { %2967 = vmax.xlane.f32.xlu2 %v2966_v19 }
 0x535   : > { %v2841_v13 = vpop.f32.mrf.mxu2  ;;  %v2890_v17 = vpop.f32.mrf.mxu3 }
 0x536   : > { %v2842_v60 = vadd.f32 %v2841_v13, %v5011_v30  ;;  %v2891_v7 = vadd.f32 %v2890_v17, %v5011_v30 }
 0x537   : > { %v2637_v28 = vpop.xlane.xlu0 %2636 }
 0x538   : > { %v2923_v25 = vmax.f32 %v2842_v60, 0.0  ;;  %v2924_v54 = vmax.f32 %v2891_v7, 0.0  ;;  %v3629_v59 = vperm.slane %v2637_v28, %v5318_v37 }
 0x53a   : > { %v3630_v20 = vsel %vm3389_vm15, %v3629_v59, %v3628_v36  ;;  %v2969_v45 = vmax.f32 %v2923_v25, %v2924_v54 }
 0x53b   : > { %v6281_v29 = vsel %vm3735_vm1, %v6194_v24, %v3630_v20  ;;  %vm6841_vm1 = vcmask 982912  }
 0x53c   : > { %2970 = vmax.xlane.f32.xlu1 %v2969_v45 }
 0x53d   : > { %v2843_v12 = vpop.f32.mrf.mxu2  ;;  %v2892_v50 = vpop.f32.mrf.mxu3 }
 0x53e   : > { %v2844_v63 = vadd.f32 %v2843_v12, %v5028_v26  ;;  %v2893_v34 = vadd.f32 %v2892_v50, %v5028_v26 }
 0x53f   : > { %v2929_v52 = vpop.xlane.xlu1 %2928 }
 0x540   : > { %v2925_v23 = vmax.f32 %v2844_v63, 0.0  ;;  %v2926_v31 = vmax.f32 %v2893_v34, 0.0  ;;  %v3648_v48 = vperm.slane %v2929_v52, %v6783_v6 }
 0x542   : > { %v6285_v51 = vmax.f32 %v2925_v23, %v2926_v31 }
 0x545   : > { %v3143_v1 = vpop.f32.mrf.mxu2  ;;  %v3192_v35 = vpop.f32.mrf.mxu3 }
 0x546   : > { %v3144_v41 = vadd.f32 %v3143_v1, %v6782_v2  ;;  %v3193_v42 = vadd.f32 %v3192_v35, %v6782_v2 }
 0x547   : > { %v2932_v24 = vpop.xlane.xlu2 %2931 }
 0x548   : > { %v3232_v8 = vmax.f32 %v3144_v41, 0.0  ;;  %v3233_v3 = vmax.f32 %v3193_v42, 0.0  ;;  %v3649_v15 = vperm.slane %v2932_v24, %v6784_v38 }
 0x54a   : > { %v6292_v43 = vsel %vm3333_vm2, %v3649_v15, %v3648_v48  ;;  %v3264_v57 = vmax.f32 %v3232_v8, %v3233_v3 }
 0x54c   : > { %3265 = vmax.xlane.f32.xlu1 %v3264_v57 }
 0x54d   : > { %v3145_v36 = vpop.f32.mrf.mxu2  ;;  %v3194_v19 = vpop.f32.mrf.mxu3 }
 0x54e   : > { %v3146_v13 = vadd.f32 %v3145_v36, %v6787_v32  ;;  %v3195_v17 = vadd.f32 %v3194_v19, %v6787_v32 }
 0x550   : > { %v3234_v60 = vmax.f32 %v3146_v13, 0.0  ;;  %v3235_v2 = vmax.f32 %v3195_v17, 0.0 }
 0x552   : > { %v3267_v7 = vmax.f32 %v3234_v60, %v3235_v2 }
 0x554   : > { %3268 = vmax.xlane.f32.xlu2 %v3267_v7 }
 0x555   : > { %v3148_v28 = vpop.f32.mrf.mxu2  ;;  %v3197_v25 = vpop.f32.mrf.mxu3 }
 0x556   : > { %v3149_v54 = vadd.f32 %v3148_v28, %v6789_v62  ;;  %v3198_v59 = vadd.f32 %v3197_v25, %v6789_v62 }
 0x558   : > { %v3236_v20 = vmax.f32 %v3149_v54, 0.0  ;;  %v3237_v45 = vmax.f32 %v3198_v59, 0.0 }
 0x55a   : > { %v3270_v12 = vmax.f32 %v3236_v20, %v3237_v45 }
 0x55c   : > { %3271 = vmax.xlane.f32.xlu0 %v3270_v12 }
 0x55d   : > { %v3150_v50 = vpop.f32.mrf.mxu2  ;;  %v3199_v63 = vpop.f32.mrf.mxu3 }
 0x55e   : > { %v3151_v34 = vadd.f32 %v3150_v50, %v6819_v61  ;;  %v3200_v32 = vadd.f32 %v3199_v63, %v6819_v61 }
 0x560   : > { %v3238_v23 = vmax.f32 %v3151_v34, 0.0  ;;  %v3239_v31 = vmax.f32 %v3200_v32, 0.0 }
 0x562   : > { %v3273_v52 = vmax.f32 %v3238_v23, %v3239_v31 }
 0x564   : > { %3274 = vmax.xlane.f32.xlu1 %v3273_v52 }
 0x565   : > { %v3153_v1 = vpop.f32.mrf.mxu2  ;;  %v3202_v35 = vpop.f32.mrf.mxu3 }
 0x566   : > { %v3154_v41 = vadd.f32 %v3153_v1, %v6822_v49  ;;  %v3203_v62 = vadd.f32 %v3202_v35, %v6822_v49 }
 0x568   : > { %v3240_v42 = vmax.f32 %v3154_v41, 0.0  ;;  %v3241_v24 = vmax.f32 %v3203_v62, 0.0 }
 0x56a   : > { %v3276_v48 = vmax.f32 %v3240_v42, %v3241_v24 }
 0x56c   : > { %3277 = vmax.xlane.f32.xlu2 %v3276_v48 }
 0x56d   : > { %v3155_v8 = vpop.f32.mrf.mxu2  ;;  %v3204_v3 = vpop.f32.mrf.mxu3 }
 0x56e   : > { %v3156_v15 = vadd.f32 %v3155_v8, %v6824_v44  ;;  %v3205_v61 = vadd.f32 %v3204_v3, %v6824_v44 }
 0x570   : > { %v3242_v57 = vmax.f32 %v3156_v15, 0.0  ;;  %v3243_v36 = vmax.f32 %v3205_v61, 0.0 }
 0x572   : > { %v3279_v19 = vmax.f32 %v3242_v57, %v3243_v36 }
 0x574   : > { %3280 = vmax.xlane.f32.xlu0 %v3279_v19 }
 0x575   : > { %v3158_v13 = vpop.f32.mrf.mxu2  ;;  %v3207_v17 = vpop.f32.mrf.mxu3 }
 0x576   : > { %v3159_v60 = vadd.f32 %v3158_v13, %v6827_v56  ;;  %v3208_v49 = vadd.f32 %v3207_v17, %v6827_v56 }
 0x578   : > { %v3244_v2 = vmax.f32 %v3159_v60, 0.0  ;;  %v3245_v7 = vmax.f32 %v3208_v49, 0.0 }
 0x57a   : > { %v3282_v28 = vmax.f32 %v3244_v2, %v3245_v7 }
 0x57c   : > { %3283 = vmax.xlane.f32.xlu1 %v3282_v28 }
 0x57d   : > { %v3160_v25 = vpop.f32.mrf.mxu2  ;;  %v3209_v54 = vpop.f32.mrf.mxu3 }
 0x57e   : > { %v3161_v59 = vadd.f32 %v3160_v25, %v6829_v22  ;;  %v3210_v44 = vadd.f32 %v3209_v54, %v6829_v22 }
 0x580   : > { %v3246_v20 = vmax.f32 %v3161_v59, 0.0  ;;  %v3247_v45 = vmax.f32 %v3210_v44, 0.0 }
 0x582   : > { %v3285_v12 = vmax.f32 %v3246_v20, %v3247_v45 }
 0x584   : > { %3286 = vmax.xlane.f32.xlu2 %v3285_v12 }
 0x585   : > { %v3163_v50 = vpop.f32.mrf.mxu2  ;;  %v3212_v63 = vpop.f32.mrf.mxu3 }
 0x586   : > { %v3164_v34 = vadd.f32 %v3163_v50, %v6832_v27  ;;  %v3213_v56 = vadd.f32 %v3212_v63, %v6832_v27 }
 0x588   : > { %v3248_v32 = vmax.f32 %v3164_v34, 0.0  ;;  %v3249_v23 = vmax.f32 %v3213_v56, 0.0 }
 0x58a   : > { %v3288_v31 = vmax.f32 %v3248_v32, %v3249_v23 }
 0x58c   : > { %3289 = vmax.xlane.f32.xlu0 %v3288_v31 }
 0x58d   : > { %v3165_v52 = vpop.f32.mrf.mxu2  ;;  %v3214_v1 = vpop.f32.mrf.mxu3 }
 0x58e   : > { %v3166_v35 = vadd.f32 %v3165_v52, %v6834_v58  ;;  %v3215_v22 = vadd.f32 %v3214_v1, %v6834_v58 }
 0x590   : > { %v3250_v41 = vmax.f32 %v3166_v35, 0.0  ;;  %v3251_v62 = vmax.f32 %v3215_v22, 0.0 }
 0x592   : > { %v3291_v42 = vmax.f32 %v3250_v41, %v3251_v62  ;;  %v2935_v62 = vpop.xlane.xlu0 %2934 }
 0x594   : > { %3292 = vmax.xlane.f32.xlu1 %v3291_v42 }
 0x595   : > { %v3168_v24 = vpop.f32.mrf.mxu2  ;;  %v3217_v48 = vpop.f32.mrf.mxu3 }
 0x596   : > { %v3169_v8 = vadd.f32 %v3168_v24, %v6837_v5  ;;  %v3218_v27 = vadd.f32 %v3217_v48, %v6837_v5  ;;  %v2938_v24 = vpop.xlane.xlu1 %2937 }
 0x598   : > { %v3252_v3 = vmax.f32 %v3169_v8, 0.0  ;;  %v3253_v15 = vmax.f32 %v3218_v27, 0.0  ;;  %v2941_v8 = vpop.xlane.xlu2 %2940 }
 0x59a   : > { %v3294_v61 = vmax.f32 %v3252_v3, %v3253_v15  ;;  %v2944_v42 = vpop.xlane.xlu0 %2943 }
 0x59c   : > { %3295 = vmax.xlane.f32.xlu2 %v3294_v61 }
 0x59d   : > { %v3170_v57 = vpop.f32.mrf.mxu2  ;;  %v3219_v36 = vpop.f32.mrf.mxu3 }
 0x59e   : > { %v3171_v19 = vadd.f32 %v3170_v57, %v4954_v14  ;;  %v3220_v58 = vadd.f32 %v3219_v36, %v4954_v14 }
 0x5a0   : > { %v3254_v13 = vmax.f32 %v3171_v19, 0.0  ;;  %v3255_v17 = vmax.f32 %v3220_v58, 0.0  ;;  %v2950_v3 = vpop.xlane.xlu2 %2949 }
 0x5a2   : > { %v3297_v60 = vmax.f32 %v3254_v13, %v3255_v17  ;;  %v2953_v48 = vpop.xlane.xlu0 %2952 }
 0x5a4   : > { %3298 = vmax.xlane.f32.xlu1 %v3297_v60 }
 0x5a5   : > { %v3173_v49 = vpop.f32.mrf.mxu2  ;;  %v3222_v2 = vpop.f32.mrf.mxu3 }
 0x5a6   : > { %v3174_v7 = vadd.f32 %v3173_v49, %v4972_v18  ;;  %v3223_v5 = vadd.f32 %v3222_v2, %v4972_v18 }
 0x5a8   : > { %v3256_v28 = vmax.f32 %v3174_v7, 0.0  ;;  %v3257_v25 = vmax.f32 %v3223_v5, 0.0  ;;  %v2959_v61 = vpop.xlane.xlu2 %2958  ;;  %v3651_v7 = vperm.slane %v2935_v62, %v6788_v4  ;;  %v3653_v5 = vperm.slane %v2938_v24, %v6818_v46 }
 0x5aa   : > { %v3300_v54 = vmax.f32 %v3256_v28, %v3257_v25  ;;  %v2962_v27 = vpop.xlane.xlu0 %2961  ;;  %v3655_v25 = vperm.slane %v2941_v8, %v6820_v0 }
 0x5ac   : > { %3301 = vmax.xlane.f32.xlu0 %v3300_v54  ;;  %v3657_v54 = vperm.slane %v2944_v42, %v6823_v47 }
 0x5ad   : > { %v3175_v59 = vpop.f32.mrf.mxu2  ;;  %v3224_v44 = vpop.f32.mrf.mxu3 }
 0x5ae   : > { %v3176_v20 = vadd.f32 %v3175_v59, %v4997_v16  ;;  %v3225_v14 = vadd.f32 %v3224_v44, %v4997_v16  ;;  %v3652_v59 = vsel %vm3337_vm3, %v3651_v7, %v6292_v43  ;;  %v3667_v43 = vperm.slane %v2959_v61, %v6835_v53 }
 0x5b0   : > { %v3258_v45 = vmax.f32 %v3176_v20, 0.0  ;;  %v3259_v12 = vmax.f32 %v3225_v14, 0.0  ;;  %v2968_v19 = vpop.xlane.xlu2 %2967  ;;  %v3654_v20 = vsel %vm3341_vm4, %v3653_v5, %v3652_v59  ;;  %v3661_v14 = vperm.slane %v2950_v3, %v6828_v39 }
 0x5b2   : > { %v3303_v50 = vmax.f32 %v3258_v45, %v3259_v12  ;;  %v2965_v57 = vpop.xlane.xlu0 %2964  ;;  %v3656_v45 = vsel %vm3345_vm5, %v3655_v25, %v3654_v20  ;;  %v3663_v12 = vperm.slane %v2953_v48, %v6830_v40 }
 0x5b4   : > { %2973 = vmax.xlane.f32.xlu0 %v6285_v51  ;;  %3304 = vmax.xlane.f32.xlu2 %v3303_v50 }
 0x5b5   : > { %v3178_v63 = vpop.f32.mrf.mxu2  ;;  %v3227_v34 = vpop.f32.mrf.mxu3 }
 0x5b6   : > { %v3179_v18 = vadd.f32 %v3178_v63, %v5011_v30  ;;  %v3228_v56 = vadd.f32 %v3227_v34, %v5011_v30  ;;  %v2947_v30 = vpop.xlane.xlu1 %2946  ;;  %v3658_v34 = vsel %vm3349_vm6, %v3657_v54, %v3656_v45 }
 0x5b7   : > { %v3659_v44 = vperm.slane %v2947_v30, %v6825_v55 }
 0x5b8   : > { %v3260_v32 = vmax.f32 %v3179_v18, 0.0  ;;  %v3261_v23 = vmax.f32 %v3228_v56, 0.0 }
 0x5b9   : > { %v3660_v56 = vsel %vm3353_vm7, %v3659_v44, %v3658_v34 }
 0x5ba   : > { %v3306_v31 = vmax.f32 %v3260_v32, %v3261_v23  ;;  %v3662_v32 = vsel %vm3357_vm8, %v3661_v14, %v3660_v56  ;;  %v3669_v23 = vperm.slane %v2962_v27, %v6838_v11 }
 0x5bc   : > { %3307 = vmax.xlane.f32.xlu1 %v3306_v31 }
 0x5bd   : > { %v3180_v52 = vpop.f32.mrf.mxu2  ;;  %v3229_v1 = vpop.f32.mrf.mxu3 }
 0x5be   : > { %v3181_v16 = vadd.f32 %v3180_v52, %v5028_v26  ;;  %v3230_v35 = vadd.f32 %v3229_v1, %v5028_v26  ;;  %v2956_v15 = vpop.xlane.xlu1 %2955  ;;  %v3664_v52 = vsel %vm3361_vm9, %v3663_v12, %v3662_v32  ;;  %v3671_v1 = vperm.slane %v2965_v57, %v5246_v33 }
 0x5bf   : > { %v3665_v18 = vperm.slane %v2956_v15, %v6833_v9 }
 0x5c0   : > { %v3262_v22 = vmax.f32 %v3181_v16, 0.0  ;;  %v3263_v41 = vmax.f32 %v3230_v35, 0.0  ;;  %v3673_v35 = vperm.slane %v2968_v19, %v5278_v10 }
 0x5c1   : > { %v3666_v16 = vsel %vm3365_vm10, %v3665_v18, %v3664_v52 }
 0x5c2   : > { %v3309_v51 = vmax.f32 %v3262_v22, %v3263_v41  ;;  %v3668_v22 = vsel %vm3369_vm11, %v3667_v43, %v3666_v16 }
 0x5c4   : > { %3310 = vmax.xlane.f32.xlu2 %v3309_v51  ;;  %v3670_v51 = vsel %vm3373_vm12, %v3669_v23, %v3668_v22 }
 0x5c5   : > { %v3672_v62 = vsel %vm3377_vm13, %v3671_v1, %v3670_v51 }
 0x5c6   : > { %v2971_v36 = vpop.xlane.xlu1 %2970  ;;  %v3674_v48 = vsel %vm6839_vm0, %v3673_v35, %v3672_v62 }
 0x5c7   : > { %v3269_v26 = vpop.xlane.xlu2 %3268  ;;  %v3675_v41 = vperm.slane %v2971_v36, %v5296_v21 }
 0x5c8   : > { %v3697_v8 = vperm.slane %v3269_v26, %v6784_v38 }
 0x5c9   : > { %v3676_v27 = vsel %vm6841_vm1, %v3675_v41, %v3674_v48 }
 0x5ce   : > { %v3266_v13 = vpop.xlane.xlu1 %3265 }
 0x5cf   : > { %v3272_v58 = vpop.xlane.xlu0 %3271  ;;  %v3696_v15 = vperm.slane %v3266_v13, %v6783_v6 }
 0x5d0   : > { %v3699_v3 = vperm.slane %v3272_v58, %v6788_v4 }
 0x5d1   : > { %v3698_v38 = vsel %vm3333_vm2, %v3697_v8, %v3696_v15  ;;  %vm6842_vm2 = vmmov %vm6839_vm0 }
 0x5d2   : > { %v3700_v5 = vsel %vm3337_vm3, %v3699_v3, %v3698_v38  ;;  %vm3739_vm3 = vcmask 1046528  }
 0x5d7   : > { %v3275_v60 = vpop.xlane.xlu1 %3274 }
 0x5d8   : > { %v3701_v61 = vperm.slane %v3275_v60, %v6818_v46 }
 0x5da   : > { %v3702_v6 = vsel %vm3341_vm4, %v3701_v61, %v3700_v5  ;;  %vm6843_vm4 = vmmov %vm6841_vm1 }
 0x5df   : > { %v3278_v49 = vpop.xlane.xlu2 %3277 }
 0x5e0   : > { %v3703_v19 = vperm.slane %v3278_v49, %v6820_v0 }
 0x5e2   : > { %v3704_v58 = vsel %vm3345_vm5, %v3703_v19, %v3702_v6 }
 0x5e7   : > { %v3281_v17 = vpop.xlane.xlu0 %3280 }
 0x5e8   : > { %v3705_v26 = vperm.slane %v3281_v17, %v6823_v47 }
 0x5ef   : > { %v3284_v28 = vpop.xlane.xlu1 %3283 }
 0x5f0   : > { %v3707_v4 = vperm.slane %v3284_v28, %v6825_v55 }
 0x5f7   : > { %v3287_v50 = vpop.xlane.xlu2 %3286 }
 0x5f8   : > { %v3709_v46 = vperm.slane %v3287_v50, %v6828_v39 }
 0x5ff   : > { %v3290_v2 = vpop.xlane.xlu0 %3289 }
 0x600   : > { %v3711_v13 = vperm.slane %v3290_v2, %v6830_v40 }
 0x607   : > { %v3293_v31 = vpop.xlane.xlu1 %3292 }
 0x608   : > { %v3713_v60 = vperm.slane %v3293_v31, %v6833_v9 }
 0x60f   : > { %v3296_v42 = vpop.xlane.xlu2 %3295 }
 0x610   : > { %v3715_v55 = vperm.slane %v3296_v42, %v6835_v53 }
 0x617   : > { %v3299_v57 = vpop.xlane.xlu1 %3298 }
 0x618   : > { %v3717_v49 = vperm.slane %v3299_v57, %v6838_v11 }
 0x61f   : > { %v3302_v63 = vpop.xlane.xlu0 %3301 }
 0x620   : > { %v3719_v40 = vperm.slane %v3302_v63, %v5246_v33 }
 0x627   : > { %v2974_v24 = vpop.xlane.xlu0 %2973  ;;  %v3305_v0 = vpop.xlane.xlu2 %3304 }
 0x628   : > { %v3677_v30 = vperm.slane %v2974_v24, %v5318_v37  ;;  %v3721_v9 = vperm.slane %v3305_v0, %v5278_v10 }
 0x62a   : > { %v3678_v36 = vsel %vm3389_vm15, %v3677_v30, %v3676_v27 }
 0x62b   : > { %v3738_v7 = vsel %vm3737_vm14, %v6281_v29, %v3678_v36  ;;  %v3706_v29 = vsel %vm3349_vm6, %v3705_v26, %v3704_v58 }
 0x62c   : > { %v3708_v47 = vsel %vm3353_vm7, %v3707_v4, %v3706_v29 }
 0x62d   : > { %v3710_v17 = vsel %vm3357_vm8, %v3709_v46, %v3708_v47 }
 0x62e   : > { %v3712_v28 = vsel %vm3361_vm9, %v3711_v13, %v3710_v17 }
 0x62f   : > { %v3308_v39 = vpop.xlane.xlu1 %3307  ;;  %v3714_v2 = vsel %vm3365_vm10, %v3713_v60, %v3712_v28 }
 0x630   : > { %v3716_v25 = vsel %vm3369_vm11, %v3715_v55, %v3714_v2  ;;  %v3723_v54 = vperm.slane %v3308_v39, %v5296_v21 }
 0x631   : > { %v3718_v53 = vsel %vm3373_vm12, %v3717_v49, %v3716_v25 }
 0x632   : > { %v3720_v11 = vsel %vm3377_vm13, %v3719_v40, %v3718_v53 }
 0x633   : > { %v3722_v59 = vsel %vm6842_vm2, %v3721_v9, %v3720_v11 }
 0x634   : > { %v3724_v10 = vsel %vm6843_vm4, %v3723_v54, %v3722_v59 }
 0x637   : > { %v3311_v33 = vpop.xlane.xlu2 %3310 }
 0x638   : > { %v3725_v44 = vperm.slane %v3311_v33, %v5318_v37 }
 0x63a   : > { %v3726_v21 = vsel %vm3389_vm15, %v3725_v44, %v3724_v10 }
 0x63b   : > { %v3740_v20 = vsel %vm3739_vm3, %v3738_v7, %v3726_v21 }
 0x63c   : > { %v3741_v14 = vmax.f32 %v3740_v20, 0.0 }
 0x63e   : > { %3742 = vst [vmem:[%s257_s14] sm:$0xff] %v3741_v14 }
 0x63f   : > { %4198 = shalt.err (!%p4195_p5)
}
 0x640   : > { %4068 = dma.vmem_to_hbm [thread:$0]  (%p4320_p4), %s3759_s15, 128, %s3761_s16, %s3744_s9  }
 0x641 PF: > { %p4074_p6 = scmp.ge.s32.totalorder %s4249_s23, 2  ;;  %s3772_s8 = sand.u32 1, %s4229_s18  }
 0x642   : > { %s3773_s10 = scalar_lea.sflag [#allocation3], %s3772_s8 }
 0x643   : > { %p4071_p7 = pnand %p4074_p6, %p4327_p8 }
 0x645   : > { %p4072_p9 = pneg %p4071_p7 }
 0x647   : > { %4224 = dma.done.wait (%p4072_p9), %s3773_s10, 128  }
 0x648   : > { %4226 = vsyncadd (%p4072_p9), %s3773_s10, 4294967168  ;;  %s18_s23 = sadd.s32 1, %s4249_s23   ;;  %s6844_s18 = smov %s4233_s19 }
 0x649   : > { %p15_p10 = scmp.ge.s32.totalorder %s18_s23, 4   ;;  %s6845_s19 = smov %s4237_s20 }
 0x64a   : > { %s6846_s20 = smov %s4333_s6  ;;  %s6847_s21 = smov %s4245_s22 }
 0x64b   : > { %s6848_s22 = smov %s6850_s26  ;;  %17 = sbr.rel (!%p15_p10) target bundleno = 4 (0x4), region = 86 }
 0x650   :  { %3779 = vsyncpa [#allocation3], 1 }
 0x651   :  { %3781 = vsyncpa [#allocation3 + $0x1], 1 }

</bundles_post_ra>
